<compile_context>
chip_gen: v7x
topology: tpu7x:2x2x1
jax: 0.10.0
libtpu: 0.0.40
codegen_flags: <defaults>
</compile_context>

<pallas_src>
import math
import functools

import jax
import jax.numpy as jnp
from jax import lax
from jax.experimental import pallas as pl
from jax.experimental.pallas import tpu as pltpu

F32 = jnp.float32
LN_EPS = 1e-5          # PyTorch nn.LayerNorm default
NEG_INF = -1e30        # finite "masked" value (avoids -inf - -inf NaNs)


# ------------------------------ small helpers ------------------------------

def _ceil_to(x, m):
    return ((x + m - 1) // m) * m


def _row_tile(M, target=256):
    """Row-tile size + padded extent for an (M, ...) slab."""
    if M <= target:
        return M, M
    return target, _ceil_to(M, target)


def _seq_tile(S, target=128):
    """Sequence-tile size (divides S, multiple of 8 when tiling)."""
    if S <= target:
        return S
    for t in range(target, 7, -1):
        if S % t == 0 and t % 8 == 0:
            return t
    return S


def _pad_rows(x, Mp):
    M = x.shape[0]
    return x if Mp == M else jnp.pad(x, ((0, Mp - M), (0, 0)))


def _gelu_exact(x):
    # exact (erf-based) GELU, matching torch nn.GELU() / activation='gelu'
    return 0.5 * x * (1.0 + lax.erf(x * (1.0 / math.sqrt(2.0))))


def _layernorm(x, g, b):
    mean = jnp.mean(x, axis=-1, keepdims=True)
    var = jnp.mean((x - mean) ** 2, axis=-1, keepdims=True)
    return (x - mean) * lax.rsqrt(var + LN_EPS) * g + b


# ------------------------------ Pallas kernels ------------------------------

def _linear_kernel(x_ref, w_ref, b_ref, o_ref, acc_ref, *, act):
    """Tiled matmul with f32 accumulator; bias (+optional GELU) on the last k step."""
    k = pl.program_id(2)

    @pl.when(k == 0)
    def _():
        acc_ref[...] = jnp.zeros_like(acc_ref)

    acc_ref[...] += jnp.dot(x_ref[...], w_ref[...],
                            preferred_element_type=jnp.float32)

    @pl.when(k == pl.num_programs(2) - 1)
    def _():
        y = acc_ref[...] + b_ref[...]
        if act == "gelu":
            y = _gelu_exact(y)
        o_ref[...] = y


def _ln_kernel(x_ref, g_ref, b_ref, o_ref):
    o_ref[...] = _layernorm(x_ref[...], g_ref[...], b_ref[...])


def _proj_add_ln_kernel(a_ref, w_ref, b_ref, res_ref, g_ref, beta_ref, o_ref):
    """out = LayerNorm(res + (a @ w + b))  -- attn out-proj + residual + LN fused."""
    y = jnp.dot(a_ref[...], w_ref[...], preferred_element_type=jnp.float32) + b_ref[...]
    o_ref[...] = _layernorm(res_ref[...] + y, g_ref[...], beta_ref[...])


def _ffn_add_ln_kernel(x_ref, w1_ref, b1_ref, w2_ref, b2_ref, g_ref, beta_ref, o_ref):
    """out = LayerNorm(x + W2 @ gelu(W1 @ x + b1) + b2); hidden stays in VMEM/vregs."""
    x = x_ref[...]
    h = jnp.dot(x, w1_ref[...], preferred_element_type=jnp.float32) + b1_ref[...]
    h = _gelu_exact(h)
    ff = jnp.dot(h, w2_ref[...], preferred_element_type=jnp.float32) + b2_ref[...]
    o_ref[...] = _layernorm(x + ff, g_ref[...], beta_ref[...])


def _mlp_head_kernel(x_ref, w1_ref, b1_ref, w2_ref, b2_ref, o_ref, h_ref):
    """out = gelu(x@w1+b1) @ w2[:, j-tile] + b2[j-tile]; hidden cached in VMEM scratch."""
    j = pl.program_id(1)

    @pl.when(j == 0)
    def _():
        h = jnp.dot(x_ref[...], w1_ref[...],
                    preferred_element_type=jnp.float32) + b1_ref[...]
        h_ref[...] = _gelu_exact(h)

    o_ref[...] = jnp.dot(h_ref[...], w2_ref[...],
                         preferred_element_type=jnp.float32) + b2_ref[...]


def _flash_attn_kernel(q_ref, k_ref, v_ref, o_ref, m_sc, l_sc, acc_sc,
                       *, scale, causal, tq, tk):
    """Online-softmax attention over kv tiles; all heads batched per grid step.

    q_ref/k_ref/v_ref blocks are (BH, tile, Dh); causal mask built from iota
    in-kernel (no mask DMA)."""
    ki = pl.program_id(1)

    @pl.when(ki == 0)
    def _():
        m_sc[...] = jnp.full_like(m_sc, NEG_INF)
        l_sc[...] = jnp.zeros_like(l_sc)
        acc_sc[...] = jnp.zeros_like(acc_sc)

    q = q_ref[...]          # (BH, tq, Dh)
    k = k_ref[...]          # (BH, tk, Dh)
    v = v_ref[...]          # (BH, tk, Dh)

    s = jnp.einsum('bqd,bkd->bqk', q, k,
                   preferred_element_type=jnp.float32) * scale      # (BH, tq, tk)
    if causal:
        qi = pl.program_id(0)
        row = qi * tq + lax.broadcasted_iota(jnp.int32, (tq, tk), 0)
        col = ki * tk + lax.broadcasted_iota(jnp.int32, (tq, tk), 1)
        keep = (col <= row)[None]                                    # (1, tq, tk)
        s = jnp.where(keep, s, NEG_INF)

    m_prev = m_sc[...]
    m_new = jnp.maximum(m_prev, jnp.max(s, axis=-1, keepdims=True))
    alpha = jnp.exp(m_prev - m_new)
    p = jnp.exp(s - m_new)
    if causal:
        p = jnp.where(keep, p, 0.0)     # robust even for fully-masked tiles
    l_sc[...] = alpha * l_sc[...] + jnp.sum(p, axis=-1, keepdims=True)
    acc_sc[...] = alpha * acc_sc[...] + jnp.einsum(
        'bqk,bkd->bqd', p, v, preferred_element_type=jnp.float32)
    m_sc[...] = m_new

    @pl.when(ki == pl.num_programs(1) - 1)
    def _():
        o_ref[...] = acc_sc[...] * pl.reciprocal(l_sc[...], approx=True)


# -------------------------------- wrappers --------------------------------

def linear(x, w, b, act=None, tm=256, tn=256, tk=512):
    """x: (M, K) @ w: (K, N) + b, optionally GELU.  Tiled grid with accumulator."""
    M, K = x.shape
    N = w.shape[1]
    tm = M if M <= tm else tm
    tn = N if N <= tn else tn
    tk = K if K <= tk else tk
    Mp, Kp, Np = _ceil_to(M, tm), _ceil_to(K, tk), _ceil_to(N, tn)
    xp = x if (Mp == M and Kp == K) else jnp.pad(x, ((0, Mp - M), (0, Kp - K)))
    wp = w if (Kp == K and Np == N) else jnp.pad(w, ((0, Kp - K), (0, Np - N)))
    bp = (b if Np == N else jnp.pad(b, (0, Np - N))).reshape(1, Np)

    out = pl.pallas_call(
        functools.partial(_linear_kernel, act=act),
        out_shape=jax.ShapeDtypeStruct((Mp, Np), F32),
        grid=(Mp // tm, Np // tn, Kp // tk),
        in_specs=[pl.BlockSpec((tm, tk), lambda i, j, k: (i, k)),
                  pl.BlockSpec((tk, tn), lambda i, j, k: (k, j)),
                  pl.BlockSpec((1, tn), lambda i, j, k: (0, j))],
        out_specs=pl.BlockSpec((tm, tn), lambda i, j, k: (i, j)),
        scratch_shapes=[pltpu.VMEM((tm, tn), F32)],
        compiler_params=pltpu.CompilerParams(
            dimension_semantics=("parallel", "parallel", "arbitrary")),
    )(xp, wp, bp)
    if Mp != M or Np != N:
        out = out[:M, :N]
    return out


def layer_norm(x, g, b):
    """x: (M, D) row-wise LayerNorm (no residual)."""
    M, D = x.shape
    tm, Mp = _row_tile(M)
    xp = _pad_rows(x, Mp)
    out = pl.pallas_call(
        _ln_kernel,
        out_shape=jax.ShapeDtypeStruct((Mp, D), F32),
        grid=(Mp // tm,),
        in_specs=[pl.BlockSpec((tm, D), lambda i: (i, 0)),
                  pl.BlockSpec((1, D), lambda i: (0, 0)),
                  pl.BlockSpec((1, D), lambda i: (0, 0))],
        out_specs=pl.BlockSpec((tm, D), lambda i: (i, 0)),
        compiler_params=pltpu.CompilerParams(dimension_semantics=("parallel",)),
    )(xp, g.reshape(1, D), b.reshape(1, D))
    return out[:M] if Mp != M else out


def proj_add_ln(a, w, bias, res, g, beta):
    """LayerNorm(res + a @ w + bias): fused attention out-projection + residual + LN."""
    M, D = a.shape
    tm, Mp = _row_tile(M)
    ap, rp = _pad_rows(a, Mp), _pad_rows(res, Mp)
    out = pl.pallas_call(
        _proj_add_ln_kernel,
        out_shape=jax.ShapeDtypeStruct((Mp, D), F32),
        grid=(Mp // tm,),
        in_specs=[pl.BlockSpec((tm, D), lambda i: (i, 0)),
                  pl.BlockSpec((D, D), lambda i: (0, 0)),
                  pl.BlockSpec((1, D), lambda i: (0, 0)),
                  pl.BlockSpec((tm, D), lambda i: (i, 0)),
                  pl.BlockSpec((1, D), lambda i: (0, 0)),
                  pl.BlockSpec((1, D), lambda i: (0, 0))],
        out_specs=pl.BlockSpec((tm, D), lambda i: (i, 0)),
        compiler_params=pltpu.CompilerParams(dimension_semantics=("parallel",)),
    )(ap, w, bias.reshape(1, D), rp, g.reshape(1, D), beta.reshape(1, D))
    return out[:M] if Mp != M else out


def ffn_add_ln(x, w1, b1, w2, b2, g, beta):
    """LayerNorm(x + W2 @ gelu(W1 @ x + b1) + b2): fused FFN + residual + LN."""
    M, D = x.shape
    Df = w1.shape[1]
    tm, Mp = _row_tile(M)
    xp = _pad_rows(x, Mp)
    out = pl.pallas_call(
        _ffn_add_ln_kernel,
        out_shape=jax.ShapeDtypeStruct((Mp, D), F32),
        grid=(Mp // tm,),
        in_specs=[pl.BlockSpec((tm, D), lambda i: (i, 0)),
                  pl.BlockSpec((D, Df), lambda i: (0, 0)),
                  pl.BlockSpec((1, Df), lambda i: (0, 0)),
                  pl.BlockSpec((Df, D), lambda i: (0, 0)),
                  pl.BlockSpec((1, D), lambda i: (0, 0)),
                  pl.BlockSpec((1, D), lambda i: (0, 0)),
                  pl.BlockSpec((1, D), lambda i: (0, 0))],
        out_specs=pl.BlockSpec((tm, D), lambda i: (i, 0)),
        compiler_params=pltpu.CompilerParams(dimension_semantics=("parallel",)),
    )(xp, w1, b1.reshape(1, Df), w2, b2.reshape(1, D),
      g.reshape(1, D), beta.reshape(1, D))
    return out[:M] if Mp != M else out


def mlp_head(x, w1, b1, w2, b2, tn=256):
    """Final head: gelu(x@w1+b1) @ w2 + b2 with vocab-tiled output."""
    M, D = x.shape
    H = w1.shape[1]
    N = w2.shape[1]
    tm, Mp = _row_tile(M)
    tn = N if N <= tn else tn
    Np = _ceil_to(N, tn)
    xp = _pad_rows(x, Mp)
    w2p = w2 if Np == N else jnp.pad(w2, ((0, 0), (0, Np - N)))
    b2p = (b2 if Np == N else jnp.pad(b2, (0, Np - N))).reshape(1, Np)
    out = pl.pallas_call(
        _mlp_head_kernel,
        out_shape=jax.ShapeDtypeStruct((Mp, Np), F32),
        grid=(Mp // tm, Np // tn),
        in_specs=[pl.BlockSpec((tm, D), lambda i, j: (i, 0)),
                  pl.BlockSpec((D, H), lambda i, j: (0, 0)),
                  pl.BlockSpec((1, H), lambda i, j: (0, 0)),
                  pl.BlockSpec((H, tn), lambda i, j: (0, j)),
                  pl.BlockSpec((1, tn), lambda i, j: (0, j))],
        out_specs=pl.BlockSpec((tm, tn), lambda i, j: (i, j)),
        scratch_shapes=[pltpu.VMEM((tm, H), F32)],
        compiler_params=pltpu.CompilerParams(
            dimension_semantics=("parallel", "arbitrary")),
    )(xp, w1, b1.reshape(1, H), w2p, b2p)
    if Mp != M or Np != N:
        out = out[:M, :N]
    return out


def flash_attention(q, k, v, causal):
    """q: (BH, Sq, Dh), k/v: (BH, Sk, Dh) -> (BH, Sq, Dh); online softmax.

    All BH heads are processed per grid step (batched einsum) so the grid is
    only (Sq-tiles parallel, Sk-tiles arbitrary)."""
    BH, Sq, Dh = q.shape
    Sk = k.shape[1]
    tq = _seq_tile(Sq)
    tk = _seq_tile(Sk)
    scale = 1.0 / math.sqrt(Dh)
    return pl.pallas_call(
        functools.partial(_flash_attn_kernel, scale=scale, causal=causal,
                          tq=tq, tk=tk),
        out_shape=jax.ShapeDtypeStruct((BH, Sq, Dh), F32),
        grid=(Sq // tq, Sk // tk),
        in_specs=[pl.BlockSpec((BH, tq, Dh), lambda qi, ki: (0, qi, 0)),
                  pl.BlockSpec((BH, tk, Dh), lambda qi, ki: (0, ki, 0)),
                  pl.BlockSpec((BH, tk, Dh), lambda qi, ki: (0, ki, 0))],
        out_specs=pl.BlockSpec((BH, tq, Dh), lambda qi, ki: (0, qi, 0)),
        scratch_shapes=[pltpu.VMEM((BH, tq, 1), F32),
                        pltpu.VMEM((BH, tq, 1), F32),
                        pltpu.VMEM((BH, tq, Dh), F32)],
        compiler_params=pltpu.CompilerParams(
            dimension_semantics=("parallel", "arbitrary")),
    )(q, k, v)


# --------------------------- model building blocks ---------------------------

def _split_heads(t, B, S, H, Dh):
    return t.reshape(B, S, H, Dh).transpose(0, 2, 1, 3).reshape(B * H, S, Dh)


def _merge_heads(o, B, S, H, Dh):
    return o.reshape(B, H, S, Dh).transpose(0, 2, 1, 3).reshape(B * S, H * Dh)


def mha_self(x, p, num_heads, causal):
    """Self-attention core (fused QKV projection + flash attention), pre out-proj."""
    B, S, D = x.shape
    H, Dh = num_heads, D // num_heads
    qkv = linear(x.reshape(B * S, D), p["wqkv"], p["bqkv"])       # one (D,3D) matmul
    q, k, v = qkv[:, :D], qkv[:, D:2 * D], qkv[:, 2 * D:]
    o = flash_attention(_split_heads(q, B, S, H, Dh),
                        _split_heads(k, B, S, H, Dh),
                        _split_heads(v, B, S, H, Dh), causal=causal)
    return _merge_heads(o, B, S, H, Dh)                            # (B*S, D)


def mha_cross(x_q, x_kv, p, num_heads):
    """Cross-attention core (fused KV projection + flash attention), pre out-proj."""
    B, Sq, D = x_q.shape
    Skv = x_kv.shape[1]
    H, Dh = num_heads, D // num_heads
    q = linear(x_q.reshape(B * Sq, D), p["wq"], p["bq"])
    kv = linear(x_kv.reshape(B * Skv, D), p["wkv"], p["bkv"])      # one (D,2D) matmul
    k, v = kv[:, :D], kv[:, D:]
    o = flash_attention(_split_heads(q, B, Sq, H, Dh),
                        _split_heads(k, B, Skv, H, Dh),
                        _split_heads(v, B, Skv, H, Dh), causal=False)
    return _merge_heads(o, B, Sq, H, Dh)                           # (B*Sq, D)


def encoder_layer(x, p, num_heads):
    # post-norm TransformerEncoderLayer (PyTorch default norm_first=False)
    B, S, D = x.shape
    x2 = x.reshape(B * S, D)
    attn = mha_self(x, p["self_attn"], num_heads, causal=False)
    x2 = proj_add_ln(attn, p["self_attn"]["wo"], p["self_attn"]["bo"], x2,
                     p["ln1_g"], p["ln1_b"])
    x2 = ffn_add_ln(x2, p["w1"], p["b1"], p["w2"], p["b2"], p["ln2_g"], p["ln2_b"])
    return x2.reshape(B, S, D)


def decoder_layer(x, memory, p, num_heads):
    B, St, D = x.shape
    x2 = x.reshape(B * St, D)
    attn = mha_self(x, p["self_attn"], num_heads, causal=True)
    x2 = proj_add_ln(attn, p["self_attn"]["wo"], p["self_attn"]["bo"], x2,
                     p["ln1_g"], p["ln1_b"])
    ca = mha_cross(x2.reshape(B, St, D), memory, p["cross_attn"], num_heads)
    x2 = proj_add_ln(ca, p["cross_attn"]["wo"], p["cross_attn"]["bo"], x2,
                     p["ln2_g"], p["ln2_b"])
    x2 = ffn_add_ln(x2, p["w1"], p["b1"], p["w2"], p["b2"], p["ln3_g"], p["ln3_b"])
    return x2.reshape(B, St, D)


def make_pe(max_len, d_model):
    position = jnp.arange(max_len, dtype=F32)[:, None]
    div_term = jnp.exp(jnp.arange(0, d_model, 2, dtype=F32)
                       * (-math.log(10000.0) / d_model))
    pe = jnp.zeros((max_len, d_model), F32)
    pe = pe.at[:, 0::2].set(jnp.sin(position * div_term))
    pe = pe.at[:, 1::2].set(jnp.cos(position * div_term))
    return pe


def micro_llm_forward(params, src, tgt, num_heads):
    B, Ss = src.shape
    _, St = tgt.shape
    D = params["emb"].shape[1]

    # embedding lookup (gather) + positional encoding (dropout == identity)
    src_e = params["emb"][src] + params["pe"][None, :Ss, :]
    tgt_e = params["emb"][tgt] + params["pe"][None, :St, :]

    src_e = layer_norm(src_e.reshape(B * Ss, D), *params["norm1"]).reshape(B, Ss, D)
    tgt_e = layer_norm(tgt_e.reshape(B * St, D), *params["norm2"]).reshape(B, St, D)

    memory = src_e
    for p in params["enc"]:
        memory = encoder_layer(memory, p, num_heads)

    x = tgt_e
    for p in params["dec"]:
        x = decoder_layer(x, memory, p, num_heads)

    logits = mlp_head(x.reshape(B * St, D),
                      params["wfh"], params["bfh"], params["wfo"], params["bfo"])
    return logits.reshape(B, St, -1)


# ------------------------------- parameters -------------------------------

def init_params(key, vocab_size, d_model, num_layers):
    keys = iter(jax.random.split(key, 1024))

    def dense(fan_in, fan_out):
        k1, k2 = next(keys), next(keys)
        bound = 1.0 / math.sqrt(fan_in)
        w = jax.random.uniform(k1, (fan_in, fan_out), F32, -bound, bound)
        b = jax.random.uniform(k2, (fan_out,), F32, -bound, bound)
        return w, b

    def self_attn_p():
        wq, bq = dense(d_model, d_model)
        wk, bk = dense(d_model, d_model)
        wv, bv = dense(d_model, d_model)
        wo, bo = dense(d_model, d_model)
        return dict(wqkv=jnp.concatenate([wq, wk, wv], axis=1),
                    bqkv=jnp.concatenate([bq, bk, bv]),
                    wo=wo, bo=bo)

    def cross_attn_p():
        wq, bq = dense(d_model, d_model)
        wk, bk = dense(d_model, d_model)
        wv, bv = dense(d_model, d_model)
        wo, bo = dense(d_model, d_model)
        return dict(wq=wq, bq=bq,
                    wkv=jnp.concatenate([wk, wv], axis=1),
                    bkv=jnp.concatenate([bk, bv]),
                    wo=wo, bo=bo)

    def ln_p():
        return jnp.ones((d_model,), F32), jnp.zeros((d_model,), F32)

    def enc_layer_p():
        w1, b1 = dense(d_model, 4 * d_model)
        w2, b2 = dense(4 * d_model, d_model)
        g1, be1 = ln_p()
        g2, be2 = ln_p()
        return dict(self_attn=self_attn_p(), w1=w1, b1=b1, w2=w2, b2=b2,
                    ln1_g=g1, ln1_b=be1, ln2_g=g2, ln2_b=be2)

    def dec_layer_p():
        w1, b1 = dense(d_model, 4 * d_model)
        w2, b2 = dense(4 * d_model, d_model)
        g1, be1 = ln_p()
        g2, be2 = ln_p()
        g3, be3 = ln_p()
        return dict(self_attn=self_attn_p(), cross_attn=cross_attn_p(),
                    w1=w1, b1=b1, w2=w2, b2=b2,
                    ln1_g=g1, ln1_b=be1, ln2_g=g2, ln2_b=be2, ln3_g=g3, ln3_b=be3)

    emb = jax.random.normal(next(keys), (vocab_size, d_model), F32)
    wfh, bfh = dense(d_model, 2 * d_model)
    wfo, bfo = dense(2 * d_model, vocab_size)

    return dict(
        emb=emb,
        pe=make_pe(5000, d_model),
        norm1=ln_p(),
        norm2=ln_p(),
        enc=[enc_layer_p() for _ in range(num_layers)],
        dec=[dec_layer_p() for _ in range(num_layers)],
        wfh=wfh, bfh=bfh, wfo=wfo, bfo=bfo,
    )


# ---------------------------------- main ----------------------------------

if __name__ == "__main__":
    vocab_size = 64
    embedding_dim = 32
    num_heads = 4
    num_layers = 2
    B, S_src, S_tgt = 2, 8, 8
    assert embedding_dim % num_heads == 0

    key = jax.random.PRNGKey(0)
    k_param, k_src, k_tgt = jax.random.split(key, 3)

    params = init_params(k_param, vocab_size, embedding_dim, num_layers)
    src = jax.random.randint(k_src, (B, S_src), 0, vocab_size, dtype=jnp.int32)
    tgt = jax.random.randint(k_tgt, (B, S_tgt), 0, vocab_size, dtype=jnp.int32)

    fwd = jax.jit(functools.partial(micro_llm_forward, num_heads=num_heads))
    out = fwd(params, src, tgt)
    out = jax.block_until_ready(out)

    assert out.shape == (B, S_tgt, vocab_size), out.shape
    assert bool(jnp.all(jnp.isfinite(out)))
    print("KERNEL_OK")
</pallas_src>

<mosaic_0001>
module attributes {stable_mosaic.version = 11 : i64} {
  func.func @_ln_kernel(%arg0: i32, %arg1: memref<16x32xf32, #tpu.memory_space<vmem>>, %arg2: memref<1x32xf32, #tpu.memory_space<vmem>>, %arg3: memref<1x32xf32, #tpu.memory_space<vmem>>, %arg4: memref<16x32xf32, #tpu.memory_space<vmem>>) attributes {dimension_semantics = [#tpu.dimension_semantics<parallel>], iteration_bounds = array<i64: 1>, scalar_prefetch = 0 : i64, scratch_operands = 0 : i64, tpu.core_type = #tpu.core_type<tc>, window_params = [{transform_indices = @transform_0, window_bounds = array<i64: 16, 32>}, {pipeline_mode = #tpu.pipeline_mode<synchronous>, transform_indices = @transform_1, window_bounds = array<i64: 1, 32>}, {pipeline_mode = #tpu.pipeline_mode<synchronous>, transform_indices = @transform_2, window_bounds = array<i64: 1, 32>}, {transform_indices = @transform_3, window_bounds = array<i64: 16, 32>}]} {
    %c0 = arith.constant 0 : index
    %c0_0 = arith.constant 0 : index
    %0 = vector.load %arg1[%c0, %c0_0] : memref<16x32xf32, #tpu.memory_space<vmem>>, vector<16x32xf32>
    %c0_1 = arith.constant 0 : index
    %c0_2 = arith.constant 0 : index
    %1 = vector.load %arg2[%c0_1, %c0_2] : memref<1x32xf32, #tpu.memory_space<vmem>>, vector<1x32xf32>
    %c0_3 = arith.constant 0 : index
    %c0_4 = arith.constant 0 : index
    %2 = vector.load %arg3[%c0_3, %c0_4] : memref<1x32xf32, #tpu.memory_space<vmem>>, vector<1x32xf32>
    %cst = arith.constant dense<0.000000e+00> : vector<16xf32>
    %3 = vector.multi_reduction <add>, %0, %cst [1] : vector<16x32xf32> to vector<16xf32>
    %4 = vector.shape_cast %3 : vector<16xf32> to vector<16x1xf32>
    %cst_5 = arith.constant 3.200000e+01 : f32
    %5 = vector.broadcast %cst_5 : f32 to vector<16x1xf32>
    %6 = arith.divf %4, %5 : vector<16x1xf32>
    %7 = vector.broadcast %6 : vector<16x1xf32> to vector<16x32xf32>
    %8 = arith.subf %0, %7 : vector<16x32xf32>
    %9 = arith.mulf %8, %8 : vector<16x32xf32>
    %cst_6 = arith.constant dense<0.000000e+00> : vector<16xf32>
    %10 = vector.multi_reduction <add>, %9, %cst_6 [1] : vector<16x32xf32> to vector<16xf32>
    %11 = vector.shape_cast %10 : vector<16xf32> to vector<16x1xf32>
    %cst_7 = arith.constant 3.200000e+01 : f32
    %12 = vector.broadcast %cst_7 : f32 to vector<16x1xf32>
    %13 = arith.divf %11, %12 : vector<16x1xf32>
    %14 = vector.broadcast %6 : vector<16x1xf32> to vector<16x32xf32>
    %15 = arith.subf %0, %14 : vector<16x32xf32>
    %cst_8 = arith.constant 9.99999974E-6 : f32
    %16 = vector.broadcast %cst_8 : f32 to vector<16x1xf32>
    %17 = arith.addf %13, %16 : vector<16x1xf32>
    %18 = math.rsqrt %17 : vector<16x1xf32>
    %19 = vector.broadcast %18 : vector<16x1xf32> to vector<16x32xf32>
    %20 = arith.mulf %15, %19 : vector<16x32xf32>
    %21 = vector.broadcast %1 : vector<1x32xf32> to vector<16x32xf32>
    %22 = arith.mulf %20, %21 : vector<16x32xf32>
    %23 = vector.broadcast %2 : vector<1x32xf32> to vector<16x32xf32>
    %24 = arith.addf %22, %23 : vector<16x32xf32>
    %c0_9 = arith.constant 0 : index
    %c0_10 = arith.constant 0 : index
    %25 = vector.load %arg4[%c0_9, %c0_10] : memref<16x32xf32, #tpu.memory_space<vmem>>, vector<16x32xf32>
    tpu.vector_store %arg4[%c0_9, %c0_10], %24 {strides = array<i32>} : memref<16x32xf32, #tpu.memory_space<vmem>>, vector<16x32xf32>,
    return
  }
  func.func @transform_0(%arg0: i32) -> (i32, i32) {
    %c0_i32 = arith.constant 0 : i32
    %c0_i32_0 = arith.constant 0 : i32
    return %arg0, %c0_i32 : i32, i32
  }
  func.func @transform_1(%arg0: i32) -> (i32, i32) {
    %c0_i32 = arith.constant 0 : i32
    %c0_i32_0 = arith.constant 0 : i32
    %c0_i32_1 = arith.constant 0 : i32
    return %c0_i32, %c0_i32_0 : i32, i32
  }
  func.func @transform_2(%arg0: i32) -> (i32, i32) {
    %c0_i32 = arith.constant 0 : i32
    %c0_i32_0 = arith.constant 0 : i32
    %c0_i32_1 = arith.constant 0 : i32
    return %c0_i32, %c0_i32_0 : i32, i32
  }
  func.func @transform_3(%arg0: i32) -> (i32, i32) {
    %c0_i32 = arith.constant 0 : i32
    %c0_i32_0 = arith.constant 0 : i32
    return %arg0, %c0_i32 : i32, i32
  }
}

module attributes {stable_mosaic.version = 11 : i64} {
  func.func @_linear_kernel(%arg0: i32, %arg1: i32, %arg2: i32, %arg3: memref<16x32xf32, #tpu.memory_space<vmem>>, %arg4: memref<32x96xf32, #tpu.memory_space<vmem>>, %arg5: memref<1x96xf32, #tpu.memory_space<vmem>>, %arg6: memref<16x96xf32, #tpu.memory_space<vmem>>, %arg7: memref<16x96xf32, #tpu.memory_space<vmem>>) attributes {dimension_semantics = [#tpu.dimension_semantics<parallel>, #tpu.dimension_semantics<parallel>, #tpu.dimension_semantics<arbitrary>], iteration_bounds = array<i64: 1, 1, 1>, scalar_prefetch = 0 : i64, scratch_operands = 1 : i64, tpu.core_type = #tpu.core_type<tc>, window_params = [{transform_indices = @transform_0, window_bounds = array<i64: 16, 32>}, {transform_indices = @transform_1, window_bounds = array<i64: 32, 96>}, {transform_indices = @transform_2, window_bounds = array<i64: 1, 96>}, {transform_indices = @transform_3, window_bounds = array<i64: 16, 96>}]} {
    %c0_i32 = arith.constant 0 : i32
    %0 = arith.cmpi eq, %arg2, %c0_i32 : i32
    %1 = arith.extui %0 : i1 to i32
    %c0_i32_0 = arith.constant 0 : i32
    %2 = arith.cmpi ne, %1, %c0_i32_0 : i32
    scf.if %2 {
      %cst_10 = arith.constant 0.000000e+00 : f32
      %12 = vector.broadcast %cst_10 : f32 to vector<16x96xf32>
      %c0_11 = arith.constant 0 : index
      %c0_12 = arith.constant 0 : index
      %13 = vector.load %arg7[%c0_11, %c0_12] : memref<16x96xf32, #tpu.memory_space<vmem>>, vector<16x96xf32>
      tpu.vector_store %arg7[%c0_11, %c0_12], %12 {strides = array<i32>} : memref<16x96xf32, #tpu.memory_space<vmem>>, vector<16x96xf32>,
    } else {
    }
    %c0 = arith.constant 0 : index
    %c0_1 = arith.constant 0 : index
    %3 = vector.load %arg7[%c0, %c0_1] : memref<16x96xf32, #tpu.memory_space<vmem>>, vector<16x96xf32>
    %c0_2 = arith.constant 0 : index
    %c0_3 = arith.constant 0 : index
    %4 = vector.load %arg3[%c0_2, %c0_3] : memref<16x32xf32, #tpu.memory_space<vmem>>, vector<16x32xf32>
    %c0_4 = arith.constant 0 : index
    %c0_5 = arith.constant 0 : index
    %5 = vector.load %arg4[%c0_4, %c0_5] : memref<32x96xf32, #tpu.memory_space<vmem>>, vector<32x96xf32>
    %cst = arith.constant dense<0.000000e+00> : vector<16x96xf32>
    %6 = tpu.matmul %4, %5, %cst {dimension_numbers = #tpu.dot_dimension_numbers<[1], [0], [0], [1], [0, 0, 1, 1], [], []>} : vector<16x32xf32>, vector<32x96xf32>, vector<16x96xf32> -> vector<16x96xf32>
    %7 = arith.addf %3, %6 : vector<16x96xf32>
    %c0_6 = arith.constant 0 : index
    %c0_7 = arith.constant 0 : index
    %8 = vector.load %arg7[%c0_6, %c0_7] : memref<16x96xf32, #tpu.memory_space<vmem>>, vector<16x96xf32>
    tpu.vector_store %arg7[%c0_6, %c0_7], %7 {strides = array<i32>} : memref<16x96xf32, #tpu.memory_space<vmem>>, vector<16x96xf32>,
    %c0_i32_8 = arith.constant 0 : i32
    %9 = arith.cmpi eq, %arg2, %c0_i32_8 : i32
    %10 = arith.extui %9 : i1 to i32
    %c0_i32_9 = arith.constant 0 : i32
    %11 = arith.cmpi ne, %10, %c0_i32_9 : i32
    scf.if %11 {
      %c0_10 = arith.constant 0 : index
      %c0_11 = arith.constant 0 : index
      %12 = vector.load %arg7[%c0_10, %c0_11] : memref<16x96xf32, #tpu.memory_space<vmem>>, vector<16x96xf32>
      %c0_12 = arith.constant 0 : index
      %c0_13 = arith.constant 0 : index
      %13 = vector.load %arg5[%c0_12, %c0_13] : memref<1x96xf32, #tpu.memory_space<vmem>>, vector<1x96xf32>
      %14 = vector.broadcast %13 : vector<1x96xf32> to vector<16x96xf32>
      %15 = arith.addf %12, %14 : vector<16x96xf32>
      %c0_14 = arith.constant 0 : index
      %c0_15 = arith.constant 0 : index
      %16 = vector.load %arg6[%c0_14, %c0_15] : memref<16x96xf32, #tpu.memory_space<vmem>>, vector<16x96xf32>
      tpu.vector_store %arg6[%c0_14, %c0_15], %15 {strides = array<i32>} : memref<16x96xf32, #tpu.memory_space<vmem>>, vector<16x96xf32>,
    } else {
    }
    return
  }
  func.func @transform_0(%arg0: i32, %arg1: i32, %arg2: i32) -> (i32, i32) {
    %c0_i32 = arith.constant 0 : i32
    return %arg0, %arg2 : i32, i32
  }
  func.func @transform_1(%arg0: i32, %arg1: i32, %arg2: i32) -> (i32, i32) {
    %c0_i32 = arith.constant 0 : i32
    return %arg2, %arg1 : i32, i32
  }
  func.func @transform_2(%arg0: i32, %arg1: i32, %arg2: i32) -> (i32, i32) {
    %c0_i32 = arith.constant 0 : i32
    %c0_i32_0 = arith.constant 0 : i32
    return %c0_i32, %arg1 : i32, i32
  }
  func.func @transform_3(%arg0: i32, %arg1: i32, %arg2: i32) -> (i32, i32) {
    %c0_i32 = arith.constant 0 : i32
    return %arg0, %arg1 : i32, i32
  }
}

module attributes {stable_mosaic.version = 11 : i64} {
  func.func @_flash_attn_kernel(%arg0: i32, %arg1: i32, %arg2: memref<8x8x8xf32, #tpu.memory_space<vmem>>, %arg3: memref<8x8x8xf32, #tpu.memory_space<vmem>>, %arg4: memref<8x8x8xf32, #tpu.memory_space<vmem>>, %arg5: memref<8x8x8xf32, #tpu.memory_space<vmem>>, %arg6: memref<8x8x1xf32, #tpu.memory_space<vmem>>, %arg7: memref<8x8x1xf32, #tpu.memory_space<vmem>>, %arg8: memref<8x8x8xf32, #tpu.memory_space<vmem>>) attributes {dimension_semantics = [#tpu.dimension_semantics<parallel>, #tpu.dimension_semantics<arbitrary>], iteration_bounds = array<i64: 1, 1>, scalar_prefetch = 0 : i64, scratch_operands = 3 : i64, tpu.core_type = #tpu.core_type<tc>, window_params = [{transform_indices = @transform_0, window_bounds = array<i64: 8, 8, 8>}, {transform_indices = @transform_1, window_bounds = array<i64: 8, 8, 8>}, {transform_indices = @transform_2, window_bounds = array<i64: 8, 8, 8>}, {transform_indices = @transform_3, window_bounds = array<i64: 8, 8, 8>}]} {
    %c0_i32 = arith.constant 0 : i32
    %0 = arith.cmpi eq, %arg1, %c0_i32 : i32
    %1 = arith.extui %0 : i1 to i32
    %c0_i32_0 = arith.constant 0 : i32
    %2 = arith.cmpi ne, %1, %c0_i32_0 : i32
    scf.if %2 {
      %cst_36 = arith.constant -1.000000e+30 : f32
      %52 = vector.broadcast %cst_36 : f32 to vector<8x8x1xf32>
      %c0_37 = arith.constant 0 : index
      %c0_38 = arith.constant 0 : index
      %c0_39 = arith.constant 0 : index
      %53 = vector.load %arg6[%c0_37, %c0_38, %c0_39] : memref<8x8x1xf32, #tpu.memory_space<vmem>>, vector<8x8x1xf32>
      tpu.vector_store %arg6[%c0_37, %c0_38, %c0_39], %52 {strides = array<i32>} : memref<8x8x1xf32, #tpu.memory_space<vmem>>, vector<8x8x1xf32>,
      %cst_40 = arith.constant 0.000000e+00 : f32
      %54 = vector.broadcast %cst_40 : f32 to vector<8x8x1xf32>
      %c0_41 = arith.constant 0 : index
      %c0_42 = arith.constant 0 : index
      %c0_43 = arith.constant 0 : index
      %55 = vector.load %arg7[%c0_41, %c0_42, %c0_43] : memref<8x8x1xf32, #tpu.memory_space<vmem>>, vector<8x8x1xf32>
      tpu.vector_store %arg7[%c0_41, %c0_42, %c0_43], %54 {strides = array<i32>} : memref<8x8x1xf32, #tpu.memory_space<vmem>>, vector<8x8x1xf32>,
      %cst_44 = arith.constant 0.000000e+00 : f32
      %56 = vector.broadcast %cst_44 : f32 to vector<8x8x8xf32>
      %c0_45 = arith.constant 0 : index
      %c0_46 = arith.constant 0 : index
      %c0_47 = arith.constant 0 : index
      %57 = vector.load %arg8[%c0_45, %c0_46, %c0_47] : memref<8x8x8xf32, #tpu.memory_space<vmem>>, vector<8x8x8xf32>
      tpu.vector_store %arg8[%c0_45, %c0_46, %c0_47], %56 {strides = array<i32>} : memref<8x8x8xf32, #tpu.memory_space<vmem>>, vector<8x8x8xf32>,
    } else {
    }
    %c0 = arith.constant 0 : index
    %c0_1 = arith.constant 0 : index
    %c0_2 = arith.constant 0 : index
    %3 = vector.load %arg2[%c0, %c0_1, %c0_2] : memref<8x8x8xf32, #tpu.memory_space<vmem>>, vector<8x8x8xf32>
    %c0_3 = arith.constant 0 : index
    %c0_4 = arith.constant 0 : index
    %c0_5 = arith.constant 0 : index
    %4 = vector.load %arg3[%c0_3, %c0_4, %c0_5] : memref<8x8x8xf32, #tpu.memory_space<vmem>>, vector<8x8x8xf32>
    %c0_6 = arith.constant 0 : index
    %c0_7 = arith.constant 0 : index
    %c0_8 = arith.constant 0 : index
    %5 = vector.load %arg4[%c0_6, %c0_7, %c0_8] : memref<8x8x8xf32, #tpu.memory_space<vmem>>, vector<8x8x8xf32>
    "tpu.trace_start"() <{level = 10 : i32, message = "bqd,bkd->bqk"}> : () -> ()
    %cst = arith.constant dense<0.000000e+00> : vector<8x8x8xf32>
    %6 = tpu.matmul %3, %4, %cst {dimension_numbers = #tpu.dot_dimension_numbers<[2], [2], [1], [1], [0, 0, 0, 1, 1, 1], [0], [0]>} : vector<8x8x8xf32>, vector<8x8x8xf32>, vector<8x8x8xf32> -> vector<8x8x8xf32>
    "tpu.trace_stop"() : () -> ()
    %cst_9 = arith.constant 0.353553385 : f32
    %7 = vector.broadcast %cst_9 : f32 to vector<8x8x8xf32>
    %8 = arith.mulf %6, %7 : vector<8x8x8xf32>
    %c8_i32 = arith.constant 8 : i32
    %9 = arith.muli %arg0, %c8_i32 : i32
    %10 = tpu.iota {dimensions = array<i32: 0>} : vector<8x8xi32>
    %11 = vector.broadcast %9 : i32 to vector<8x8xi32>
    %12 = arith.addi %11, %10 : vector<8x8xi32>
    %c8_i32_10 = arith.constant 8 : i32
    %13 = arith.muli %arg1, %c8_i32_10 : i32
    %14 = tpu.iota {dimensions = array<i32: 1>} : vector<8x8xi32>
    %15 = vector.broadcast %13 : i32 to vector<8x8xi32>
    %16 = arith.addi %15, %14 : vector<8x8xi32>
    %17 = arith.cmpi sle, %16, %12 : vector<8x8xi32>
    %18 = vector.shape_cast %17 : vector<8x8xi1> to vector<1x8x8xi1>
    %cst_11 = arith.constant -1.000000e+30 : f32
    %19 = vector.shape_cast %18 : vector<1x8x8xi1> to vector<1x8x8xi1>
    %20 = vector.broadcast %19 : vector<1x8x8xi1> to vector<8x8x8xi1>
    %21 = vector.broadcast %cst_11 : f32 to vector<8x8x8xf32>
    %22 = arith.select %20, %8, %21 : vector<8x8x8xi1>, vector<8x8x8xf32>
    %c0_12 = arith.constant 0 : index
    %c0_13 = arith.constant 0 : index
    %c0_14 = arith.constant 0 : index
    %23 = vector.load %arg6[%c0_12, %c0_13, %c0_14] : memref<8x8x1xf32, #tpu.memory_space<vmem>>, vector<8x8x1xf32>
    %cst_15 = arith.constant dense<0xFF800000> : vector<8x8xf32>
    %24 = vector.multi_reduction <maximumf>, %22, %cst_15 [2] : vector<8x8x8xf32> to vector<8x8xf32>
    %25 = vector.shape_cast %24 : vector<8x8xf32> to vector<8x8x1xf32>
    %26 = arith.maximumf %23, %25 : vector<8x8x1xf32>
    %27 = arith.subf %23, %26 : vector<8x8x1xf32>
    %28 = math.exp %27 : vector<8x8x1xf32>
    %29 = vector.broadcast %26 : vector<8x8x1xf32> to vector<8x8x8xf32>
    %30 = arith.subf %22, %29 : vector<8x8x8xf32>
    %31 = math.exp %30 : vector<8x8x8xf32>
    %cst_16 = arith.constant 0.000000e+00 : f32
    %32 = vector.shape_cast %18 : vector<1x8x8xi1> to vector<1x8x8xi1>
    %33 = vector.broadcast %32 : vector<1x8x8xi1> to vector<8x8x8xi1>
    %34 = vector.broadcast %cst_16 : f32 to vector<8x8x8xf32>
    %35 = arith.select %33, %31, %34 : vector<8x8x8xi1>, vector<8x8x8xf32>
    %c0_17 = arith.constant 0 : index
    %c0_18 = arith.constant 0 : index
    %c0_19 = arith.constant 0 : index
    %36 = vector.load %arg7[%c0_17, %c0_18, %c0_19] : memref<8x8x1xf32, #tpu.memory_space<vmem>>, vector<8x8x1xf32>
    %37 = arith.mulf %28, %36 : vector<8x8x1xf32>
    %cst_20 = arith.constant dense<0.000000e+00> : vector<8x8xf32>
    %38 = vector.multi_reduction <add>, %35, %cst_20 [2] : vector<8x8x8xf32> to vector<8x8xf32>
    %39 = vector.shape_cast %38 : vector<8x8xf32> to vector<8x8x1xf32>
    %40 = arith.addf %37, %39 : vector<8x8x1xf32>
    %c0_21 = arith.constant 0 : index
    %c0_22 = arith.constant 0 : index
    %c0_23 = arith.constant 0 : index
    %41 = vector.load %arg7[%c0_21, %c0_22, %c0_23] : memref<8x8x1xf32, #tpu.memory_space<vmem>>, vector<8x8x1xf32>
    tpu.vector_store %arg7[%c0_21, %c0_22, %c0_23], %40 {strides = array<i32>} : memref<8x8x1xf32, #tpu.memory_space<vmem>>, vector<8x8x1xf32>,
    %c0_24 = arith.constant 0 : index
    %c0_25 = arith.constant 0 : index
    %c0_26 = arith.constant 0 : index
    %42 = vector.load %arg8[%c0_24, %c0_25, %c0_26] : memref<8x8x8xf32, #tpu.memory_space<vmem>>, vector<8x8x8xf32>
    %43 = vector.broadcast %28 : vector<8x8x1xf32> to vector<8x8x8xf32>
    %44 = arith.mulf %43, %42 : vector<8x8x8xf32>
    "tpu.trace_start"() <{level = 10 : i32, message = "bqk,bkd->bqd"}> : () -> ()
    %cst_27 = arith.constant dense<0.000000e+00> : vector<8x8x8xf32>
    %45 = tpu.matmul %35, %5, %cst_27 {dimension_numbers = #tpu.dot_dimension_numbers<[2], [1], [1], [2], [0, 0, 0, 1, 1, 2], [0], [0]>} : vector<8x8x8xf32>, vector<8x8x8xf32>, vector<8x8x8xf32> -> vector<8x8x8xf32>
    "tpu.trace_stop"() : () -> ()
    %46 = arith.addf %44, %45 : vector<8x8x8xf32>
    %c0_28 = arith.constant 0 : index
    %c0_29 = arith.constant 0 : index
    %c0_30 = arith.constant 0 : index
    %47 = vector.load %arg8[%c0_28, %c0_29, %c0_30] : memref<8x8x8xf32, #tpu.memory_space<vmem>>, vector<8x8x8xf32>
    tpu.vector_store %arg8[%c0_28, %c0_29, %c0_30], %46 {strides = array<i32>} : memref<8x8x8xf32, #tpu.memory_space<vmem>>, vector<8x8x8xf32>,
    %c0_31 = arith.constant 0 : index
    %c0_32 = arith.constant 0 : index
    %c0_33 = arith.constant 0 : index
    %48 = vector.load %arg6[%c0_31, %c0_32, %c0_33] : memref<8x8x1xf32, #tpu.memory_space<vmem>>, vector<8x8x1xf32>
    tpu.vector_store %arg6[%c0_31, %c0_32, %c0_33], %26 {strides = array<i32>} : memref<8x8x1xf32, #tpu.memory_space<vmem>>, vector<8x8x1xf32>,
    %c0_i32_34 = arith.constant 0 : i32
    %49 = arith.cmpi eq, %arg1, %c0_i32_34 : i32
    %50 = arith.extui %49 : i1 to i32
    %c0_i32_35 = arith.constant 0 : i32
    %51 = arith.cmpi ne, %50, %c0_i32_35 : i32
    scf.if %51 {
      %c0_36 = arith.constant 0 : index
      %c0_37 = arith.constant 0 : index
      %c0_38 = arith.constant 0 : index
      %52 = vector.load %arg8[%c0_36, %c0_37, %c0_38] : memref<8x8x8xf32, #tpu.memory_space<vmem>>, vector<8x8x8xf32>
      %c0_39 = arith.constant 0 : index
      %c0_40 = arith.constant 0 : index
      %c0_41 = arith.constant 0 : index
      %53 = vector.load %arg7[%c0_39, %c0_40, %c0_41] : memref<8x8x1xf32, #tpu.memory_space<vmem>>, vector<8x8x1xf32>
      %54 = tpu.reciprocal %53 {approx = true} : vector<8x8x1xf32> -> vector<8x8x1xf32>
      %55 = vector.broadcast %54 : vector<8x8x1xf32> to vector<8x8x8xf32>
      %56 = arith.mulf %52, %55 : vector<8x8x8xf32>
      %c0_42 = arith.constant 0 : index
      %c0_43 = arith.constant 0 : index
      %c0_44 = arith.constant 0 : index
      %57 = vector.load %arg5[%c0_42, %c0_43, %c0_44] : memref<8x8x8xf32, #tpu.memory_space<vmem>>, vector<8x8x8xf32>
      tpu.vector_store %arg5[%c0_42, %c0_43, %c0_44], %56 {strides = array<i32>} : memref<8x8x8xf32, #tpu.memory_space<vmem>>, vector<8x8x8xf32>,
    } else {
    }
    return
  }
  func.func @transform_0(%arg0: i32, %arg1: i32) -> (i32, i32, i32) {
    %c0_i32 = arith.constant 0 : i32
    %c0_i32_0 = arith.constant 0 : i32
    %c0_i32_1 = arith.constant 0 : i32
    return %c0_i32, %arg0, %c0_i32_0 : i32, i32, i32
  }
  func.func @transform_1(%arg0: i32, %arg1: i32) -> (i32, i32, i32) {
    %c0_i32 = arith.constant 0 : i32
    %c0_i32_0 = arith.constant 0 : i32
    %c0_i32_1 = arith.constant 0 : i32
    return %c0_i32, %arg1, %c0_i32_0 : i32, i32, i32
  }
  func.func @transform_2(%arg0: i32, %arg1: i32) -> (i32, i32, i32) {
    %c0_i32 = arith.constant 0 : i32
    %c0_i32_0 = arith.constant 0 : i32
    %c0_i32_1 = arith.constant 0 : i32
    return %c0_i32, %arg1, %c0_i32_0 : i32, i32, i32
  }
  func.func @transform_3(%arg0: i32, %arg1: i32) -> (i32, i32, i32) {
    %c0_i32 = arith.constant 0 : i32
    %c0_i32_0 = arith.constant 0 : i32
    %c0_i32_1 = arith.constant 0 : i32
    return %c0_i32, %arg0, %c0_i32_0 : i32, i32, i32
  }
}

module attributes {stable_mosaic.version = 11 : i64} {
  func.func @_proj_add_ln_kernel(%arg0: i32, %arg1: memref<16x32xf32, #tpu.memory_space<vmem>>, %arg2: memref<32x32xf32, #tpu.memory_space<vmem>>, %arg3: memref<1x32xf32, #tpu.memory_space<vmem>>, %arg4: memref<16x32xf32, #tpu.memory_space<vmem>>, %arg5: memref<1x32xf32, #tpu.memory_space<vmem>>, %arg6: memref<1x32xf32, #tpu.memory_space<vmem>>, %arg7: memref<16x32xf32, #tpu.memory_space<vmem>>) attributes {dimension_semantics = [#tpu.dimension_semantics<parallel>], iteration_bounds = array<i64: 1>, scalar_prefetch = 0 : i64, scratch_operands = 0 : i64, tpu.core_type = #tpu.core_type<tc>, window_params = [{transform_indices = @transform_0, window_bounds = array<i64: 16, 32>}, {pipeline_mode = #tpu.pipeline_mode<synchronous>, transform_indices = @transform_1, window_bounds = array<i64: 32, 32>}, {pipeline_mode = #tpu.pipeline_mode<synchronous>, transform_indices = @transform_2, window_bounds = array<i64: 1, 32>}, {transform_indices = @transform_3, window_bounds = array<i64: 16, 32>}, {pipeline_mode = #tpu.pipeline_mode<synchronous>, transform_indices = @transform_4, window_bounds = array<i64: 1, 32>}, {pipeline_mode = #tpu.pipeline_mode<synchronous>, transform_indices = @transform_5, window_bounds = array<i64: 1, 32>}, {transform_indices = @transform_6, window_bounds = array<i64: 16, 32>}]} {
    %c0 = arith.constant 0 : index
    %c0_0 = arith.constant 0 : index
    %0 = vector.load %arg1[%c0, %c0_0] : memref<16x32xf32, #tpu.memory_space<vmem>>, vector<16x32xf32>
    %c0_1 = arith.constant 0 : index
    %c0_2 = arith.constant 0 : index
    %1 = vector.load %arg2[%c0_1, %c0_2] : memref<32x32xf32, #tpu.memory_space<vmem>>, vector<32x32xf32>
    %cst = arith.constant dense<0.000000e+00> : vector<16x32xf32>
    %2 = tpu.matmul %0, %1, %cst {dimension_numbers = #tpu.dot_dimension_numbers<[1], [0], [0], [1], [0, 0, 1, 1], [], []>} : vector<16x32xf32>, vector<32x32xf32>, vector<16x32xf32> -> vector<16x32xf32>
    %c0_3 = arith.constant 0 : index
    %c0_4 = arith.constant 0 : index
    %3 = vector.load %arg3[%c0_3, %c0_4] : memref<1x32xf32, #tpu.memory_space<vmem>>, vector<1x32xf32>
    %4 = vector.broadcast %3 : vector<1x32xf32> to vector<16x32xf32>
    %5 = arith.addf %2, %4 : vector<16x32xf32>
    %c0_5 = arith.constant 0 : index
    %c0_6 = arith.constant 0 : index
    %6 = vector.load %arg4[%c0_5, %c0_6] : memref<16x32xf32, #tpu.memory_space<vmem>>, vector<16x32xf32>
    %7 = arith.addf %6, %5 : vector<16x32xf32>
    %c0_7 = arith.constant 0 : index
    %c0_8 = arith.constant 0 : index
    %8 = vector.load %arg5[%c0_7, %c0_8] : memref<1x32xf32, #tpu.memory_space<vmem>>, vector<1x32xf32>
    %c0_9 = arith.constant 0 : index
    %c0_10 = arith.constant 0 : index
    %9 = vector.load %arg6[%c0_9, %c0_10] : memref<1x32xf32, #tpu.memory_space<vmem>>, vector<1x32xf32>
    %cst_11 = arith.constant dense<0.000000e+00> : vector<16xf32>
    %10 = vector.multi_reduction <add>, %7, %cst_11 [1] : vector<16x32xf32> to vector<16xf32>
    %11 = vector.shape_cast %10 : vector<16xf32> to vector<16x1xf32>
    %cst_12 = arith.constant 3.200000e+01 : f32
    %12 = vector.broadcast %cst_12 : f32 to vector<16x1xf32>
    %13 = arith.divf %11, %12 : vector<16x1xf32>
    %14 = vector.broadcast %13 : vector<16x1xf32> to vector<16x32xf32>
    %15 = arith.subf %7, %14 : vector<16x32xf32>
    %16 = arith.mulf %15, %15 : vector<16x32xf32>
    %cst_13 = arith.constant dense<0.000000e+00> : vector<16xf32>
    %17 = vector.multi_reduction <add>, %16, %cst_13 [1] : vector<16x32xf32> to vector<16xf32>
    %18 = vector.shape_cast %17 : vector<16xf32> to vector<16x1xf32>
    %cst_14 = arith.constant 3.200000e+01 : f32
    %19 = vector.broadcast %cst_14 : f32 to vector<16x1xf32>
    %20 = arith.divf %18, %19 : vector<16x1xf32>
    %21 = vector.broadcast %13 : vector<16x1xf32> to vector<16x32xf32>
    %22 = arith.subf %7, %21 : vector<16x32xf32>
    %cst_15 = arith.constant 9.99999974E-6 : f32
    %23 = vector.broadcast %cst_15 : f32 to vector<16x1xf32>
    %24 = arith.addf %20, %23 : vector<16x1xf32>
    %25 = math.rsqrt %24 : vector<16x1xf32>
    %26 = vector.broadcast %25 : vector<16x1xf32> to vector<16x32xf32>
    %27 = arith.mulf %22, %26 : vector<16x32xf32>
    %28 = vector.broadcast %8 : vector<1x32xf32> to vector<16x32xf32>
    %29 = arith.mulf %27, %28 : vector<16x32xf32>
    %30 = vector.broadcast %9 : vector<1x32xf32> to vector<16x32xf32>
    %31 = arith.addf %29, %30 : vector<16x32xf32>
    %c0_16 = arith.constant 0 : index
    %c0_17 = arith.constant 0 : index
    %32 = vector.load %arg7[%c0_16, %c0_17] : memref<16x32xf32, #tpu.memory_space<vmem>>, vector<16x32xf32>
    tpu.vector_store %arg7[%c0_16, %c0_17], %31 {strides = array<i32>} : memref<16x32xf32, #tpu.memory_space<vmem>>, vector<16x32xf32>,
    return
  }
  func.func @transform_0(%arg0: i32) -> (i32, i32) {
    %c0_i32 = arith.constant 0 : i32
    %c0_i32_0 = arith.constant 0 : i32
    return %arg0, %c0_i32 : i32, i32
  }
  func.func @transform_1(%arg0: i32) -> (i32, i32) {
    %c0_i32 = arith.constant 0 : i32
    %c0_i32_0 = arith.constant 0 : i32
    %c0_i32_1 = arith.constant 0 : i32
    return %c0_i32, %c0_i32_0 : i32, i32
  }
  func.func @transform_2(%arg0: i32) -> (i32, i32) {
    %c0_i32 = arith.constant 0 : i32
    %c0_i32_0 = arith.constant 0 : i32
    %c0_i32_1 = arith.constant 0 : i32
    return %c0_i32, %c0_i32_0 : i32, i32
  }
  func.func @transform_3(%arg0: i32) -> (i32, i32) {
    %c0_i32 = arith.constant 0 : i32
    %c0_i32_0 = arith.constant 0 : i32
    return %arg0, %c0_i32 : i32, i32
  }
  func.func @transform_4(%arg0: i32) -> (i32, i32) {
    %c0_i32 = arith.constant 0 : i32
    %c0_i32_0 = arith.constant 0 : i32
    %c0_i32_1 = arith.constant 0 : i32
    return %c0_i32, %c0_i32_0 : i32, i32
  }
  func.func @transform_5(%arg0: i32) -> (i32, i32) {
    %c0_i32 = arith.constant 0 : i32
    %c0_i32_0 = arith.constant 0 : i32
    %c0_i32_1 = arith.constant 0 : i32
    return %c0_i32, %c0_i32_0 : i32, i32
  }
  func.func @transform_6(%arg0: i32) -> (i32, i32) {
    %c0_i32 = arith.constant 0 : i32
    %c0_i32_0 = arith.constant 0 : i32
    return %arg0, %c0_i32 : i32, i32
  }
}

module attributes {stable_mosaic.version = 11 : i64} {
  func.func @_flash_attn_kernel(%arg0: i32, %arg1: i32, %arg2: memref<8x8x8xf32, #tpu.memory_space<vmem>>, %arg3: memref<8x8x8xf32, #tpu.memory_space<vmem>>, %arg4: memref<8x8x8xf32, #tpu.memory_space<vmem>>, %arg5: memref<8x8x8xf32, #tpu.memory_space<vmem>>, %arg6: memref<8x8x1xf32, #tpu.memory_space<vmem>>, %arg7: memref<8x8x1xf32, #tpu.memory_space<vmem>>, %arg8: memref<8x8x8xf32, #tpu.memory_space<vmem>>) attributes {dimension_semantics = [#tpu.dimension_semantics<parallel>, #tpu.dimension_semantics<arbitrary>], iteration_bounds = array<i64: 1, 1>, scalar_prefetch = 0 : i64, scratch_operands = 3 : i64, tpu.core_type = #tpu.core_type<tc>, window_params = [{transform_indices = @transform_0, window_bounds = array<i64: 8, 8, 8>}, {transform_indices = @transform_1, window_bounds = array<i64: 8, 8, 8>}, {transform_indices = @transform_2, window_bounds = array<i64: 8, 8, 8>}, {transform_indices = @transform_3, window_bounds = array<i64: 8, 8, 8>}]} {
    %c0_i32 = arith.constant 0 : i32
    %0 = arith.cmpi eq, %arg1, %c0_i32 : i32
    %1 = arith.extui %0 : i1 to i32
    %c0_i32_0 = arith.constant 0 : i32
    %2 = arith.cmpi ne, %1, %c0_i32_0 : i32
    scf.if %2 {
      %cst_33 = arith.constant -1.000000e+30 : f32
      %34 = vector.broadcast %cst_33 : f32 to vector<8x8x1xf32>
      %c0_34 = arith.constant 0 : index
      %c0_35 = arith.constant 0 : index
      %c0_36 = arith.constant 0 : index
      %35 = vector.load %arg6[%c0_34, %c0_35, %c0_36] : memref<8x8x1xf32, #tpu.memory_space<vmem>>, vector<8x8x1xf32>
      tpu.vector_store %arg6[%c0_34, %c0_35, %c0_36], %34 {strides = array<i32>} : memref<8x8x1xf32, #tpu.memory_space<vmem>>, vector<8x8x1xf32>,
      %cst_37 = arith.constant 0.000000e+00 : f32
      %36 = vector.broadcast %cst_37 : f32 to vector<8x8x1xf32>
      %c0_38 = arith.constant 0 : index
      %c0_39 = arith.constant 0 : index
      %c0_40 = arith.constant 0 : index
      %37 = vector.load %arg7[%c0_38, %c0_39, %c0_40] : memref<8x8x1xf32, #tpu.memory_space<vmem>>, vector<8x8x1xf32>
      tpu.vector_store %arg7[%c0_38, %c0_39, %c0_40], %36 {strides = array<i32>} : memref<8x8x1xf32, #tpu.memory_space<vmem>>, vector<8x8x1xf32>,
      %cst_41 = arith.constant 0.000000e+00 : f32
      %38 = vector.broadcast %cst_41 : f32 to vector<8x8x8xf32>
      %c0_42 = arith.constant 0 : index
      %c0_43 = arith.constant 0 : index
      %c0_44 = arith.constant 0 : index
      %39 = vector.load %arg8[%c0_42, %c0_43, %c0_44] : memref<8x8x8xf32, #tpu.memory_space<vmem>>, vector<8x8x8xf32>
      tpu.vector_store %arg8[%c0_42, %c0_43, %c0_44], %38 {strides = array<i32>} : memref<8x8x8xf32, #tpu.memory_space<vmem>>, vector<8x8x8xf32>,
    } else {
    }
    %c0 = arith.constant 0 : index
    %c0_1 = arith.constant 0 : index
    %c0_2 = arith.constant 0 : index
    %3 = vector.load %arg2[%c0, %c0_1, %c0_2] : memref<8x8x8xf32, #tpu.memory_space<vmem>>, vector<8x8x8xf32>
    %c0_3 = arith.constant 0 : index
    %c0_4 = arith.constant 0 : index
    %c0_5 = arith.constant 0 : index
    %4 = vector.load %arg3[%c0_3, %c0_4, %c0_5] : memref<8x8x8xf32, #tpu.memory_space<vmem>>, vector<8x8x8xf32>
    %c0_6 = arith.constant 0 : index
    %c0_7 = arith.constant 0 : index
    %c0_8 = arith.constant 0 : index
    %5 = vector.load %arg4[%c0_6, %c0_7, %c0_8] : memref<8x8x8xf32, #tpu.memory_space<vmem>>, vector<8x8x8xf32>
    "tpu.trace_start"() <{level = 10 : i32, message = "bqd,bkd->bqk"}> : () -> ()
    %cst = arith.constant dense<0.000000e+00> : vector<8x8x8xf32>
    %6 = tpu.matmul %3, %4, %cst {dimension_numbers = #tpu.dot_dimension_numbers<[2], [2], [1], [1], [0, 0, 0, 1, 1, 1], [0], [0]>} : vector<8x8x8xf32>, vector<8x8x8xf32>, vector<8x8x8xf32> -> vector<8x8x8xf32>
    "tpu.trace_stop"() : () -> ()
    %cst_9 = arith.constant 0.353553385 : f32
    %7 = vector.broadcast %cst_9 : f32 to vector<8x8x8xf32>
    %8 = arith.mulf %6, %7 : vector<8x8x8xf32>
    %c0_10 = arith.constant 0 : index
    %c0_11 = arith.constant 0 : index
    %c0_12 = arith.constant 0 : index
    %9 = vector.load %arg6[%c0_10, %c0_11, %c0_12] : memref<8x8x1xf32, #tpu.memory_space<vmem>>, vector<8x8x1xf32>
    %cst_13 = arith.constant dense<0xFF800000> : vector<8x8xf32>
    %10 = vector.multi_reduction <maximumf>, %8, %cst_13 [2] : vector<8x8x8xf32> to vector<8x8xf32>
    %11 = vector.shape_cast %10 : vector<8x8xf32> to vector<8x8x1xf32>
    %12 = arith.maximumf %9, %11 : vector<8x8x1xf32>
    %13 = arith.subf %9, %12 : vector<8x8x1xf32>
    %14 = math.exp %13 : vector<8x8x1xf32>
    %15 = vector.broadcast %12 : vector<8x8x1xf32> to vector<8x8x8xf32>
    %16 = arith.subf %8, %15 : vector<8x8x8xf32>
    %17 = math.exp %16 : vector<8x8x8xf32>
    %c0_14 = arith.constant 0 : index
    %c0_15 = arith.constant 0 : index
    %c0_16 = arith.constant 0 : index
    %18 = vector.load %arg7[%c0_14, %c0_15, %c0_16] : memref<8x8x1xf32, #tpu.memory_space<vmem>>, vector<8x8x1xf32>
    %19 = arith.mulf %14, %18 : vector<8x8x1xf32>
    %cst_17 = arith.constant dense<0.000000e+00> : vector<8x8xf32>
    %20 = vector.multi_reduction <add>, %17, %cst_17 [2] : vector<8x8x8xf32> to vector<8x8xf32>
    %21 = vector.shape_cast %20 : vector<8x8xf32> to vector<8x8x1xf32>
    %22 = arith.addf %19, %21 : vector<8x8x1xf32>
    %c0_18 = arith.constant 0 : index
    %c0_19 = arith.constant 0 : index
    %c0_20 = arith.constant 0 : index
    %23 = vector.load %arg7[%c0_18, %c0_19, %c0_20] : memref<8x8x1xf32, #tpu.memory_space<vmem>>, vector<8x8x1xf32>
    tpu.vector_store %arg7[%c0_18, %c0_19, %c0_20], %22 {strides = array<i32>} : memref<8x8x1xf32, #tpu.memory_space<vmem>>, vector<8x8x1xf32>,
    %c0_21 = arith.constant 0 : index
    %c0_22 = arith.constant 0 : index
    %c0_23 = arith.constant 0 : index
    %24 = vector.load %arg8[%c0_21, %c0_22, %c0_23] : memref<8x8x8xf32, #tpu.memory_space<vmem>>, vector<8x8x8xf32>
    %25 = vector.broadcast %14 : vector<8x8x1xf32> to vector<8x8x8xf32>
    %26 = arith.mulf %25, %24 : vector<8x8x8xf32>
    "tpu.trace_start"() <{level = 10 : i32, message = "bqk,bkd->bqd"}> : () -> ()
    %cst_24 = arith.constant dense<0.000000e+00> : vector<8x8x8xf32>
    %27 = tpu.matmul %17, %5, %cst_24 {dimension_numbers = #tpu.dot_dimension_numbers<[2], [1], [1], [2], [0, 0, 0, 1, 1, 2], [0], [0]>} : vector<8x8x8xf32>, vector<8x8x8xf32>, vector<8x8x8xf32> -> vector<8x8x8xf32>
    "tpu.trace_stop"() : () -> ()
    %28 = arith.addf %26, %27 : vector<8x8x8xf32>
    %c0_25 = arith.constant 0 : index
    %c0_26 = arith.constant 0 : index
    %c0_27 = arith.constant 0 : index
    %29 = vector.load %arg8[%c0_25, %c0_26, %c0_27] : memref<8x8x8xf32, #tpu.memory_space<vmem>>, vector<8x8x8xf32>
    tpu.vector_store %arg8[%c0_25, %c0_26, %c0_27], %28 {strides = array<i32>} : memref<8x8x8xf32, #tpu.memory_space<vmem>>, vector<8x8x8xf32>,
    %c0_28 = arith.constant 0 : index
    %c0_29 = arith.constant 0 : index
    %c0_30 = arith.constant 0 : index
    %30 = vector.load %arg6[%c0_28, %c0_29, %c0_30] : memref<8x8x1xf32, #tpu.memory_space<vmem>>, vector<8x8x1xf32>
    tpu.vector_store %arg6[%c0_28, %c0_29, %c0_30], %12 {strides = array<i32>} : memref<8x8x1xf32, #tpu.memory_space<vmem>>, vector<8x8x1xf32>,
    %c0_i32_31 = arith.constant 0 : i32
    %31 = arith.cmpi eq, %arg1, %c0_i32_31 : i32
    %32 = arith.extui %31 : i1 to i32
    %c0_i32_32 = arith.constant 0 : i32
    %33 = arith.cmpi ne, %32, %c0_i32_32 : i32
    scf.if %33 {
      %c0_33 = arith.constant 0 : index
      %c0_34 = arith.constant 0 : index
      %c0_35 = arith.constant 0 : index
      %34 = vector.load %arg8[%c0_33, %c0_34, %c0_35] : memref<8x8x8xf32, #tpu.memory_space<vmem>>, vector<8x8x8xf32>
      %c0_36 = arith.constant 0 : index
      %c0_37 = arith.constant 0 : index
      %c0_38 = arith.constant 0 : index
      %35 = vector.load %arg7[%c0_36, %c0_37, %c0_38] : memref<8x8x1xf32, #tpu.memory_space<vmem>>, vector<8x8x1xf32>
      %36 = tpu.reciprocal %35 {approx = true} : vector<8x8x1xf32> -> vector<8x8x1xf32>
      %37 = vector.broadcast %36 : vector<8x8x1xf32> to vector<8x8x8xf32>
      %38 = arith.mulf %34, %37 : vector<8x8x8xf32>
      %c0_39 = arith.constant 0 : index
      %c0_40 = arith.constant 0 : index
      %c0_41 = arith.constant 0 : index
      %39 = vector.load %arg5[%c0_39, %c0_40, %c0_41] : memref<8x8x8xf32, #tpu.memory_space<vmem>>, vector<8x8x8xf32>
      tpu.vector_store %arg5[%c0_39, %c0_40, %c0_41], %38 {strides = array<i32>} : memref<8x8x8xf32, #tpu.memory_space<vmem>>, vector<8x8x8xf32>,
    } else {
    }
    return
  }
  func.func @transform_0(%arg0: i32, %arg1: i32) -> (i32, i32, i32) {
    %c0_i32 = arith.constant 0 : i32
    %c0_i32_0 = arith.constant 0 : i32
    %c0_i32_1 = arith.constant 0 : i32
    return %c0_i32, %arg0, %c0_i32_0 : i32, i32, i32
  }
  func.func @transform_1(%arg0: i32, %arg1: i32) -> (i32, i32, i32) {
    %c0_i32 = arith.constant 0 : i32
    %c0_i32_0 = arith.constant 0 : i32
    %c0_i32_1 = arith.constant 0 : i32
    return %c0_i32, %arg1, %c0_i32_0 : i32, i32, i32
  }
  func.func @transform_2(%arg0: i32, %arg1: i32) -> (i32, i32, i32) {
    %c0_i32 = arith.constant 0 : i32
    %c0_i32_0 = arith.constant 0 : i32
    %c0_i32_1 = arith.constant 0 : i32
    return %c0_i32, %arg1, %c0_i32_0 : i32, i32, i32
  }
  func.func @transform_3(%arg0: i32, %arg1: i32) -> (i32, i32, i32) {
    %c0_i32 = arith.constant 0 : i32
    %c0_i32_0 = arith.constant 0 : i32
    %c0_i32_1 = arith.constant 0 : i32
    return %c0_i32, %arg0, %c0_i32_0 : i32, i32, i32
  }
}

module attributes {stable_mosaic.version = 11 : i64} {
  func.func @_linear_kernel(%arg0: i32, %arg1: i32, %arg2: i32, %arg3: memref<16x32xf32, #tpu.memory_space<vmem>>, %arg4: memref<32x32xf32, #tpu.memory_space<vmem>>, %arg5: memref<1x32xf32, #tpu.memory_space<vmem>>, %arg6: memref<16x32xf32, #tpu.memory_space<vmem>>, %arg7: memref<16x32xf32, #tpu.memory_space<vmem>>) attributes {dimension_semantics = [#tpu.dimension_semantics<parallel>, #tpu.dimension_semantics<parallel>, #tpu.dimension_semantics<arbitrary>], iteration_bounds = array<i64: 1, 1, 1>, scalar_prefetch = 0 : i64, scratch_operands = 1 : i64, tpu.core_type = #tpu.core_type<tc>, window_params = [{transform_indices = @transform_0, window_bounds = array<i64: 16, 32>}, {transform_indices = @transform_1, window_bounds = array<i64: 32, 32>}, {transform_indices = @transform_2, window_bounds = array<i64: 1, 32>}, {transform_indices = @transform_3, window_bounds = array<i64: 16, 32>}]} {
    %c0_i32 = arith.constant 0 : i32
    %0 = arith.cmpi eq, %arg2, %c0_i32 : i32
    %1 = arith.extui %0 : i1 to i32
    %c0_i32_0 = arith.constant 0 : i32
    %2 = arith.cmpi ne, %1, %c0_i32_0 : i32
    scf.if %2 {
      %cst_10 = arith.constant 0.000000e+00 : f32
      %12 = vector.broadcast %cst_10 : f32 to vector<16x32xf32>
      %c0_11 = arith.constant 0 : index
      %c0_12 = arith.constant 0 : index
      %13 = vector.load %arg7[%c0_11, %c0_12] : memref<16x32xf32, #tpu.memory_space<vmem>>, vector<16x32xf32>
      tpu.vector_store %arg7[%c0_11, %c0_12], %12 {strides = array<i32>} : memref<16x32xf32, #tpu.memory_space<vmem>>, vector<16x32xf32>,
    } else {
    }
    %c0 = arith.constant 0 : index
    %c0_1 = arith.constant 0 : index
    %3 = vector.load %arg7[%c0, %c0_1] : memref<16x32xf32, #tpu.memory_space<vmem>>, vector<16x32xf32>
    %c0_2 = arith.constant 0 : index
    %c0_3 = arith.constant 0 : index
    %4 = vector.load %arg3[%c0_2, %c0_3] : memref<16x32xf32, #tpu.memory_space<vmem>>, vector<16x32xf32>
    %c0_4 = arith.constant 0 : index
    %c0_5 = arith.constant 0 : index
    %5 = vector.load %arg4[%c0_4, %c0_5] : memref<32x32xf32, #tpu.memory_space<vmem>>, vector<32x32xf32>
    %cst = arith.constant dense<0.000000e+00> : vector<16x32xf32>
    %6 = tpu.matmul %4, %5, %cst {dimension_numbers = #tpu.dot_dimension_numbers<[1], [0], [0], [1], [0, 0, 1, 1], [], []>} : vector<16x32xf32>, vector<32x32xf32>, vector<16x32xf32> -> vector<16x32xf32>
    %7 = arith.addf %3, %6 : vector<16x32xf32>
    %c0_6 = arith.constant 0 : index
    %c0_7 = arith.constant 0 : index
    %8 = vector.load %arg7[%c0_6, %c0_7] : memref<16x32xf32, #tpu.memory_space<vmem>>, vector<16x32xf32>
    tpu.vector_store %arg7[%c0_6, %c0_7], %7 {strides = array<i32>} : memref<16x32xf32, #tpu.memory_space<vmem>>, vector<16x32xf32>,
    %c0_i32_8 = arith.constant 0 : i32
    %9 = arith.cmpi eq, %arg2, %c0_i32_8 : i32
    %10 = arith.extui %9 : i1 to i32
    %c0_i32_9 = arith.constant 0 : i32
    %11 = arith.cmpi ne, %10, %c0_i32_9 : i32
    scf.if %11 {
      %c0_10 = arith.constant 0 : index
      %c0_11 = arith.constant 0 : index
      %12 = vector.load %arg7[%c0_10, %c0_11] : memref<16x32xf32, #tpu.memory_space<vmem>>, vector<16x32xf32>
      %c0_12 = arith.constant 0 : index
      %c0_13 = arith.constant 0 : index
      %13 = vector.load %arg5[%c0_12, %c0_13] : memref<1x32xf32, #tpu.memory_space<vmem>>, vector<1x32xf32>
      %14 = vector.broadcast %13 : vector<1x32xf32> to vector<16x32xf32>
      %15 = arith.addf %12, %14 : vector<16x32xf32>
      %c0_14 = arith.constant 0 : index
      %c0_15 = arith.constant 0 : index
      %16 = vector.load %arg6[%c0_14, %c0_15] : memref<16x32xf32, #tpu.memory_space<vmem>>, vector<16x32xf32>
      tpu.vector_store %arg6[%c0_14, %c0_15], %15 {strides = array<i32>} : memref<16x32xf32, #tpu.memory_space<vmem>>, vector<16x32xf32>,
    } else {
    }
    return
  }
  func.func @transform_0(%arg0: i32, %arg1: i32, %arg2: i32) -> (i32, i32) {
    %c0_i32 = arith.constant 0 : i32
    return %arg0, %arg2 : i32, i32
  }
  func.func @transform_1(%arg0: i32, %arg1: i32, %arg2: i32) -> (i32, i32) {
    %c0_i32 = arith.constant 0 : i32
    return %arg2, %arg1 : i32, i32
  }
  func.func @transform_2(%arg0: i32, %arg1: i32, %arg2: i32) -> (i32, i32) {
    %c0_i32 = arith.constant 0 : i32
    %c0_i32_0 = arith.constant 0 : i32
    return %c0_i32, %arg1 : i32, i32
  }
  func.func @transform_3(%arg0: i32, %arg1: i32, %arg2: i32) -> (i32, i32) {
    %c0_i32 = arith.constant 0 : i32
    return %arg0, %arg1 : i32, i32
  }
}

module attributes {stable_mosaic.version = 11 : i64} {
  func.func @_ffn_add_ln_kernel(%arg0: i32, %arg1: memref<16x32xf32, #tpu.memory_space<vmem>>, %arg2: memref<32x128xf32, #tpu.memory_space<vmem>>, %arg3: memref<1x128xf32, #tpu.memory_space<vmem>>, %arg4: memref<128x32xf32, #tpu.memory_space<vmem>>, %arg5: memref<1x32xf32, #tpu.memory_space<vmem>>, %arg6: memref<1x32xf32, #tpu.memory_space<vmem>>, %arg7: memref<1x32xf32, #tpu.memory_space<vmem>>, %arg8: memref<16x32xf32, #tpu.memory_space<vmem>>) attributes {dimension_semantics = [#tpu.dimension_semantics<parallel>], iteration_bounds = array<i64: 1>, scalar_prefetch = 0 : i64, scratch_operands = 0 : i64, tpu.core_type = #tpu.core_type<tc>, window_params = [{transform_indices = @transform_0, window_bounds = array<i64: 16, 32>}, {pipeline_mode = #tpu.pipeline_mode<synchronous>, transform_indices = @transform_1, window_bounds = array<i64: 32, 128>}, {pipeline_mode = #tpu.pipeline_mode<synchronous>, transform_indices = @transform_2, window_bounds = array<i64: 1, 128>}, {pipeline_mode = #tpu.pipeline_mode<synchronous>, transform_indices = @transform_3, window_bounds = array<i64: 128, 32>}, {pipeline_mode = #tpu.pipeline_mode<synchronous>, transform_indices = @transform_4, window_bounds = array<i64: 1, 32>}, {pipeline_mode = #tpu.pipeline_mode<synchronous>, transform_indices = @transform_5, window_bounds = array<i64: 1, 32>}, {pipeline_mode = #tpu.pipeline_mode<synchronous>, transform_indices = @transform_6, window_bounds = array<i64: 1, 32>}, {transform_indices = @transform_7, window_bounds = array<i64: 16, 32>}]} {
    %c0 = arith.constant 0 : index
    %c0_0 = arith.constant 0 : index
    %0 = vector.load %arg1[%c0, %c0_0] : memref<16x32xf32, #tpu.memory_space<vmem>>, vector<16x32xf32>
    %c0_1 = arith.constant 0 : index
    %c0_2 = arith.constant 0 : index
    %1 = vector.load %arg2[%c0_1, %c0_2] : memref<32x128xf32, #tpu.memory_space<vmem>>, vector<32x128xf32>
    %cst = arith.constant dense<0.000000e+00> : vector<16x128xf32>
    %2 = tpu.matmul %0, %1, %cst {dimension_numbers = #tpu.dot_dimension_numbers<[1], [0], [0], [1], [0, 0, 1, 1], [], []>} : vector<16x32xf32>, vector<32x128xf32>, vector<16x128xf32> -> vector<16x128xf32>
    %c0_3 = arith.constant 0 : index
    %c0_4 = arith.constant 0 : index
    %3 = vector.load %arg3[%c0_3, %c0_4] : memref<1x128xf32, #tpu.memory_space<vmem>>, vector<1x128xf32>
    %4 = vector.broadcast %3 : vector<1x128xf32> to vector<16x128xf32>
    %5 = arith.addf %2, %4 : vector<16x128xf32>
    %cst_5 = arith.constant 5.000000e-01 : f32
    %6 = vector.broadcast %cst_5 : f32 to vector<16x128xf32>
    %7 = arith.mulf %6, %5 : vector<16x128xf32>
    %cst_6 = arith.constant 0.707106769 : f32
    %8 = vector.broadcast %cst_6 : f32 to vector<16x128xf32>
    %9 = arith.mulf %5, %8 : vector<16x128xf32>
    %10 = math.erf %9 : vector<16x128xf32>
    %cst_7 = arith.constant 1.000000e+00 : f32
    %11 = vector.broadcast %cst_7 : f32 to vector<16x128xf32>
    %12 = arith.addf %11, %10 : vector<16x128xf32>
    %13 = arith.mulf %7, %12 : vector<16x128xf32>
    %c0_8 = arith.constant 0 : index
    %c0_9 = arith.constant 0 : index
    %14 = vector.load %arg4[%c0_8, %c0_9] : memref<128x32xf32, #tpu.memory_space<vmem>>, vector<128x32xf32>
    %cst_10 = arith.constant dense<0.000000e+00> : vector<16x32xf32>
    %15 = tpu.matmul %13, %14, %cst_10 {dimension_numbers = #tpu.dot_dimension_numbers<[1], [0], [0], [1], [0, 0, 1, 1], [], []>} : vector<16x128xf32>, vector<128x32xf32>, vector<16x32xf32> -> vector<16x32xf32>
    %c0_11 = arith.constant 0 : index
    %c0_12 = arith.constant 0 : index
    %16 = vector.load %arg5[%c0_11, %c0_12] : memref<1x32xf32, #tpu.memory_space<vmem>>, vector<1x32xf32>
    %17 = vector.broadcast %16 : vector<1x32xf32> to vector<16x32xf32>
    %18 = arith.addf %15, %17 : vector<16x32xf32>
    %19 = arith.addf %0, %18 : vector<16x32xf32>
    %c0_13 = arith.constant 0 : index
    %c0_14 = arith.constant 0 : index
    %20 = vector.load %arg6[%c0_13, %c0_14] : memref<1x32xf32, #tpu.memory_space<vmem>>, vector<1x32xf32>
    %c0_15 = arith.constant 0 : index
    %c0_16 = arith.constant 0 : index
    %21 = vector.load %arg7[%c0_15, %c0_16] : memref<1x32xf32, #tpu.memory_space<vmem>>, vector<1x32xf32>
    %cst_17 = arith.constant dense<0.000000e+00> : vector<16xf32>
    %22 = vector.multi_reduction <add>, %19, %cst_17 [1] : vector<16x32xf32> to vector<16xf32>
    %23 = vector.shape_cast %22 : vector<16xf32> to vector<16x1xf32>
    %cst_18 = arith.constant 3.200000e+01 : f32
    %24 = vector.broadcast %cst_18 : f32 to vector<16x1xf32>
    %25 = arith.divf %23, %24 : vector<16x1xf32>
    %26 = vector.broadcast %25 : vector<16x1xf32> to vector<16x32xf32>
    %27 = arith.subf %19, %26 : vector<16x32xf32>
    %28 = arith.mulf %27, %27 : vector<16x32xf32>
    %cst_19 = arith.constant dense<0.000000e+00> : vector<16xf32>
    %29 = vector.multi_reduction <add>, %28, %cst_19 [1] : vector<16x32xf32> to vector<16xf32>
    %30 = vector.shape_cast %29 : vector<16xf32> to vector<16x1xf32>
    %cst_20 = arith.constant 3.200000e+01 : f32
    %31 = vector.broadcast %cst_20 : f32 to vector<16x1xf32>
    %32 = arith.divf %30, %31 : vector<16x1xf32>
    %33 = vector.broadcast %25 : vector<16x1xf32> to vector<16x32xf32>
    %34 = arith.subf %19, %33 : vector<16x32xf32>
    %cst_21 = arith.constant 9.99999974E-6 : f32
    %35 = vector.broadcast %cst_21 : f32 to vector<16x1xf32>
    %36 = arith.addf %32, %35 : vector<16x1xf32>
    %37 = math.rsqrt %36 : vector<16x1xf32>
    %38 = vector.broadcast %37 : vector<16x1xf32> to vector<16x32xf32>
    %39 = arith.mulf %34, %38 : vector<16x32xf32>
    %40 = vector.broadcast %20 : vector<1x32xf32> to vector<16x32xf32>
    %41 = arith.mulf %39, %40 : vector<16x32xf32>
    %42 = vector.broadcast %21 : vector<1x32xf32> to vector<16x32xf32>
    %43 = arith.addf %41, %42 : vector<16x32xf32>
    %c0_22 = arith.constant 0 : index
    %c0_23 = arith.constant 0 : index
    %44 = vector.load %arg8[%c0_22, %c0_23] : memref<16x32xf32, #tpu.memory_space<vmem>>, vector<16x32xf32>
    tpu.vector_store %arg8[%c0_22, %c0_23], %43 {strides = array<i32>} : memref<16x32xf32, #tpu.memory_space<vmem>>, vector<16x32xf32>,
    return
  }
  func.func @transform_0(%arg0: i32) -> (i32, i32) {
    %c0_i32 = arith.constant 0 : i32
    %c0_i32_0 = arith.constant 0 : i32
    return %arg0, %c0_i32 : i32, i32
  }
  func.func @transform_1(%arg0: i32) -> (i32, i32) {
    %c0_i32 = arith.constant 0 : i32
    %c0_i32_0 = arith.constant 0 : i32
    %c0_i32_1 = arith.constant 0 : i32
    return %c0_i32, %c0_i32_0 : i32, i32
  }
  func.func @transform_2(%arg0: i32) -> (i32, i32) {
    %c0_i32 = arith.constant 0 : i32
    %c0_i32_0 = arith.constant 0 : i32
    %c0_i32_1 = arith.constant 0 : i32
    return %c0_i32, %c0_i32_0 : i32, i32
  }
  func.func @transform_3(%arg0: i32) -> (i32, i32) {
    %c0_i32 = arith.constant 0 : i32
    %c0_i32_0 = arith.constant 0 : i32
    %c0_i32_1 = arith.constant 0 : i32
    return %c0_i32, %c0_i32_0 : i32, i32
  }
  func.func @transform_4(%arg0: i32) -> (i32, i32) {
    %c0_i32 = arith.constant 0 : i32
    %c0_i32_0 = arith.constant 0 : i32
    %c0_i32_1 = arith.constant 0 : i32
    return %c0_i32, %c0_i32_0 : i32, i32
  }
  func.func @transform_5(%arg0: i32) -> (i32, i32) {
    %c0_i32 = arith.constant 0 : i32
    %c0_i32_0 = arith.constant 0 : i32
    %c0_i32_1 = arith.constant 0 : i32
    return %c0_i32, %c0_i32_0 : i32, i32
  }
  func.func @transform_6(%arg0: i32) -> (i32, i32) {
    %c0_i32 = arith.constant 0 : i32
    %c0_i32_0 = arith.constant 0 : i32
    %c0_i32_1 = arith.constant 0 : i32
    return %c0_i32, %c0_i32_0 : i32, i32
  }
  func.func @transform_7(%arg0: i32) -> (i32, i32) {
    %c0_i32 = arith.constant 0 : i32
    %c0_i32_0 = arith.constant 0 : i32
    return %arg0, %c0_i32 : i32, i32
  }
}

module attributes {stable_mosaic.version = 11 : i64} {
  func.func @_linear_kernel(%arg0: i32, %arg1: i32, %arg2: i32, %arg3: memref<16x32xf32, #tpu.memory_space<vmem>>, %arg4: memref<32x64xf32, #tpu.memory_space<vmem>>, %arg5: memref<1x64xf32, #tpu.memory_space<vmem>>, %arg6: memref<16x64xf32, #tpu.memory_space<vmem>>, %arg7: memref<16x64xf32, #tpu.memory_space<vmem>>) attributes {dimension_semantics = [#tpu.dimension_semantics<parallel>, #tpu.dimension_semantics<parallel>, #tpu.dimension_semantics<arbitrary>], iteration_bounds = array<i64: 1, 1, 1>, scalar_prefetch = 0 : i64, scratch_operands = 1 : i64, tpu.core_type = #tpu.core_type<tc>, window_params = [{transform_indices = @transform_0, window_bounds = array<i64: 16, 32>}, {transform_indices = @transform_1, window_bounds = array<i64: 32, 64>}, {transform_indices = @transform_2, window_bounds = array<i64: 1, 64>}, {transform_indices = @transform_3, window_bounds = array<i64: 16, 64>}]} {
    %c0_i32 = arith.constant 0 : i32
    %0 = arith.cmpi eq, %arg2, %c0_i32 : i32
    %1 = arith.extui %0 : i1 to i32
    %c0_i32_0 = arith.constant 0 : i32
    %2 = arith.cmpi ne, %1, %c0_i32_0 : i32
    scf.if %2 {
      %cst_10 = arith.constant 0.000000e+00 : f32
      %12 = vector.broadcast %cst_10 : f32 to vector<16x64xf32>
      %c0_11 = arith.constant 0 : index
      %c0_12 = arith.constant 0 : index
      %13 = vector.load %arg7[%c0_11, %c0_12] : memref<16x64xf32, #tpu.memory_space<vmem>>, vector<16x64xf32>
      tpu.vector_store %arg7[%c0_11, %c0_12], %12 {strides = array<i32>} : memref<16x64xf32, #tpu.memory_space<vmem>>, vector<16x64xf32>,
    } else {
    }
    %c0 = arith.constant 0 : index
    %c0_1 = arith.constant 0 : index
    %3 = vector.load %arg7[%c0, %c0_1] : memref<16x64xf32, #tpu.memory_space<vmem>>, vector<16x64xf32>
    %c0_2 = arith.constant 0 : index
    %c0_3 = arith.constant 0 : index
    %4 = vector.load %arg3[%c0_2, %c0_3] : memref<16x32xf32, #tpu.memory_space<vmem>>, vector<16x32xf32>
    %c0_4 = arith.constant 0 : index
    %c0_5 = arith.constant 0 : index
    %5 = vector.load %arg4[%c0_4, %c0_5] : memref<32x64xf32, #tpu.memory_space<vmem>>, vector<32x64xf32>
    %cst = arith.constant dense<0.000000e+00> : vector<16x64xf32>
    %6 = tpu.matmul %4, %5, %cst {dimension_numbers = #tpu.dot_dimension_numbers<[1], [0], [0], [1], [0, 0, 1, 1], [], []>} : vector<16x32xf32>, vector<32x64xf32>, vector<16x64xf32> -> vector<16x64xf32>
    %7 = arith.addf %3, %6 : vector<16x64xf32>
    %c0_6 = arith.constant 0 : index
    %c0_7 = arith.constant 0 : index
    %8 = vector.load %arg7[%c0_6, %c0_7] : memref<16x64xf32, #tpu.memory_space<vmem>>, vector<16x64xf32>
    tpu.vector_store %arg7[%c0_6, %c0_7], %7 {strides = array<i32>} : memref<16x64xf32, #tpu.memory_space<vmem>>, vector<16x64xf32>,
    %c0_i32_8 = arith.constant 0 : i32
    %9 = arith.cmpi eq, %arg2, %c0_i32_8 : i32
    %10 = arith.extui %9 : i1 to i32
    %c0_i32_9 = arith.constant 0 : i32
    %11 = arith.cmpi ne, %10, %c0_i32_9 : i32
    scf.if %11 {
      %c0_10 = arith.constant 0 : index
      %c0_11 = arith.constant 0 : index
      %12 = vector.load %arg7[%c0_10, %c0_11] : memref<16x64xf32, #tpu.memory_space<vmem>>, vector<16x64xf32>
      %c0_12 = arith.constant 0 : index
      %c0_13 = arith.constant 0 : index
      %13 = vector.load %arg5[%c0_12, %c0_13] : memref<1x64xf32, #tpu.memory_space<vmem>>, vector<1x64xf32>
      %14 = vector.broadcast %13 : vector<1x64xf32> to vector<16x64xf32>
      %15 = arith.addf %12, %14 : vector<16x64xf32>
      %c0_14 = arith.constant 0 : index
      %c0_15 = arith.constant 0 : index
      %16 = vector.load %arg6[%c0_14, %c0_15] : memref<16x64xf32, #tpu.memory_space<vmem>>, vector<16x64xf32>
      tpu.vector_store %arg6[%c0_14, %c0_15], %15 {strides = array<i32>} : memref<16x64xf32, #tpu.memory_space<vmem>>, vector<16x64xf32>,
    } else {
    }
    return
  }
  func.func @transform_0(%arg0: i32, %arg1: i32, %arg2: i32) -> (i32, i32) {
    %c0_i32 = arith.constant 0 : i32
    return %arg0, %arg2 : i32, i32
  }
  func.func @transform_1(%arg0: i32, %arg1: i32, %arg2: i32) -> (i32, i32) {
    %c0_i32 = arith.constant 0 : i32
    return %arg2, %arg1 : i32, i32
  }
  func.func @transform_2(%arg0: i32, %arg1: i32, %arg2: i32) -> (i32, i32) {
    %c0_i32 = arith.constant 0 : i32
    %c0_i32_0 = arith.constant 0 : i32
    return %c0_i32, %arg1 : i32, i32
  }
  func.func @transform_3(%arg0: i32, %arg1: i32, %arg2: i32) -> (i32, i32) {
    %c0_i32 = arith.constant 0 : i32
    return %arg0, %arg1 : i32, i32
  }
}

module attributes {stable_mosaic.version = 11 : i64} {
  func.func @_mlp_head_kernel(%arg0: i32, %arg1: i32, %arg2: memref<16x32xf32, #tpu.memory_space<vmem>>, %arg3: memref<32x64xf32, #tpu.memory_space<vmem>>, %arg4: memref<1x64xf32, #tpu.memory_space<vmem>>, %arg5: memref<64x64xf32, #tpu.memory_space<vmem>>, %arg6: memref<1x64xf32, #tpu.memory_space<vmem>>, %arg7: memref<16x64xf32, #tpu.memory_space<vmem>>, %arg8: memref<16x64xf32, #tpu.memory_space<vmem>>) attributes {dimension_semantics = [#tpu.dimension_semantics<parallel>, #tpu.dimension_semantics<arbitrary>], iteration_bounds = array<i64: 1, 1>, scalar_prefetch = 0 : i64, scratch_operands = 1 : i64, tpu.core_type = #tpu.core_type<tc>, window_params = [{transform_indices = @transform_0, window_bounds = array<i64: 16, 32>}, {pipeline_mode = #tpu.pipeline_mode<synchronous>, transform_indices = @transform_1, window_bounds = array<i64: 32, 64>}, {pipeline_mode = #tpu.pipeline_mode<synchronous>, transform_indices = @transform_2, window_bounds = array<i64: 1, 64>}, {transform_indices = @transform_3, window_bounds = array<i64: 64, 64>}, {transform_indices = @transform_4, window_bounds = array<i64: 1, 64>}, {transform_indices = @transform_5, window_bounds = array<i64: 16, 64>}]} {
    %c0_i32 = arith.constant 0 : i32
    %0 = arith.cmpi eq, %arg1, %c0_i32 : i32
    %1 = arith.extui %0 : i1 to i32
    %c0_i32_0 = arith.constant 0 : i32
    %2 = arith.cmpi ne, %1, %c0_i32_0 : i32
    scf.if %2 {
      %c0_8 = arith.constant 0 : index
      %c0_9 = arith.constant 0 : index
      %10 = vector.load %arg2[%c0_8, %c0_9] : memref<16x32xf32, #tpu.memory_space<vmem>>, vector<16x32xf32>
      %c0_10 = arith.constant 0 : index
      %c0_11 = arith.constant 0 : index
      %11 = vector.load %arg3[%c0_10, %c0_11] : memref<32x64xf32, #tpu.memory_space<vmem>>, vector<32x64xf32>
      %cst_12 = arith.constant dense<0.000000e+00> : vector<16x64xf32>
      %12 = tpu.matmul %10, %11, %cst_12 {dimension_numbers = #tpu.dot_dimension_numbers<[1], [0], [0], [1], [0, 0, 1, 1], [], []>} : vector<16x32xf32>, vector<32x64xf32>, vector<16x64xf32> -> vector<16x64xf32>
      %c0_13 = arith.constant 0 : index
      %c0_14 = arith.constant 0 : index
      %13 = vector.load %arg4[%c0_13, %c0_14] : memref<1x64xf32, #tpu.memory_space<vmem>>, vector<1x64xf32>
      %14 = vector.broadcast %13 : vector<1x64xf32> to vector<16x64xf32>
      %15 = arith.addf %12, %14 : vector<16x64xf32>
      %cst_15 = arith.constant 5.000000e-01 : f32
      %16 = vector.broadcast %cst_15 : f32 to vector<16x64xf32>
      %17 = arith.mulf %16, %15 : vector<16x64xf32>
      %cst_16 = arith.constant 0.707106769 : f32
      %18 = vector.broadcast %cst_16 : f32 to vector<16x64xf32>
      %19 = arith.mulf %15, %18 : vector<16x64xf32>
      %20 = math.erf %19 : vector<16x64xf32>
      %cst_17 = arith.constant 1.000000e+00 : f32
      %21 = vector.broadcast %cst_17 : f32 to vector<16x64xf32>
      %22 = arith.addf %21, %20 : vector<16x64xf32>
      %23 = arith.mulf %17, %22 : vector<16x64xf32>
      %c0_18 = arith.constant 0 : index
      %c0_19 = arith.constant 0 : index
      %24 = vector.load %arg8[%c0_18, %c0_19] : memref<16x64xf32, #tpu.memory_space<vmem>>, vector<16x64xf32>
      tpu.vector_store %arg8[%c0_18, %c0_19], %23 {strides = array<i32>} : memref<16x64xf32, #tpu.memory_space<vmem>>, vector<16x64xf32>,
    } else {
    }
    %c0 = arith.constant 0 : index
    %c0_1 = arith.constant 0 : index
    %3 = vector.load %arg8[%c0, %c0_1] : memref<16x64xf32, #tpu.memory_space<vmem>>, vector<16x64xf32>
    %c0_2 = arith.constant 0 : index
    %c0_3 = arith.constant 0 : index
    %4 = vector.load %arg5[%c0_2, %c0_3] : memref<64x64xf32, #tpu.memory_space<vmem>>, vector<64x64xf32>
    %cst = arith.constant dense<0.000000e+00> : vector<16x64xf32>
    %5 = tpu.matmul %3, %4, %cst {dimension_numbers = #tpu.dot_dimension_numbers<[1], [0], [0], [1], [0, 0, 1, 1], [], []>} : vector<16x64xf32>, vector<64x64xf32>, vector<16x64xf32> -> vector<16x64xf32>
    %c0_4 = arith.constant 0 : index
    %c0_5 = arith.constant 0 : index
    %6 = vector.load %arg6[%c0_4, %c0_5] : memref<1x64xf32, #tpu.memory_space<vmem>>, vector<1x64xf32>
    %7 = vector.broadcast %6 : vector<1x64xf32> to vector<16x64xf32>
    %8 = arith.addf %5, %7 : vector<16x64xf32>
    %c0_6 = arith.constant 0 : index
    %c0_7 = arith.constant 0 : index
    %9 = vector.load %arg7[%c0_6, %c0_7] : memref<16x64xf32, #tpu.memory_space<vmem>>, vector<16x64xf32>
    tpu.vector_store %arg7[%c0_6, %c0_7], %8 {strides = array<i32>} : memref<16x64xf32, #tpu.memory_space<vmem>>, vector<16x64xf32>,
    return
  }
  func.func @transform_0(%arg0: i32, %arg1: i32) -> (i32, i32) {
    %c0_i32 = arith.constant 0 : i32
    %c0_i32_0 = arith.constant 0 : i32
    return %arg0, %c0_i32 : i32, i32
  }
  func.func @transform_1(%arg0: i32, %arg1: i32) -> (i32, i32) {
    %c0_i32 = arith.constant 0 : i32
    %c0_i32_0 = arith.constant 0 : i32
    %c0_i32_1 = arith.constant 0 : i32
    return %c0_i32, %c0_i32_0 : i32, i32
  }
  func.func @transform_2(%arg0: i32, %arg1: i32) -> (i32, i32) {
    %c0_i32 = arith.constant 0 : i32
    %c0_i32_0 = arith.constant 0 : i32
    %c0_i32_1 = arith.constant 0 : i32
    return %c0_i32, %c0_i32_0 : i32, i32
  }
  func.func @transform_3(%arg0: i32, %arg1: i32) -> (i32, i32) {
    %c0_i32 = arith.constant 0 : i32
    %c0_i32_0 = arith.constant 0 : i32
    return %c0_i32, %arg1 : i32, i32
  }
  func.func @transform_4(%arg0: i32, %arg1: i32) -> (i32, i32) {
    %c0_i32 = arith.constant 0 : i32
    %c0_i32_0 = arith.constant 0 : i32
    return %c0_i32, %arg1 : i32, i32
  }
  func.func @transform_5(%arg0: i32, %arg1: i32) -> (i32, i32) {
    %c0_i32 = arith.constant 0 : i32
    return %arg0, %arg1 : i32, i32
  }
}

</mosaic_0001>

<bundles_post_ra>
// kernel: micro_llm_forward.28
= control target key start
LH: loop header
LB: loop body
LE: loop exit
PB: predicated region body
PF: predicated region fallthrough
CT: control target
= control target key end

     0   :  { %vm18_vm0 = vcmask 261120   ;;  %s118_s0 = inlined_call_operand.vmem [shape: f32[16,32], index: 0, kind: input, shape index: {}]   ;;  %s119_s1 = inlined_call_operand.vmem [shape: f32[1,32], index: 1, kind: input, shape index: {}]   ;;  %s120_s2 = inlined_call_operand.vmem [shape: f32[1,32], index: 2, kind: input, shape index: {}]   ;;  %s121_s3 = inlined_call_operand.vmem [shape: f32[16,32], index: 3, kind: output, shape index: {}]  }
   0x1   :  { %v14_v0 = vld [vmem:[%s118_s0] sm:$0xff]  ;;  %v15_v1 = vld [vmem:[%s118_s0 + $0x8] sm:$0xff] }
   0x2   :  { %v19_v2 = vsel %vm18_vm0, %v14_v0, 0.0  ;;  %v22_v3 = vsel %vm18_vm0, %v15_v1, 0.0  ;;  %v68_v21 = vld [vmem:[%s119_s1] ss:$0 sm:$0xff] }
   0x3   :  { %20 = vadd.xlane.f32.xlu0 %v19_v2  ;;  %v69_v23 = vld [vmem:[%s120_s2] ss:$0 sm:$0xff] }
   0x7   :  { %23 = vadd.xlane.f32.xlu0 %v22_v3 }
  0x90   :  { %v21_v4 = vpop.xlane.xlu0 %20 }
  0x91   :  { %v26_v5 = vmul.f32 0.03125, %v21_v4 }
  0x93   :  { %v28_v6 = vsub.f32 %v14_v0, %v26_v5 }
  0x94   :  { %v24_v7 = vpop.xlane.xlu0 %23 }
  0x95   :  { %v27_v8 = vmul.f32 0.03125, %v24_v7  ;;  %v30_v9 = vmul.f32 %v28_v6, %v28_v6 }
  0x97   :  { %v29_v10 = vsub.f32 %v15_v1, %v27_v8  ;;  %v32_v11 = vsel %vm18_vm0, %v30_v9, 0.0 }
  0x98   :  { %33 = vadd.xlane.f32.xlu1 %v32_v11 }
  0x99   :  { %v31_v12 = vmul.f32 %v29_v10, %v29_v10 }
  0x9b   :  { %v35_v13 = vsel %vm18_vm0, %v31_v12, 0.0 }
  0x9c   :  { %36 = vadd.xlane.f32.xlu1 %v35_v13 }
 0x125   :  { %v34_v14 = vpop.xlane.xlu1 %33 }
 0x126   :  { %v38_v15 = vmul.f32 0.03125, %v34_v14 }
 0x128   :  { %v40_v16 = vadd.f32 1e-05, %v38_v15 }
 0x129   :  { %v37_v17 = vpop.xlane.xlu1 %36 }
 0x12a   :  { %70 = vrsqrt.f32 %v40_v16  ;;  %v39_v18 = vmul.f32 0.03125, %v37_v17 }
 0x12c   :  { %v41_v19 = vadd.f32 1e-05, %v39_v18 }
 0x12e   :  { %72 = vrsqrt.f32 %v41_v19 }
 0x134   :  { %v71_v20 = vpop.eup %70 }
 0x135   :  { %v44_v22 = vmul.f32 %v71_v20, %v28_v6 }
 0x137   :  { %v52_v24 = vmul.f32 %v68_v21, %v44_v22 }
 0x138   :  { %v73_v25 = vpop.eup %72 }
 0x139   :  { %v60_v26 = vadd.f32 %v69_v23, %v52_v24  ;;  %v45_v27 = vmul.f32 %v73_v25, %v29_v10 }
 0x13b   :  { %62 = vst.msk [vmem:[%s121_s3] sm:$0xff] %vm18_vm0, %v60_v26  ;;  %v53_v28 = vmul.f32 %v68_v21, %v45_v27 }
 0x13d   :  { %v61_v29 = vadd.f32 %v69_v23, %v53_v28 }
 0x13f   :  { %63 = vst.msk [vmem:[%s121_s3 + $0x8] sm:$0xff] %vm18_vm0, %v61_v29 }

// kernel: micro_llm_forward.37
= control target key start
LH: loop header
LB: loop body
LE: loop exit
PB: predicated region body
PF: predicated region fallthrough
CT: control target
= control target key end

     0   :  { %vm29_vm0 = vcmask 261120   ;;  %vm18_vm1 = vcmask 785408   ;;  %v165_v3 = vmov 0.0   ;;  %s221_s1 = inlined_call_operand.vmem [shape: f32[32,96], index: 1, kind: input, shape index: {}]   ;;  %s222_s0 = inlined_call_operand.vmem [shape: f32[16,32], index: 0, kind: input, shape index: {}]   ;;  %s223_s2 = inlined_call_operand.vmem [shape: f32[1,96], index: 2, kind: input, shape index: {}]   ;;  %s224_s3 = inlined_call_operand.vmem [shape: f32[16,96], index: 3, kind: output, shape index: {}]  }
   0x1   :  { %v25_v0 = vld [vmem:[%s221_s1] sm:$0xff]  ;;  %v26_v1 = vld [vmem:[%s221_s1 + $0x8] sm:$0xff]  ;;  %v27_v2 = vld [vmem:[%s221_s1 + $0x10] sm:$0xff]  ;;  %20 = vst.msk [vmem:[#allocation2 + $0x8] sm:$0xff] %vm18_vm1, %v165_v3 }
   0x2   :  { %19 = vst.msk [vmem:[#allocation2] sm:$0xff] %vm18_vm1, %v165_v3  ;;  %v156_v4 = vpack.c.bf16 %v26_v1, %v25_v0  ;;  %v28_v5 = vld [vmem:[%s221_s1 + $0x18] sm:$0xff]  ;;  %v23_v6 = vld [vmem:[%s222_s0] sm:$0xff]  ;;  %v24_v8 = vld [vmem:[%s222_s0 + $0x8] sm:$0xff] }
   0x3   :  { %v160_v7 = vpack.c.bf16 %v28_v5, %v27_v2  ;;  %153 = vmatprep.mubr.msk.f32.mxu0 %vm29_vm0, %v23_v6  ;;  %v138_v15 = vld [vmem:[%s223_s2] ss:$0 sm:$0xff] }
   0x4   :  { %157 = vmatprep.subr.bf16.mxu0 %v156_v4 }
   0x5   :  { %159 = vmatpush3.bf16.msra.mxu0 %v156_v4 }
   0x6   :  { %161 = vmatprep.subr.bf16.mxu0 %v160_v7 }
   0x8   :  { %v22_v9 = vld [vmem:[#allocation2 + $0x8] sm:$0xff] }
   0x9   :  { %163 = vmatpush3.bf16.msra.mxu0 %v160_v7  ;;  %v21_v10 = vld [vmem:[#allocation2] sm:$0xff] }
   0xc   :  { %154 = vmatmul.mubr.msk.f32.vlgmr.msra.gmra.mrb[0].mxu0 %vm29_vm0, %v24_v8 }
  0xdf   :  { %v155_v11 = vpop.f32.mrb[0].mxu0 }
  0xe0   :  { %v112_v12 = vadd.f32 %v155_v11, %v22_v9  ;;  %v102_v13 = vpop.f32.mrb[1].mxu0 }
  0xe1   :  { %v111_v14 = vadd.f32 %v102_v13, %v21_v10 }
  0xe2   :  { %115 = vst.msk [vmem:[#allocation2 + $0x8] sm:$0xff] %vm18_vm1, %v112_v12 }
  0xe3   :  { %114 = vst.msk [vmem:[#allocation2] sm:$0xff] %vm18_vm1, %v111_v14 }
  0xe9   :  { %v120_v16 = vld [vmem:[#allocation2 + $0x8] sm:$0xff] }
  0xea   :  { %v129_v17 = vadd.f32 %v138_v15, %v120_v16  ;;  %v119_v18 = vld [vmem:[#allocation2] sm:$0xff] }
  0xeb   :  { %v128_v19 = vadd.f32 %v138_v15, %v119_v18 }
  0xec   :  { %131 = vst.msk [vmem:[%s224_s3 + $0x8] sm:$0xff] %vm18_vm1, %v129_v17 }
  0xed   :  { %130 = vst.msk [vmem:[%s224_s3] sm:$0xff] %vm18_vm1, %v128_v19 }

// kernel: micro_llm_forward.39
= control target key start
LH: loop header
LB: loop body
LE: loop exit
PB: predicated region body
PF: predicated region fallthrough
CT: control target
= control target key end

     0   :  { %vm36_vm0 = vcmask 261120   ;;  %s289_s1 = inlined_call_operand.vmem [shape: f32[32,32], index: 1, kind: input, shape index: {}]   ;;  %s290_s0 = inlined_call_operand.vmem [shape: f32[16,32], index: 0, kind: input, shape index: {}]   ;;  %s291_s2 = inlined_call_operand.vmem [shape: f32[1,32], index: 2, kind: input, shape index: {}]   ;;  %s292_s3 = inlined_call_operand.vmem [shape: f32[16,32], index: 3, kind: input, shape index: {}]   ;;  %s293_s4 = inlined_call_operand.vmem [shape: f32[1,32], index: 4, kind: input, shape index: {}]   ;;  %s294_s5 = inlined_call_operand.vmem [shape: f32[1,32], index: 5, kind: input, shape index: {}]   ;;  %s295_s6 = inlined_call_operand.vmem [shape: f32[16,32], index: 6, kind: output, shape index: {}]  }
   0x1   :  { %v25_v0 = vld [vmem:[%s289_s1] sm:$0xff]  ;;  %v26_v1 = vld [vmem:[%s289_s1 + $0x8] sm:$0xff]  ;;  %v27_v2 = vld [vmem:[%s289_s1 + $0x10] sm:$0xff] }
   0x2   :  { %v195_v3 = vpack.c.bf16 %v26_v1, %v25_v0  ;;  %v28_v4 = vld [vmem:[%s289_s1 + $0x18] sm:$0xff]  ;;  %v23_v5 = vld [vmem:[%s290_s0] sm:$0xff]  ;;  %v24_v7 = vld [vmem:[%s290_s0 + $0x8] sm:$0xff] }
   0x3   :  { %v199_v6 = vpack.c.bf16 %v28_v4, %v27_v2  ;;  %192 = vmatprep.mubr.msk.f32.mxu0 %vm36_vm0, %v23_v5  ;;  %v173_v8 = vld [vmem:[%s291_s2] ss:$0 sm:$0xff]  ;;  %v119_v14 = vld [vmem:[%s292_s3 + $0x8] sm:$0xff] }
   0x4   :  { %196 = vmatprep.subr.bf16.mxu0 %v195_v3  ;;  %v118_v11 = vld [vmem:[%s292_s3] sm:$0xff] }
   0x5   :  { %198 = vmatpush3.bf16.msra.mxu0 %v195_v3  ;;  %v176_v36 = vld [vmem:[%s293_s4] ss:$0 sm:$0xff] }
   0x6   :  { %200 = vmatprep.subr.bf16.mxu0 %v199_v6  ;;  %v177_v38 = vld [vmem:[%s294_s5] ss:$0 sm:$0xff] }
   0x9   :  { %202 = vmatpush3.bf16.msra.mxu0 %v199_v6 }
   0xc   :  { %193 = vmatmul.mubr.msk.f32.vlgmr.msra.gmra.mrb[0].mxu0 %vm36_vm0, %v24_v7 }
  0xdf   :  { %v194_v9 = vpop.f32.mrb[0].mxu0 }
  0xe0   :  { %v109_v10 = vpop.f32.mrb[1].mxu0  ;;  %v115_v12 = vadd.f32 %v194_v9, %v173_v8 }
  0xe1   :  { %v110_v13 = vadd.f32 %v173_v8, %v109_v10 }
  0xe2   :  { %v121_v17 = vadd.f32 %v119_v14, %v115_v12 }
  0xe3   :  { %v120_v15 = vadd.f32 %v118_v11, %v110_v13 }
  0xe4   :  { %v127_v18 = vsel %vm36_vm0, %v121_v17, 0.0 }
  0xe5   :  { %v124_v16 = vsel %vm36_vm0, %v120_v15, 0.0 }
  0xe6   :  { %125 = vadd.xlane.f32.xlu0 %v124_v16 }
  0xea   :  { %128 = vadd.xlane.f32.xlu0 %v127_v18 }
 0x173   :  { %v126_v19 = vpop.xlane.xlu0 %125 }
 0x174   :  { %v131_v20 = vmul.f32 0.03125, %v126_v19 }
 0x176   :  { %v133_v21 = vsub.f32 %v120_v15, %v131_v20 }
 0x177   :  { %v129_v22 = vpop.xlane.xlu0 %128 }
 0x178   :  { %v132_v23 = vmul.f32 0.03125, %v129_v22  ;;  %v135_v24 = vmul.f32 %v133_v21, %v133_v21 }
 0x17a   :  { %v134_v25 = vsub.f32 %v121_v17, %v132_v23  ;;  %v137_v26 = vsel %vm36_vm0, %v135_v24, 0.0 }
 0x17b   :  { %138 = vadd.xlane.f32.xlu1 %v137_v26 }
 0x17c   :  { %v136_v27 = vmul.f32 %v134_v25, %v134_v25 }
 0x17e   :  { %v140_v28 = vsel %vm36_vm0, %v136_v27, 0.0 }
 0x17f   :  { %141 = vadd.xlane.f32.xlu1 %v140_v28 }
 0x208   :  { %v139_v29 = vpop.xlane.xlu1 %138 }
 0x209   :  { %v143_v30 = vmul.f32 0.03125, %v139_v29 }
 0x20b   :  { %v145_v31 = vadd.f32 1e-05, %v143_v30 }
 0x20c   :  { %v142_v32 = vpop.xlane.xlu1 %141 }
 0x20d   :  { %203 = vrsqrt.f32 %v145_v31  ;;  %v144_v33 = vmul.f32 0.03125, %v142_v32 }
 0x20f   :  { %v146_v34 = vadd.f32 1e-05, %v144_v33 }
 0x211   :  { %205 = vrsqrt.f32 %v146_v34 }
 0x217   :  { %v204_v35 = vpop.eup %203 }
 0x218   :  { %v149_v37 = vmul.f32 %v204_v35, %v133_v21 }
 0x21a   :  { %v157_v39 = vmul.f32 %v176_v36, %v149_v37 }
 0x21b   :  { %v206_v40 = vpop.eup %205 }
 0x21c   :  { %v165_v41 = vadd.f32 %v177_v38, %v157_v39  ;;  %v150_v42 = vmul.f32 %v206_v40, %v134_v25 }
 0x21e   :  { %167 = vst.msk [vmem:[%s295_s6] sm:$0xff] %vm36_vm0, %v165_v41  ;;  %v158_v43 = vmul.f32 %v176_v36, %v150_v42 }
 0x220   :  { %v166_v44 = vadd.f32 %v177_v38, %v158_v43 }
 0x222   :  { %168 = vst.msk [vmem:[%s295_s6 + $0x8] sm:$0xff] %vm36_vm0, %v166_v44 }

// kernel: micro_llm_forward.40
= control target key start
LH: loop header
LB: loop body
LE: loop exit
PB: predicated region body
PF: predicated region fallthrough
CT: control target
= control target key end

     0   :  { %vm18_vm0 = vcmask 261120   ;;  %v164_v3 = vmov 0.0   ;;  %s220_s1 = inlined_call_operand.vmem [shape: f32[32,32], index: 1, kind: input, shape index: {}]   ;;  %s221_s0 = inlined_call_operand.vmem [shape: f32[16,32], index: 0, kind: input, shape index: {}]   ;;  %s222_s2 = inlined_call_operand.vmem [shape: f32[1,32], index: 2, kind: input, shape index: {}]   ;;  %s223_s3 = inlined_call_operand.vmem [shape: f32[16,32], index: 3, kind: output, shape index: {}]  }
   0x1   :  { %v25_v0 = vld [vmem:[%s220_s1] sm:$0xff]  ;;  %v26_v1 = vld [vmem:[%s220_s1 + $0x8] sm:$0xff]  ;;  %v27_v2 = vld [vmem:[%s220_s1 + $0x10] sm:$0xff]  ;;  %20 = vst.msk [vmem:[#allocation2 + $0x8] sm:$0xff] %vm18_vm0, %v164_v3 }
   0x2   :  { %19 = vst.msk [vmem:[#allocation2] sm:$0xff] %vm18_vm0, %v164_v3  ;;  %v155_v4 = vpack.c.bf16 %v26_v1, %v25_v0  ;;  %v28_v5 = vld [vmem:[%s220_s1 + $0x18] sm:$0xff]  ;;  %v23_v6 = vld [vmem:[%s221_s0] sm:$0xff]  ;;  %v24_v8 = vld [vmem:[%s221_s0 + $0x8] sm:$0xff] }
   0x3   :  { %v159_v7 = vpack.c.bf16 %v28_v5, %v27_v2  ;;  %152 = vmatprep.mubr.msk.f32.mxu0 %vm18_vm0, %v23_v6  ;;  %v137_v15 = vld [vmem:[%s222_s2] ss:$0 sm:$0xff] }
   0x4   :  { %156 = vmatprep.subr.bf16.mxu0 %v155_v4 }
   0x5   :  { %158 = vmatpush3.bf16.msra.mxu0 %v155_v4 }
   0x6   :  { %160 = vmatprep.subr.bf16.mxu0 %v159_v7 }
   0x8   :  { %v22_v9 = vld [vmem:[#allocation2 + $0x8] sm:$0xff] }
   0x9   :  { %162 = vmatpush3.bf16.msra.mxu0 %v159_v7  ;;  %v21_v10 = vld [vmem:[#allocation2] sm:$0xff] }
   0xc   :  { %153 = vmatmul.mubr.msk.f32.vlgmr.msra.gmra.mrb[0].mxu0 %vm18_vm0, %v24_v8 }
  0xdf   :  { %v154_v11 = vpop.f32.mrb[0].mxu0 }
  0xe0   :  { %v112_v12 = vadd.f32 %v154_v11, %v22_v9  ;;  %v102_v13 = vpop.f32.mrb[1].mxu0 }
  0xe1   :  { %v111_v14 = vadd.f32 %v102_v13, %v21_v10 }
  0xe2   :  { %114 = vst.msk [vmem:[#allocation2 + $0x8] sm:$0xff] %vm18_vm0, %v112_v12 }
  0xe3   :  { %113 = vst.msk [vmem:[#allocation2] sm:$0xff] %vm18_vm0, %v111_v14 }
  0xe9   :  { %v119_v16 = vld [vmem:[#allocation2 + $0x8] sm:$0xff] }
  0xea   :  { %v128_v17 = vadd.f32 %v137_v15, %v119_v16  ;;  %v118_v18 = vld [vmem:[#allocation2] sm:$0xff] }
  0xeb   :  { %v127_v19 = vadd.f32 %v137_v15, %v118_v18 }
  0xec   :  { %130 = vst.msk [vmem:[%s223_s3 + $0x8] sm:$0xff] %vm18_vm0, %v128_v17 }
  0xed   :  { %129 = vst.msk [vmem:[%s223_s3] sm:$0xff] %vm18_vm0, %v127_v19 }

// kernel: micro_llm_forward.38
= control target key start
LH: loop header
LB: loop body
LE: loop exit
PB: predicated region body
PF: predicated region fallthrough
CT: control target
= control target key end

     0   :  { %vm35_vm0 = vcmask 64512   ;;  %v1840_v0 = vmov 0.0   ;;  %vm1841_vm1 = vmmov 0   ;;  %vm18_vm2 = vcmask 7168   ;;  %s2284_s1 = inlined_call_operand.vmem [shape: f32[8,8,8], index: 1, kind: input, shape index: {}]   ;;  %s2285_s0 = inlined_call_operand.vmem [shape: f32[8,8,8], index: 0, kind: input, shape index: {}]   ;;  %s2286_s2 = inlined_call_operand.vmem [shape: f32[8,8,8], index: 2, kind: input, shape index: {}]   ;;  %s2287_s3 = inlined_call_operand.vmem [shape: f32[8,8,8], index: 3, kind: output, shape index: {}]  }
   0x1   :  { %1706 = vmatprep.subr.mxu0 %v1840_v0  ;;  %v52_v1 = vld [vmem:[%s2284_s1] sm:$0xff]  ;;  %36 = vst.msk [vmem:[#allocation4] sm:$0xff] %vm35_vm0, %v1840_v0  ;;  %37 = vst.msk [vmem:[#allocation4 + $0x8] sm:$0xff] %vm35_vm0, %v1840_v0  ;;  %1708 = vmatprep.mubr.msk.f32.mxu0 %vm1841_vm1, %v1840_v0  ;;  %v53_v2 = vld [vmem:[%s2284_s1 + $0x8] sm:$0xff]  ;;  %v1842_v17 = vmov -1e+30   ;;  %v686_v18 = vlaneseq }
   0x2   :  { %38 = vst.msk [vmem:[#allocation4 + $0x10] sm:$0xff] %vm35_vm0, %v1840_v0  ;;  %39 = vst.msk [vmem:[#allocation4 + $0x18] sm:$0xff] %vm35_vm0, %v1840_v0  ;;  %1707 = vmatpush3.xpose.msk.msra.mxu0 %vm35_vm0, %v52_v1  ;;  %1711 = vmatprep.subr.mxu1 %v1840_v0  ;;  %v44_v3 = vld [vmem:[%s2285_s0] sm:$0xff]  ;;  %v45_v4 = vld [vmem:[%s2285_s0 + $0x8] sm:$0xff]  ;;  %v1843_v62 = vmov 0  }
   0x3   :  { %40 = vst.msk [vmem:[#allocation4 + $0x20] sm:$0xff] %vm35_vm0, %v1840_v0  ;;  %41 = vst.msk [vmem:[#allocation4 + $0x28] sm:$0xff] %vm35_vm0, %v1840_v0  ;;  %1712 = vmatpush3.xpose.msk.msra.mxu1 %vm35_vm0, %v53_v2  ;;  %1713 = vmatprep.mubr.msk.f32.mxu1 %vm1841_vm1, %v1840_v0  ;;  %v54_v5 = vld [vmem:[%s2284_s1 + $0x10] sm:$0xff]  ;;  %v55_v6 = vld [vmem:[%s2284_s1 + $0x18] sm:$0xff]  ;;  %v687_v19 = vshrl.u32 %v686_v18, 7  ;;  %v692_v20 = vand.u32 127, %v686_v18 }
   0x4   :  { %42 = vst.msk [vmem:[#allocation4 + $0x30] sm:$0xff] %vm35_vm0, %v1840_v0  ;;  %43 = vst.msk [vmem:[#allocation4 + $0x38] sm:$0xff] %vm35_vm0, %v1840_v0  ;;  %1716 = vmatprep.subr.mxu0 %v1840_v0  ;;  %1721 = vmatprep.subr.mxu1 %v1840_v0  ;;  %v46_v7 = vld [vmem:[%s2285_s0 + $0x10] sm:$0xff]  ;;  %v47_v8 = vld [vmem:[%s2285_s0 + $0x18] sm:$0xff] }
   0x5   :  { %1709 = vmatmul.mubr.msk.f32.vlgmr.msra.gmra.mrb[0].mxu0 %vm35_vm0, %v44_v3  ;;  %v56_v9 = vld [vmem:[%s2284_s1 + $0x20] sm:$0xff]  ;;  %v57_v10 = vld [vmem:[%s2284_s1 + $0x28] sm:$0xff]  ;;  %v58_v13 = vld [vmem:[%s2284_s1 + $0x30] sm:$0xff]  ;;  %19 = vst.msk [vmem:[#allocation2] sm:$0xff] %vm18_vm2, %v1842_v17  ;;  %vm1998_vm3 = vcmp.le.s32.totalorder %v692_v20, %v687_v19  ;;  %1790 = vset.pattern.permute.xlu0 %v1843_v62 }
   0x6   :  { %1714 = vmatmul.mubr.msk.f32.vlgmr.msra.gmra.mrb[0].mxu1 %vm35_vm0, %v45_v4  ;;  %1717 = vmatpush3.xpose.msk.msra.mxu0 %vm35_vm0, %v54_v5  ;;  %v48_v11 = vld [vmem:[%s2285_s0 + $0x20] sm:$0xff]  ;;  %v49_v12 = vld [vmem:[%s2285_s0 + $0x28] sm:$0xff]  ;;  %v59_v14 = vld [vmem:[%s2284_s1 + $0x38] sm:$0xff]  ;;  %20 = vst.msk [vmem:[#allocation2 + $0x8] sm:$0xff] %vm18_vm2, %v1842_v17 }
   0x7   :  { %1718 = vmatprep.mubr.msk.f32.mxu0 %vm1841_vm1, %v1840_v0  ;;  %1722 = vmatpush3.xpose.msk.msra.mxu1 %vm35_vm0, %v55_v6  ;;  %v50_v15 = vld [vmem:[%s2285_s0 + $0x30] sm:$0xff]  ;;  %v51_v16 = vld [vmem:[%s2285_s0 + $0x38] sm:$0xff]  ;;  %21 = vst.msk [vmem:[#allocation2 + $0x10] sm:$0xff] %vm18_vm2, %v1842_v17  ;;  %22 = vst.msk [vmem:[#allocation2 + $0x18] sm:$0xff] %vm18_vm2, %v1842_v17 }
   0x8   :  { %1723 = vmatprep.mubr.msk.f32.mxu1 %vm1841_vm1, %v1840_v0  ;;  %1726 = vmatprep.subr.mxu0 %v1840_v0  ;;  %23 = vst.msk [vmem:[#allocation2 + $0x20] sm:$0xff] %vm18_vm2, %v1842_v17  ;;  %24 = vst.msk [vmem:[#allocation2 + $0x28] sm:$0xff] %vm18_vm2, %v1842_v17 }
   0x9   :  { %1719 = vmatmul.mubr.msk.f32.vlgmr.msra.gmra.mrb[2].mxu0 %vm35_vm0, %v46_v7  ;;  %1731 = vmatprep.subr.mxu1 %v1840_v0  ;;  %25 = vst.msk [vmem:[#allocation2 + $0x30] sm:$0xff] %vm18_vm2, %v1842_v17  ;;  %26 = vst.msk [vmem:[#allocation2 + $0x38] sm:$0xff] %vm18_vm2, %v1842_v17 }
   0xa   :  { %1724 = vmatmul.mubr.msk.f32.vlgmr.msra.gmra.mrb[2].mxu1 %vm35_vm0, %v47_v8  ;;  %1727 = vmatpush3.xpose.msk.msra.mxu0 %vm35_vm0, %v56_v9  ;;  %27 = vst.msk [vmem:[#allocation3] sm:$0xff] %vm18_vm2, %v1840_v0  ;;  %28 = vst.msk [vmem:[#allocation3 + $0x8] sm:$0xff] %vm18_vm2, %v1840_v0 }
   0xb   :  { %1728 = vmatprep.mubr.msk.f32.mxu0 %vm1841_vm1, %v1840_v0  ;;  %1732 = vmatpush3.xpose.msk.msra.mxu1 %vm35_vm0, %v57_v10  ;;  %29 = vst.msk [vmem:[#allocation3 + $0x10] sm:$0xff] %vm18_vm2, %v1840_v0  ;;  %30 = vst.msk [vmem:[#allocation3 + $0x18] sm:$0xff] %vm18_vm2, %v1840_v0 }
   0xc   :  { %1733 = vmatprep.mubr.msk.f32.mxu1 %vm1841_vm1, %v1840_v0  ;;  %1736 = vmatprep.subr.mxu0 %v1840_v0  ;;  %31 = vst.msk [vmem:[#allocation3 + $0x20] sm:$0xff] %vm18_vm2, %v1840_v0  ;;  %32 = vst.msk [vmem:[#allocation3 + $0x28] sm:$0xff] %vm18_vm2, %v1840_v0  ;;  %v2050_v63 = vld [vmem:[#allocation2] sm:$0xff] }
   0xd   :  { %1729 = vmatmul.mubr.msk.f32.vlgmr.msra.gmra.mrb[4].mxu0 %vm35_vm0, %v48_v11  ;;  %1741 = vmatprep.subr.mxu1 %v1840_v0  ;;  %33 = vst.msk [vmem:[#allocation3 + $0x30] sm:$0xff] %vm18_vm2, %v1840_v0  ;;  %34 = vst.msk [vmem:[#allocation3 + $0x38] sm:$0xff] %vm18_vm2, %v1840_v0  ;;  %v2055_v3 = vld [vmem:[#allocation2 + $0x8] sm:$0xff] }
   0xe   :  { %1734 = vmatmul.mubr.msk.f32.vlgmr.msra.gmra.mrb[4].mxu1 %vm35_vm0, %v49_v12  ;;  %1737 = vmatpush3.xpose.msk.msra.mxu0 %vm35_vm0, %v58_v13  ;;  %v2057_v4 = vld [vmem:[#allocation2 + $0x10] sm:$0xff]  ;;  %v2070_v10 = vld [vmem:[#allocation2 + $0x18] sm:$0xff] }
   0xf   :  { %1738 = vmatprep.mubr.msk.f32.mxu0 %vm1841_vm1, %v1840_v0  ;;  %1742 = vmatpush3.xpose.msk.msra.mxu1 %vm35_vm0, %v59_v14  ;;  %v2072_v11 = vld [vmem:[#allocation2 + $0x20] sm:$0xff]  ;;  %v2089_v18 = vld [vmem:[#allocation2 + $0x28] sm:$0xff] }
  0x10   :  { %1743 = vmatprep.mubr.msk.f32.mxu1 %vm1841_vm1, %v1840_v0  ;;  %1746 = vmatprep.subr.mxu0 %v1840_v0  ;;  %v2091_v19 = vld [vmem:[#allocation2 + $0x30] sm:$0xff] }
  0x11   :  { %1739 = vmatmul.mubr.msk.f32.vlgmr.msra.gmra.mrb[6].mxu0 %vm35_vm0, %v50_v15  ;;  %1751 = vmatprep.subr.mxu1 %v1840_v0 }
  0x12   :  { %1744 = vmatmul.mubr.msk.f32.vlgmr.msra.gmra.mrb[6].mxu1 %vm35_vm0, %v51_v16  ;;  %1748 = vmatprep.mubr.msk.f32.mxu0 %vm1841_vm1, %v1840_v0 }
  0x13   :  { %1753 = vmatprep.mubr.msk.f32.mxu1 %vm1841_vm1, %v1840_v0  ;;  %1791 = vset.pattern.permute.xlu1 %v1843_v62 }
  0xd8   :  { %v141_v21 = vpop.f32.mrb[0].mxu0 }
  0xd9   :  { %v677_v23 = vmul.f32 0.35355338, %v141_v21  ;;  %v1710_v24 = vpop.f32.mrb[1].mxu0  ;;  %v217_v25 = vpop.f32.mrb[0].mxu1 }
  0xda   :  { %v678_v26 = vmul.f32 0.35355338, %v217_v25  ;;  %v1715_v27 = vpop.f32.mrb[1].mxu1 }
  0xdb   :  { %v2004_v28 = vsel %vm1998_vm3, %v677_v23, -1e+30  ;;  %v2108_v27 = vld [vmem:[#allocation2 + $0x38] sm:$0xff] }
  0xdc   :  { %v714_v29 = vsel %vm35_vm0, %v2004_v28, -inf  ;;  %v293_v30 = vpop.f32.mrb[2].mxu0  ;;  %v2010_v31 = vsel %vm1998_vm3, %v678_v26, -1e+30 }
  0xdd   :  { %715 = vmax.xlane.f32.xlu0 %v714_v29  ;;  %v679_v32 = vmul.f32 0.35355338, %v293_v30  ;;  %v1720_v33 = vpop.f32.mrb[3].mxu0  ;;  %v369_v34 = vpop.f32.mrb[2].mxu1  ;;  %v717_v35 = vsel %vm35_vm0, %v2010_v31, -inf }
  0xde   :  { %v680_v36 = vmul.f32 0.35355338, %v369_v34  ;;  %v1725_v37 = vpop.f32.mrb[3].mxu1  ;;  %v60_v34 = vld [vmem:[%s2286_s2] sm:$0xff] }
  0xdf   :  { %v2016_v38 = vsel %vm1998_vm3, %v679_v32, -1e+30  ;;  %1747 = vmatpush3.msra.mxu0 %v60_v34  ;;  %v65_v34 = vld [vmem:[%s2286_s2 + $0x28] sm:$0xff] }
  0xe0   :  { %v720_v39 = vsel %vm35_vm0, %v2016_v38, -inf  ;;  %v445_v40 = vpop.f32.mrb[4].mxu0  ;;  %v2022_v41 = vsel %vm1998_vm3, %v680_v36, -1e+30  ;;  %1756 = vmatprep.subr.mxu0 %v1840_v0  ;;  %v61_v36 = vld [vmem:[%s2286_s2 + $0x8] sm:$0xff] }
  0xe1   :  { %718 = vmax.xlane.f32.xlu0 %v717_v35  ;;  %721 = vmax.xlane.f32.xlu1 %v720_v39  ;;  %v681_v42 = vmul.f32 0.35355338, %v445_v40  ;;  %v1730_v43 = vpop.f32.mrb[5].mxu0  ;;  %v521_v44 = vpop.f32.mrb[4].mxu1  ;;  %v723_v45 = vsel %vm35_vm0, %v2022_v41, -inf }
  0xe2   :  { %v682_v46 = vmul.f32 0.35355338, %v521_v44  ;;  %v1735_v47 = vpop.f32.mrb[5].mxu1  ;;  %1752 = vmatpush3.msra.mxu1 %v61_v36 }
  0xe3   :  { %v2028_v48 = vsel %vm1998_vm3, %v681_v42, -1e+30  ;;  %1761 = vmatprep.subr.mxu1 %v1840_v0 }
  0xe4   :  { %v726_v49 = vsel %vm35_vm0, %v2028_v48, -inf  ;;  %v597_v50 = vpop.f32.mrb[6].mxu0  ;;  %v2034_v51 = vsel %vm1998_vm3, %v682_v46, -1e+30 }
  0xe5   :  { %724 = vmax.xlane.f32.xlu1 %v723_v45  ;;  %727 = vmax.xlane.f32.xlu0 %v726_v49  ;;  %v683_v52 = vmul.f32 0.35355338, %v597_v50  ;;  %v1740_v53 = vpop.f32.mrb[7].mxu0  ;;  %v673_v54 = vpop.f32.mrb[6].mxu1  ;;  %v729_v55 = vsel %vm35_vm0, %v2034_v51, -inf }
  0xe6   :  { %v684_v56 = vmul.f32 0.35355338, %v673_v54  ;;  %v1745_v57 = vpop.f32.mrb[7].mxu1 }
  0xe7   :  { %v2040_v58 = vsel %vm1998_vm3, %v683_v52, -1e+30  ;;  %v63_v57 = vld [vmem:[%s2286_s2 + $0x18] sm:$0xff] }
  0xe8   :  { %v732_v59 = vsel %vm35_vm0, %v2040_v58, -inf  ;;  %v2046_v60 = vsel %vm1998_vm3, %v684_v56, -1e+30 }
  0xe9   :  { %730 = vmax.xlane.f32.xlu1 %v729_v55  ;;  %733 = vmax.xlane.f32.xlu0 %v732_v59  ;;  %v735_v61 = vsel %vm35_vm0, %v2046_v60, -inf }
  0xed   :  { %736 = vmax.xlane.f32.xlu1 %v735_v61 }
 0x16a   :  { %v716_v1 = vpop.xlane.xlu0 %715 }
 0x16b   :  { %v2053_v2 = vmax.f32 %v2050_v63, %v716_v1 }
 0x16d   :  { %v746_v5 = vsub.f32 %v2050_v63, %v2053_v2  ;;  %1555 = vst.msk [vmem:[#allocation2] sm:$0xff] %vm18_vm2, %v2053_v2  ;;  %772 = vperm.xlu0 %1790, %v2053_v2  }
 0x16e   :  { %v719_v6 = vpop.xlane.xlu0 %718  ;;  %v722_v7 = vpop.xlane.xlu1 %721 }
 0x16f   :  { %v2065_v8 = vmax.f32 %v2055_v3, %v719_v6  ;;  %v2068_v9 = vmax.f32 %v2057_v4, %v722_v7  ;;  %v64_v7 = vld [vmem:[%s2286_s2 + $0x20] sm:$0xff] }
 0x171   :  { %v747_v12 = vsub.f32 %v2055_v3, %v2065_v8  ;;  %1556 = vst.msk [vmem:[#allocation2 + $0x8] sm:$0xff] %vm18_vm2, %v2065_v8  ;;  %777 = vperm.xlu1 %1791, %v2065_v8   ;;  %v748_v13 = vsub.f32 %v2057_v4, %v2068_v9  ;;  %1557 = vst.msk [vmem:[#allocation2 + $0x10] sm:$0xff] %vm18_vm2, %v2068_v9 }
 0x172   :  { %v725_v14 = vpop.xlane.xlu1 %724  ;;  %v728_v15 = vpop.xlane.xlu0 %727 }
 0x173   :  { %v2084_v16 = vmax.f32 %v2070_v10, %v725_v14  ;;  %v2087_v17 = vmax.f32 %v2072_v11, %v728_v15 }
 0x175   :  { %782 = vperm.xlu1 %1791, %v2068_v9   ;;  %v749_v20 = vsub.f32 %v2070_v10, %v2084_v16  ;;  %1558 = vst.msk [vmem:[#allocation2 + $0x18] sm:$0xff] %vm18_vm2, %v2084_v16  ;;  %v750_v21 = vsub.f32 %v2072_v11, %v2087_v17  ;;  %1559 = vst.msk [vmem:[#allocation2 + $0x20] sm:$0xff] %vm18_vm2, %v2087_v17 }
 0x176   :  { %v731_v23 = vpop.xlane.xlu1 %730  ;;  %v734_v24 = vpop.xlane.xlu0 %733 }
 0x177   :  { %v2103_v25 = vmax.f32 %v2089_v18, %v731_v23  ;;  %v2106_v26 = vmax.f32 %v2091_v19, %v734_v24  ;;  %v760_v22 = vmul.f32 1.442695, %v749_v20  ;;  %v762_v3 = vmul.f32 1.442695, %v750_v21  ;;  %v843_v20 = vld [vmem:[#allocation3 + $0x8] sm:$0xff] }
 0x179   :  { %787 = vperm.xlu1 %1791, %v2084_v16   ;;  %v751_v29 = vsub.f32 %v2089_v18, %v2103_v25  ;;  %1560 = vst.msk [vmem:[#allocation2 + $0x28] sm:$0xff] %vm18_vm2, %v2103_v25  ;;  %v752_v30 = vsub.f32 %v2091_v19, %v2106_v26  ;;  %1561 = vst.msk [vmem:[#allocation2 + $0x30] sm:$0xff] %vm18_vm2, %v2106_v26 }
 0x17a   :  { %v737_v32 = vpop.xlane.xlu1 %736 }
 0x17b   :  { %v2120_v33 = vmax.f32 %v2108_v27, %v737_v32  ;;  %v764_v63 = vmul.f32 1.442695, %v751_v29  ;;  %v766_v2 = vmul.f32 1.442695, %v752_v30 }
 0x17d   :  { %792 = vperm.xlu1 %1791, %v2087_v17   ;;  %v753_v35 = vsub.f32 %v2108_v27, %v2120_v33  ;;  %1562 = vst.msk [vmem:[#allocation2 + $0x38] sm:$0xff] %vm18_vm2, %v2120_v33  ;;  %v842_v17 = vld [vmem:[#allocation3] sm:$0xff]  ;;  %v844_v27 = vld [vmem:[#allocation3 + $0x10] sm:$0xff] }
 0x17f   :  { %v768_v4 = vmul.f32 1.442695, %v753_v35  ;;  %v845_v35 = vld [vmem:[#allocation3 + $0x18] sm:$0xff] }
 0x181   :  { %797 = vperm.xlu1 %1791, %v2103_v25  }
 0x185   :  { %802 = vperm.xlu1 %1791, %v2106_v26  }
 0x189   :  { %807 = vperm.xlu1 %1791, %v2120_v33  }
 0x1ec   :  { %v773_v37 = vpop.permute.xlu0 %772 }
 0x1ed   :  { %v810_v39 = vsub.f32 %v2004_v28, %v773_v37  ;;  %v62_v28 = vld [vmem:[%s2286_s2 + $0x10] sm:$0xff] }
 0x1ef   :  { %v818_v40 = vmul.f32 1.442695, %v810_v39 }
 0x1f0   :  { %v778_v42 = vpop.permute.xlu1 %777 }
 0x1f1   :  { %1792 = vpow2.f32 %v818_v40  ;;  %v811_v43 = vsub.f32 %v2010_v31, %v778_v42 }
 0x1f3   :  { %v820_v44 = vmul.f32 1.442695, %v811_v43  ;;  %v66_v43 = vld [vmem:[%s2286_s2 + $0x30] sm:$0xff] }
 0x1f4   :  { %v783_v45 = vpop.permute.xlu1 %782 }
 0x1f5   :  { %1794 = vpow2.f32 %v820_v44  ;;  %v812_v46 = vsub.f32 %v2016_v38, %v783_v45 }
 0x1f7   :  { %v822_v47 = vmul.f32 1.442695, %v812_v46  ;;  %v67_v46 = vld [vmem:[%s2286_s2 + $0x38] sm:$0xff] }
 0x1f8   :  { %v788_v49 = vpop.permute.xlu1 %787 }
 0x1f9   :  { %1796 = vpow2.f32 %v822_v47  ;;  %v813_v50 = vsub.f32 %v2022_v41, %v788_v49 }
 0x1fb   :  { %v1793_v52 = vpop.eup %1792  ;;  %v824_v53 = vmul.f32 1.442695, %v813_v50 }
 0x1fc   :  { %v793_v54 = vpop.permute.xlu1 %792  ;;  %v834_v31 = vsel %vm1998_vm3, %v1793_v52, 0.0 }
 0x1fd   :  { %1798 = vpow2.f32 %v824_v53  ;;  %v814_v55 = vsub.f32 %v2028_v48, %v793_v54  ;;  %1749 = vmatmul.mubr.msk.f32.vlgmr.msra.gmra.mrb[8].mxu0 %vm35_vm0, %v834_v31  ;;  %v858_v38 = vsel %vm35_vm0, %v834_v31, 0.0 }
 0x1fe   :  { %859 = vadd.xlane.f32.xlu1 %v858_v38  ;;  %1757 = vmatpush3.msra.mxu0 %v62_v28  ;;  %v758_v38 = vmul.f32 1.442695, %v748_v13 }
 0x1ff   :  { %v1795_v41 = vpop.eup %1794  ;;  %v826_v56 = vmul.f32 1.442695, %v814_v55  ;;  %1758 = vmatprep.mubr.msk.f32.mxu0 %vm1841_vm1, %v1840_v0  ;;  %1766 = vmatprep.subr.mxu0 %v1840_v0  ;;  %v754_v55 = vmul.f32 1.442695, %v746_v5 }
 0x200   :  { %v798_v59 = vpop.permute.xlu1 %797  ;;  %v835_v48 = vsel %vm1998_vm3, %v1795_v41, 0.0 }
 0x201   :  { %1800 = vpow2.f32 %v826_v56  ;;  %v815_v61 = vsub.f32 %v2034_v51, %v798_v59  ;;  %1754 = vmatmul.mubr.msk.f32.vlgmr.msra.gmra.mrb[8].mxu1 %vm35_vm0, %v835_v48  ;;  %v861_v62 = vsel %vm35_vm0, %v835_v48, 0.0  ;;  %v846_v48 = vld [vmem:[#allocation3 + $0x20] sm:$0xff] }
 0x202   :  { %862 = vadd.xlane.f32.xlu0 %v861_v62  ;;  %1762 = vmatpush3.msra.mxu1 %v63_v57 }
 0x203   :  { %v1797_v1 = vpop.eup %1796  ;;  %v828_v6 = vmul.f32 1.442695, %v815_v61  ;;  %1763 = vmatprep.mubr.msk.f32.mxu1 %vm1841_vm1, %v1840_v0  ;;  %1771 = vmatprep.subr.mxu1 %v1840_v0 }
 0x204   :  { %v803_v14 = vpop.permute.xlu1 %802  ;;  %v836_v51 = vsel %vm1998_vm3, %v1797_v1, 0.0 }
 0x205   :  { %1802 = vpow2.f32 %v828_v6  ;;  %v816_v15 = vsub.f32 %v2040_v58, %v803_v14  ;;  %1759 = vmatmul.mubr.msk.f32.vlgmr.msra.gmra.mrb[10].mxu0 %vm35_vm0, %v836_v51  ;;  %v864_v23 = vsel %vm35_vm0, %v836_v51, 0.0 }
 0x206   :  { %865 = vadd.xlane.f32.xlu0 %v864_v23  ;;  %1767 = vmatpush3.msra.mxu0 %v64_v7  ;;  %v847_v7 = vld [vmem:[#allocation3 + $0x28] sm:$0xff] }
 0x207   :  { %v1799_v24 = vpop.eup %1798  ;;  %v830_v32 = vmul.f32 1.442695, %v816_v15  ;;  %1768 = vmatprep.mubr.msk.f32.mxu0 %vm1841_vm1, %v1840_v0  ;;  %1776 = vmatprep.subr.mxu0 %v1840_v0 }
 0x208   :  { %v808_v36 = vpop.permute.xlu1 %807  ;;  %v837_v58 = vsel %vm1998_vm3, %v1799_v24, 0.0  ;;  %v848_v24 = vld [vmem:[#allocation3 + $0x30] sm:$0xff] }
 0x209   :  { %1804 = vpow2.f32 %v830_v32  ;;  %v817_v37 = vsub.f32 %v2046_v60, %v808_v36  ;;  %1764 = vmatmul.mubr.msk.f32.vlgmr.msra.gmra.mrb[10].mxu1 %vm35_vm0, %v837_v58  ;;  %v867_v39 = vsel %vm35_vm0, %v837_v58, 0.0 }
 0x20a   :  { %868 = vadd.xlane.f32.xlu1 %v867_v39  ;;  %1772 = vmatpush3.msra.mxu1 %v65_v34  ;;  %v849_v39 = vld [vmem:[#allocation3 + $0x38] sm:$0xff] }
 0x20b   :  { %v1801_v40 = vpop.eup %1800  ;;  %v832_v42 = vmul.f32 1.442695, %v817_v37  ;;  %1773 = vmatprep.mubr.msk.f32.mxu1 %vm1841_vm1, %v1840_v0  ;;  %1781 = vmatprep.subr.mxu1 %v1840_v0 }
 0x20c   :  { %v838_v60 = vsel %vm1998_vm3, %v1801_v40, 0.0 }
 0x20d   :  { %1806 = vpow2.f32 %v832_v42  ;;  %1769 = vmatmul.mubr.msk.f32.vlgmr.msra.gmra.mrb[12].mxu0 %vm35_vm0, %v838_v60  ;;  %v870_v44 = vsel %vm35_vm0, %v838_v60, 0.0 }
 0x20e   :  { %871 = vadd.xlane.f32.xlu0 %v870_v44  ;;  %1777 = vmatpush3.msra.mxu0 %v66_v43 }
 0x20f   :  { %v1803_v45 = vpop.eup %1802  ;;  %1778 = vmatprep.mubr.msk.f32.mxu0 %vm1841_vm1, %v1840_v0 }
 0x210   :  { %v839_v47 = vsel %vm1998_vm3, %v1803_v45, 0.0 }
 0x211   :  { %1774 = vmatmul.mubr.msk.f32.vlgmr.msra.gmra.mrb[12].mxu1 %vm35_vm0, %v839_v47  ;;  %v873_v49 = vsel %vm35_vm0, %v839_v47, 0.0 }
 0x212   :  { %874 = vadd.xlane.f32.xlu1 %v873_v49  ;;  %1782 = vmatpush3.msra.mxu1 %v67_v46 }
 0x213   :  { %v1805_v50 = vpop.eup %1804  ;;  %1783 = vmatprep.mubr.msk.f32.mxu1 %vm1841_vm1, %v1840_v0  ;;  %v756_v0 = vmul.f32 1.442695, %v747_v12 }
 0x214   :  { %v840_v52 = vsel %vm1998_vm3, %v1805_v50, 0.0 }
 0x215   :  { %1779 = vmatmul.mubr.msk.f32.vlgmr.msra.gmra.mrb[14].mxu0 %vm35_vm0, %v840_v52  ;;  %v876_v53 = vsel %vm35_vm0, %v840_v52, 0.0  ;;  %1808 = vpow2.f32 %v756_v0  ;;  %v899_v0 = vld [vmem:[#allocation4] sm:$0xff] }
 0x216   :  { %877 = vadd.xlane.f32.xlu0 %v876_v53  ;;  %1810 = vpow2.f32 %v754_v55 }
 0x217   :  { %v1807_v28 = vpop.eup %1806  ;;  %1812 = vpow2.f32 %v758_v38 }
 0x218   :  { %v841_v54 = vsel %vm1998_vm3, %v1807_v28, 0.0  ;;  %1814 = vpow2.f32 %v760_v22 }
 0x219   :  { %1784 = vmatmul.mubr.msk.f32.vlgmr.msra.gmra.mrb[14].mxu1 %vm35_vm0, %v841_v54  ;;  %v879_v31 = vsel %vm35_vm0, %v841_v54, 0.0  ;;  %1816 = vpow2.f32 %v762_v3  ;;  %v900_v3 = vld [vmem:[#allocation4 + $0x8] sm:$0xff] }
 0x21a   :  { %880 = vadd.xlane.f32.xlu1 %v879_v31  ;;  %1818 = vpow2.f32 %v764_v63 }
 0x21b   :  { %1820 = vpow2.f32 %v766_v2 }
 0x21c   :  { %1822 = vpow2.f32 %v768_v4 }
 0x21f   :  { %v1809_v5 = vpop.eup %1808 }
 0x220   :  { %v1811_v8 = vpop.eup %1810  ;;  %v851_v25 = vmul.f32 %v1809_v5, %v843_v20 }
 0x221   :  { %v1813_v9 = vpop.eup %1812  ;;  %v850_v18 = vmul.f32 %v1811_v8, %v842_v17 }
 0x222   :  { %v1815_v10 = vpop.eup %1814  ;;  %v852_v30 = vmul.f32 %v1813_v9, %v844_v27 }
 0x223   :  { %v1817_v11 = vpop.eup %1816  ;;  %v853_v57 = vmul.f32 %v1815_v10, %v845_v35  ;;  %v904_v35 = vld [vmem:[#allocation4 + $0x28] sm:$0xff] }
 0x224   :  { %v1819_v12 = vpop.eup %1818  ;;  %v854_v1 = vmul.f32 %v1817_v11, %v846_v48 }
 0x225   :  { %v1821_v13 = vpop.eup %1820  ;;  %v855_v15 = vmul.f32 %v1819_v12, %v847_v7 }
 0x226   :  { %v1823_v16 = vpop.eup %1822  ;;  %v856_v58 = vmul.f32 %v1821_v13, %v848_v24 }
 0x227   :  { %v857_v60 = vmul.f32 %v1823_v16, %v849_v39 }
 0x22b   :  { %914 = vperm.xlu1 %1791, %v1809_v5  }
 0x22c   :  { %909 = vperm.xlu0 %1790, %v1811_v8   ;;  %v901_v8 = vld [vmem:[#allocation4 + $0x10] sm:$0xff] }
 0x22f   :  { %919 = vperm.xlu1 %1791, %v1813_v9  }
 0x230   :  { %924 = vperm.xlu0 %1790, %v1815_v10  }
 0x233   :  { %929 = vperm.xlu1 %1791, %v1817_v11  }
 0x234   :  { %934 = vperm.xlu0 %1790, %v1819_v12  }
 0x237   :  { %939 = vperm.xlu1 %1791, %v1821_v13  }
 0x238   :  { %944 = vperm.xlu0 %1790, %v1823_v16   ;;  %v902_v16 = vld [vmem:[#allocation4 + $0x18] sm:$0xff] }
 0x28b   :  { %v860_v19 = vpop.xlane.xlu1 %859 }
 0x28c   :  { %v882_v21 = vadd.f32 %v860_v19, %v850_v18 }
 0x28e   :  { %891 = vst.msk [vmem:[#allocation3] sm:$0xff] %vm18_vm2, %v882_v21 }
 0x28f   :  { %v863_v26 = vpop.xlane.xlu0 %862 }
 0x290   :  { %v883_v29 = vadd.f32 %v863_v26, %v851_v25  ;;  %v903_v25 = vld [vmem:[#allocation4 + $0x20] sm:$0xff] }
 0x292   :  { %892 = vst.msk [vmem:[#allocation3 + $0x8] sm:$0xff] %vm18_vm2, %v883_v29 }
 0x293   :  { %v866_v33 = vpop.xlane.xlu0 %865 }
 0x294   :  { %v884_v41 = vadd.f32 %v866_v33, %v852_v30 }
 0x295   :  { %v1574_v56 = vld [vmem:[#allocation3] sm:$0xff] }
 0x296   :  { %893 = vst.msk [vmem:[#allocation3 + $0x10] sm:$0xff] %vm18_vm2, %v884_v41  ;;  %1824 = vrcp.f32 %v1574_v56 }
 0x297   :  { %v869_v59 = vpop.xlane.xlu1 %868 }
 0x298   :  { %v885_v61 = vadd.f32 %v869_v59, %v853_v57 }
 0x299   :  { %v1575_v62 = vld [vmem:[#allocation3 + $0x8] sm:$0xff] }
 0x29a   :  { %894 = vst.msk [vmem:[#allocation3 + $0x18] sm:$0xff] %vm18_vm2, %v885_v61  ;;  %1826 = vrcp.f32 %v1575_v62  ;;  %v905_v61 = vld [vmem:[#allocation4 + $0x30] sm:$0xff] }
 0x29b   :  { %v872_v6 = vpop.xlane.xlu0 %871 }
 0x29c   :  { %v886_v14 = vadd.f32 %v872_v6, %v854_v1 }
 0x29d   :  { %v1576_v51 = vld [vmem:[#allocation3 + $0x10] sm:$0xff] }
 0x29e   :  { %895 = vst.msk [vmem:[#allocation3 + $0x20] sm:$0xff] %vm18_vm2, %v886_v14  ;;  %1828 = vrcp.f32 %v1576_v51  ;;  %v906_v51 = vld [vmem:[#allocation4 + $0x38] sm:$0xff] }
 0x29f   :  { %v875_v23 = vpop.xlane.xlu1 %874 }
 0x2a0   :  { %v1825_v32 = vpop.eup %1824  ;;  %v887_v34 = vadd.f32 %v875_v23, %v855_v15 }
 0x2a1   :  { %1592 = vperm.xlu1 %1791, %v1825_v32   ;;  %v1577_v36 = vld [vmem:[#allocation3 + $0x18] sm:$0xff] }
 0x2a2   :  { %896 = vst.msk [vmem:[#allocation3 + $0x28] sm:$0xff] %vm18_vm2, %v887_v34  ;;  %1830 = vrcp.f32 %v1577_v36 }
 0x2a3   :  { %v878_v37 = vpop.xlane.xlu0 %877 }
 0x2a4   :  { %v1827_v40 = vpop.eup %1826  ;;  %v888_v42 = vadd.f32 %v878_v37, %v856_v58 }
 0x2a5   :  { %1597 = vperm.xlu0 %1790, %v1827_v40   ;;  %v1578_v43 = vld [vmem:[#allocation3 + $0x20] sm:$0xff] }
 0x2a6   :  { %897 = vst.msk [vmem:[#allocation3 + $0x30] sm:$0xff] %vm18_vm2, %v888_v42  ;;  %1832 = vrcp.f32 %v1578_v43 }
 0x2a7   :  { %v881_v44 = vpop.xlane.xlu1 %880 }
 0x2a8   :  { %v1829_v45 = vpop.eup %1828  ;;  %v889_v46 = vadd.f32 %v881_v44, %v857_v60 }
 0x2a9   :  { %1602 = vperm.xlu1 %1791, %v1829_v45   ;;  %v1579_v47 = vld [vmem:[#allocation3 + $0x28] sm:$0xff] }
 0x2aa   :  { %898 = vst.msk [vmem:[#allocation3 + $0x38] sm:$0xff] %vm18_vm2, %v889_v46  ;;  %1834 = vrcp.f32 %v1579_v47 }
 0x2ab   :  { %v910_v55 = vpop.permute.xlu0 %909  ;;  %v915_v38 = vpop.permute.xlu1 %914 }
 0x2ac   :  { %v1831_v49 = vpop.eup %1830  ;;  %v947_v22 = vmul.f32 %v910_v55, %v899_v0  ;;  %v948_v5 = vmul.f32 %v915_v38, %v900_v3 }
 0x2ad   :  { %1607 = vperm.xlu0 %1790, %v1831_v49   ;;  %v1580_v50 = vld [vmem:[#allocation3 + $0x30] sm:$0xff] }
 0x2ae   :  { %1836 = vrcp.f32 %v1580_v50 }
 0x2af   :  { %v920_v9 = vpop.permute.xlu1 %919  ;;  %v925_v17 = vpop.permute.xlu0 %924 }
 0x2b0   :  { %v1833_v52 = vpop.eup %1832  ;;  %v949_v13 = vmul.f32 %v920_v9, %v901_v8  ;;  %v950_v21 = vmul.f32 %v925_v17, %v902_v16 }
 0x2b1   :  { %1612 = vperm.xlu1 %1791, %v1833_v52   ;;  %v1581_v53 = vld [vmem:[#allocation3 + $0x38] sm:$0xff] }
 0x2b2   :  { %1838 = vrcp.f32 %v1581_v53 }
 0x2b3   :  { %v930_v26 = vpop.permute.xlu1 %929  ;;  %v935_v41 = vpop.permute.xlu0 %934 }
 0x2b4   :  { %v1835_v28 = vpop.eup %1834  ;;  %v951_v33 = vmul.f32 %v930_v26, %v903_v25  ;;  %v952_v48 = vmul.f32 %v935_v41, %v904_v35 }
 0x2b5   :  { %1617 = vperm.xlu0 %1790, %v1835_v28  }
 0x2b7   :  { %v940_v62 = vpop.permute.xlu1 %939  ;;  %v945_v15 = vpop.permute.xlu0 %944 }
 0x2b8   :  { %v1837_v54 = vpop.eup %1836  ;;  %v953_v14 = vmul.f32 %v940_v62, %v905_v61  ;;  %v954_v34 = vmul.f32 %v945_v15, %v906_v51 }
 0x2b9   :  { %1622 = vperm.xlu1 %1791, %v1837_v54  }
 0x2bc   :  { %v1839_v31 = vpop.eup %1838 }
 0x2bd   :  { %1627 = vperm.xlu0 %1790, %v1839_v31  }
 0x2d0   :  { %v1024_v63 = vpop.f32.mrb[8].mxu0 }
 0x2d1   :  { %v1539_v2 = vadd.f32 %v1024_v63, %v947_v22  ;;  %v1750_v4 = vpop.f32.mrb[9].mxu0 }
 0x2d3   :  { %1547 = vst.msk [vmem:[#allocation4] sm:$0xff] %vm35_vm0, %v1539_v2 }
 0x2d4   :  { %v1097_v10 = vpop.f32.mrb[8].mxu1 }
 0x2d5   :  { %v1540_v11 = vadd.f32 %v1097_v10, %v948_v5  ;;  %v1755_v12 = vpop.f32.mrb[9].mxu1 }
 0x2d7   :  { %1548 = vst.msk [vmem:[#allocation4 + $0x8] sm:$0xff] %vm35_vm0, %v1540_v11 }
 0x2d8   :  { %v1170_v18 = vpop.f32.mrb[10].mxu0 }
 0x2d9   :  { %v1541_v19 = vadd.f32 %v1170_v18, %v949_v13  ;;  %v1760_v20 = vpop.f32.mrb[11].mxu0 }
 0x2da   :  { %v1566_v40 = vld [vmem:[#allocation4] sm:$0xff] }
 0x2db   :  { %1549 = vst.msk [vmem:[#allocation4 + $0x10] sm:$0xff] %vm35_vm0, %v1541_v19 }
 0x2dc   :  { %v1243_v27 = vpop.f32.mrb[10].mxu1 }
 0x2dd   :  { %v1542_v29 = vadd.f32 %v1243_v27, %v950_v21  ;;  %v1765_v30 = vpop.f32.mrb[11].mxu1 }
 0x2de   :  { %v1567_v43 = vld [vmem:[#allocation4 + $0x8] sm:$0xff] }
 0x2df   :  { %1550 = vst.msk [vmem:[#allocation4 + $0x18] sm:$0xff] %vm35_vm0, %v1542_v29 }
 0x2e0   :  { %v1316_v56 = vpop.f32.mrb[12].mxu0 }
 0x2e1   :  { %v1543_v57 = vadd.f32 %v1316_v56, %v951_v33  ;;  %v1770_v59 = vpop.f32.mrb[13].mxu0 }
 0x2e2   :  { %v1568_v46 = vld [vmem:[#allocation4 + $0x10] sm:$0xff] }
 0x2e3   :  { %1551 = vst.msk [vmem:[#allocation4 + $0x20] sm:$0xff] %vm35_vm0, %v1543_v57 }
 0x2e4   :  { %v1389_v1 = vpop.f32.mrb[12].mxu1 }
 0x2e5   :  { %v1544_v6 = vadd.f32 %v1389_v1, %v952_v48  ;;  %v1775_v7 = vpop.f32.mrb[13].mxu1 }
 0x2e6   :  { %v1569_v49 = vld [vmem:[#allocation4 + $0x18] sm:$0xff] }
 0x2e7   :  { %1552 = vst.msk [vmem:[#allocation4 + $0x28] sm:$0xff] %vm35_vm0, %v1544_v6 }
 0x2e8   :  { %v1462_v23 = vpop.f32.mrb[14].mxu0 }
 0x2e9   :  { %v1545_v24 = vadd.f32 %v1462_v23, %v953_v14  ;;  %v1780_v32 = vpop.f32.mrb[15].mxu0 }
 0x2ea   :  { %v1570_v28 = vld [vmem:[#allocation4 + $0x20] sm:$0xff] }
 0x2eb   :  { %1553 = vst.msk [vmem:[#allocation4 + $0x30] sm:$0xff] %vm35_vm0, %v1545_v24 }
 0x2ec   :  { %v1535_v36 = vpop.f32.mrb[14].mxu1 }
 0x2ed   :  { %v1546_v58 = vadd.f32 %v1535_v36, %v954_v34  ;;  %v1785_v37 = vpop.f32.mrb[15].mxu1 }
 0x2ee   :  { %v1571_v31 = vld [vmem:[#allocation4 + $0x28] sm:$0xff] }
 0x2ef   :  { %1554 = vst.msk [vmem:[#allocation4 + $0x38] sm:$0xff] %vm35_vm0, %v1546_v58 }
 0x2f2   :  { %v1572_v22 = vld [vmem:[#allocation4 + $0x30] sm:$0xff] }
 0x2f6   :  { %v1573_v63 = vld [vmem:[#allocation4 + $0x38] sm:$0xff] }
 0x320   :  { %v1593_v39 = vpop.permute.xlu1 %1592 }
 0x321   :  { %v1630_v42 = vmul.f32 %v1593_v39, %v1566_v40 }
 0x323   :  { %1638 = vst.msk [vmem:[%s2287_s3] sm:$0xff] %vm35_vm0, %v1630_v42 }
 0x324   :  { %v1598_v60 = vpop.permute.xlu0 %1597 }
 0x325   :  { %v1631_v44 = vmul.f32 %v1598_v60, %v1567_v43 }
 0x327   :  { %1639 = vst.msk [vmem:[%s2287_s3 + $0x8] sm:$0xff] %vm35_vm0, %v1631_v44 }
 0x328   :  { %v1603_v45 = vpop.permute.xlu1 %1602 }
 0x329   :  { %v1632_v47 = vmul.f32 %v1603_v45, %v1568_v46 }
 0x32b   :  { %1640 = vst.msk [vmem:[%s2287_s3 + $0x10] sm:$0xff] %vm35_vm0, %v1632_v47 }
 0x32c   :  { %v1608_v50 = vpop.permute.xlu0 %1607 }
 0x32d   :  { %v1633_v52 = vmul.f32 %v1608_v50, %v1569_v49 }
 0x32f   :  { %1641 = vst.msk [vmem:[%s2287_s3 + $0x18] sm:$0xff] %vm35_vm0, %v1633_v52 }
 0x330   :  { %v1613_v53 = vpop.permute.xlu1 %1612 }
 0x331   :  { %v1634_v54 = vmul.f32 %v1613_v53, %v1570_v28 }
 0x333   :  { %1642 = vst.msk [vmem:[%s2287_s3 + $0x20] sm:$0xff] %vm35_vm0, %v1634_v54 }
 0x334   :  { %v1618_v0 = vpop.permute.xlu0 %1617 }
 0x335   :  { %v1635_v55 = vmul.f32 %v1618_v0, %v1571_v31 }
 0x337   :  { %1643 = vst.msk [vmem:[%s2287_s3 + $0x28] sm:$0xff] %vm35_vm0, %v1635_v55 }
 0x338   :  { %v1623_v38 = vpop.permute.xlu1 %1622 }
 0x339   :  { %v1636_v3 = vmul.f32 %v1623_v38, %v1572_v22 }
 0x33b   :  { %1644 = vst.msk [vmem:[%s2287_s3 + $0x30] sm:$0xff] %vm35_vm0, %v1636_v3 }
 0x33c   :  { %v1628_v2 = vpop.permute.xlu0 %1627 }
 0x33d   :  { %v1637_v4 = vmul.f32 %v1628_v2, %v1573_v63 }
 0x33f   :  { %1645 = vst.msk [vmem:[%s2287_s3 + $0x38] sm:$0xff] %vm35_vm0, %v1637_v4 }

// kernel: micro_llm_forward.32
= control target key start
LH: loop header
LB: loop body
LE: loop exit
PB: predicated region body
PF: predicated region fallthrough
CT: control target
= control target key end

     0   :  { %vm39_vm0 = vcmask 261120   ;;  %s542_s1 = inlined_call_operand.vmem [shape: f32[32,128], index: 1, kind: input, shape index: {}]   ;;  %s543_s0 = inlined_call_operand.vmem [shape: f32[16,32], index: 0, kind: input, shape index: {}]   ;;  %s544_s3 = inlined_call_operand.vmem [shape: f32[128,32], index: 3, kind: input, shape index: {}]   ;;  %s545_s2 = inlined_call_operand.vmem [shape: f32[1,128], index: 2, kind: input, shape index: {}]   ;;  %s546_s4 = inlined_call_operand.vmem [shape: f32[1,32], index: 4, kind: input, shape index: {}]   ;;  %s547_s5 = inlined_call_operand.vmem [shape: f32[1,32], index: 5, kind: input, shape index: {}]   ;;  %s548_s6 = inlined_call_operand.vmem [shape: f32[1,32], index: 6, kind: input, shape index: {}]   ;;  %s549_s7 = inlined_call_operand.vmem [shape: f32[16,32], index: 7, kind: output, shape index: {}]  }
   0x1   :  { %v28_v0 = vld [vmem:[%s542_s1] sm:$0xff]  ;;  %v29_v1 = vld [vmem:[%s542_s1 + $0x8] sm:$0xff]  ;;  %v30_v2 = vld [vmem:[%s542_s1 + $0x10] sm:$0xff] }
   0x2   :  { %v358_v3 = vpack.c.bf16 %v29_v1, %v28_v0  ;;  %v31_v4 = vld [vmem:[%s542_s1 + $0x18] sm:$0xff]  ;;  %v461_v5 = vld [vmem:[%s543_s0] sm:$0xff]  ;;  %v132_v8 = vld [vmem:[%s544_s3 + $0x8] sm:$0xff] }
   0x3   :  { %v362_v6 = vpack.c.bf16 %v31_v4, %v30_v2  ;;  %320 = vmatprep.mubr.msk.f32.mxu0 %vm39_vm0, %v461_v5  ;;  %v131_v7 = vld [vmem:[%s544_s3] sm:$0xff]  ;;  %v133_v9 = vld [vmem:[%s544_s3 + $0x10] sm:$0xff]  ;;  %v134_v11 = vld [vmem:[%s544_s3 + $0x18] sm:$0xff] }
   0x4   :  { %359 = vmatprep.subr.bf16.mxu0 %v358_v3  ;;  %v366_v10 = vpack.c.bf16 %v132_v8, %v131_v7  ;;  %v370_v12 = vpack.c.bf16 %v134_v11, %v133_v9  ;;  %v135_v13 = vld [vmem:[%s544_s3 + $0x20] sm:$0xff]  ;;  %v136_v14 = vld [vmem:[%s544_s3 + $0x28] sm:$0xff]  ;;  %v137_v17 = vld [vmem:[%s544_s3 + $0x30] sm:$0xff] }
   0x5   :  { %361 = vmatpush3.bf16.msra.mxu0 %v358_v3  ;;  %v374_v15 = vpack.c.bf16 %v136_v14, %v135_v13  ;;  %v27_v16 = vld [vmem:[%s543_s0 + $0x8] sm:$0xff]  ;;  %v138_v18 = vld [vmem:[%s544_s3 + $0x38] sm:$0xff]  ;;  %v139_v20 = vld [vmem:[%s544_s3 + $0x40] sm:$0xff] }
   0x6   :  { %363 = vmatprep.subr.bf16.mxu0 %v362_v6  ;;  %367 = vmatprep.subr.bf16.mxu1 %v366_v10  ;;  %v378_v19 = vpack.c.bf16 %v138_v18, %v137_v17  ;;  %v140_v21 = vld [vmem:[%s544_s3 + $0x48] sm:$0xff]  ;;  %v141_v23 = vld [vmem:[%s544_s3 + $0x50] sm:$0xff]  ;;  %v142_v24 = vld [vmem:[%s544_s3 + $0x58] sm:$0xff] }
   0x7   :  { %369 = vmatpush3.bf16.msra.mxu1 %v366_v10  ;;  %v382_v22 = vpack.c.bf16 %v140_v21, %v139_v20  ;;  %v386_v25 = vpack.c.bf16 %v142_v24, %v141_v23  ;;  %v143_v26 = vld [vmem:[%s544_s3 + $0x60] sm:$0xff]  ;;  %v144_v27 = vld [vmem:[%s544_s3 + $0x68] sm:$0xff]  ;;  %v145_v29 = vld [vmem:[%s544_s3 + $0x70] sm:$0xff] }
   0x8   :  { %371 = vmatprep.subr.bf16.mxu1 %v370_v12  ;;  %v390_v28 = vpack.c.bf16 %v144_v27, %v143_v26  ;;  %v146_v30 = vld [vmem:[%s544_s3 + $0x78] sm:$0xff]  ;;  %v282_v32 = vld [vmem:[%s545_s2] ss:$0 sm:$0xff] }
   0x9   :  { %365 = vmatpush3.bf16.msra.mxu0 %v362_v6  ;;  %v394_v31 = vpack.c.bf16 %v146_v30, %v145_v29  ;;  %v285_v47 = vld [vmem:[%s546_s4] ss:$0 sm:$0xff] }
   0xa   :  { %v286_v9 = vld [vmem:[%s547_s5] ss:$0 sm:$0xff] }
   0xb   :  { %373 = vmatpush3.bf16.msra.mxu1 %v370_v12  ;;  %v287_v11 = vld [vmem:[%s548_s6] ss:$0 sm:$0xff] }
   0xc   :  { %321 = vmatmul.mubr.msk.f32.vlgmr.msra.gmra.mrb[0].mxu0 %vm39_vm0, %v27_v16  ;;  %375 = vmatprep.subr.bf16.mxu1 %v374_v15 }
   0xf   :  { %377 = vmatpush3.bf16.msra.mxu1 %v374_v15 }
  0x10   :  { %379 = vmatprep.subr.bf16.mxu1 %v378_v19 }
  0x13   :  { %381 = vmatpush3.bf16.msra.mxu1 %v378_v19 }
  0x14   :  { %383 = vmatprep.subr.bf16.mxu1 %v382_v22 }
  0x17   :  { %385 = vmatpush3.bf16.msra.mxu1 %v382_v22 }
  0x18   :  { %387 = vmatprep.subr.bf16.mxu1 %v386_v25 }
  0x1b   :  { %389 = vmatpush3.bf16.msra.mxu1 %v386_v25 }
  0x1c   :  { %391 = vmatprep.subr.bf16.mxu1 %v390_v28 }
  0x1f   :  { %393 = vmatpush3.bf16.msra.mxu1 %v390_v28 }
  0x20   :  { %395 = vmatprep.subr.bf16.mxu1 %v394_v31 }
  0x23   :  { %397 = vmatpush3.bf16.msra.mxu1 %v394_v31 }
  0xdf   :  { %v322_v33 = vpop.f32.mrb[0].mxu0 }
  0xe0   :  { %v118_v34 = vadd.f32 %v322_v33, %v282_v32  ;;  %v112_v35 = vpop.f32.mrb[1].mxu0 }
  0xe1   :  { %v113_v36 = vadd.f32 %v282_v32, %v112_v35 }
  0xe2   :  { %v124_v37 = vmul.f32 0.70710677, %v118_v34  ;;  %v122_v44 = vmul.f32 0.5, %v118_v34 }
  0xe3   :  { %v123_v38 = vmul.f32 0.70710677, %v113_v36  ;;  %v121_v42 = vmul.f32 0.5, %v113_v36 }
  0xe4   :  { %398 = verf.f32 %v124_v37 }
  0xe5   :  { %400 = verf.f32 %v123_v38 }
  0xee   :  { %v399_v39 = vpop.eup %398 }
  0xef   :  { %v401_v40 = vpop.eup %400  ;;  %v128_v41 = vadd.f32 1.0, %v399_v39 }
  0xf0   :  { %v127_v43 = vadd.f32 1.0, %v401_v40 }
  0xf1   :  { %v130_v46 = vmul.f32 %v128_v41, %v122_v44 }
  0xf2   :  { %v129_v45 = vmul.f32 %v127_v43, %v121_v42 }
  0xf4   :  { %355 = vmatprep.mubr.f32.mxu1 %v129_v45 }
  0xf5   :  { %356 = vmatmul.mubr.f32.vlgmr.msra.gmra.mrb[0].mxu1 %v130_v46 }
 0x1c8   :  { %v357_v48 = vpop.f32.mrb[0].mxu1 }
 0x1c9   :  { %v220_v49 = vpop.f32.mrb[1].mxu1  ;;  %v226_v50 = vadd.f32 %v357_v48, %v285_v47 }
 0x1ca   :  { %v221_v51 = vadd.f32 %v285_v47, %v220_v49 }
 0x1cb   :  { %v230_v54 = vadd.f32 %v226_v50, %v27_v16 }
 0x1cc   :  { %v229_v52 = vadd.f32 %v221_v51, %v461_v5 }
 0x1cd   :  { %v236_v55 = vsel %vm39_vm0, %v230_v54, 0.0 }
 0x1ce   :  { %v233_v53 = vsel %vm39_vm0, %v229_v52, 0.0 }
 0x1cf   :  { %234 = vadd.xlane.f32.xlu0 %v233_v53 }
 0x1d3   :  { %237 = vadd.xlane.f32.xlu0 %v236_v55 }
 0x25c   :  { %v235_v56 = vpop.xlane.xlu0 %234 }
 0x25d   :  { %v240_v57 = vmul.f32 0.03125, %v235_v56 }
 0x25f   :  { %v242_v58 = vsub.f32 %v229_v52, %v240_v57 }
 0x260   :  { %v238_v59 = vpop.xlane.xlu0 %237 }
 0x261   :  { %v241_v60 = vmul.f32 0.03125, %v238_v59  ;;  %v244_v61 = vmul.f32 %v242_v58, %v242_v58 }
 0x263   :  { %v243_v62 = vsub.f32 %v230_v54, %v241_v60  ;;  %v246_v63 = vsel %vm39_vm0, %v244_v61, 0.0 }
 0x264   :  { %247 = vadd.xlane.f32.xlu1 %v246_v63 }
 0x265   :  { %v245_v0 = vmul.f32 %v243_v62, %v243_v62 }
 0x267   :  { %v249_v1 = vsel %vm39_vm0, %v245_v0, 0.0 }
 0x268   :  { %250 = vadd.xlane.f32.xlu1 %v249_v1 }
 0x2f1   :  { %v248_v2 = vpop.xlane.xlu1 %247 }
 0x2f2   :  { %v252_v3 = vmul.f32 0.03125, %v248_v2 }
 0x2f4   :  { %v254_v4 = vadd.f32 1e-05, %v252_v3 }
 0x2f5   :  { %v251_v5 = vpop.xlane.xlu1 %250 }
 0x2f6   :  { %402 = vrsqrt.f32 %v254_v4  ;;  %v253_v6 = vmul.f32 0.03125, %v251_v5 }
 0x2f8   :  { %v255_v7 = vadd.f32 1e-05, %v253_v6 }
 0x2fa   :  { %404 = vrsqrt.f32 %v255_v7 }
 0x300   :  { %v403_v8 = vpop.eup %402 }
 0x301   :  { %v258_v10 = vmul.f32 %v403_v8, %v242_v58 }
 0x303   :  { %v266_v12 = vmul.f32 %v286_v9, %v258_v10 }
 0x304   :  { %v405_v13 = vpop.eup %404 }
 0x305   :  { %v274_v14 = vadd.f32 %v287_v11, %v266_v12  ;;  %v259_v15 = vmul.f32 %v405_v13, %v243_v62 }
 0x307   :  { %276 = vst.msk [vmem:[%s549_s7] sm:$0xff] %vm39_vm0, %v274_v14  ;;  %v267_v16 = vmul.f32 %v286_v9, %v259_v15 }
 0x309   :  { %v275_v17 = vadd.f32 %v287_v11, %v267_v16 }
 0x30b   :  { %277 = vst.msk [vmem:[%s549_s7 + $0x8] sm:$0xff] %vm39_vm0, %v275_v17 }

// kernel: micro_llm_forward.30
= control target key start
LH: loop header
LB: loop body
LE: loop exit
PB: predicated region body
PF: predicated region fallthrough
CT: control target
= control target key end

     0   :  { %vm35_vm0 = vcmask 64512   ;;  %v1811_v0 = vmov 0.0   ;;  %vm1812_vm1 = vmmov 0   ;;  %vm18_vm2 = vcmask 7168   ;;  %s2219_s1 = inlined_call_operand.vmem [shape: f32[8,8,8], index: 1, kind: input, shape index: {}]   ;;  %s2220_s0 = inlined_call_operand.vmem [shape: f32[8,8,8], index: 0, kind: input, shape index: {}]   ;;  %s2221_s2 = inlined_call_operand.vmem [shape: f32[8,8,8], index: 2, kind: input, shape index: {}]   ;;  %s2222_s3 = inlined_call_operand.vmem [shape: f32[8,8,8], index: 3, kind: output, shape index: {}]  }
   0x1   :  { %1677 = vmatprep.subr.mxu0 %v1811_v0  ;;  %v52_v1 = vld [vmem:[%s2219_s1] sm:$0xff]  ;;  %36 = vst.msk [vmem:[#allocation4] sm:$0xff] %vm35_vm0, %v1811_v0  ;;  %37 = vst.msk [vmem:[#allocation4 + $0x8] sm:$0xff] %vm35_vm0, %v1811_v0  ;;  %1679 = vmatprep.mubr.msk.f32.mxu0 %vm1812_vm1, %v1811_v0  ;;  %v53_v2 = vld [vmem:[%s2219_s1 + $0x8] sm:$0xff]  ;;  %v1813_v17 = vmov -1e+30  }
   0x2   :  { %38 = vst.msk [vmem:[#allocation4 + $0x10] sm:$0xff] %vm35_vm0, %v1811_v0  ;;  %39 = vst.msk [vmem:[#allocation4 + $0x18] sm:$0xff] %vm35_vm0, %v1811_v0  ;;  %1678 = vmatpush3.xpose.msk.msra.mxu0 %vm35_vm0, %v52_v1  ;;  %1682 = vmatprep.subr.mxu1 %v1811_v0  ;;  %v44_v3 = vld [vmem:[%s2220_s0] sm:$0xff]  ;;  %v45_v4 = vld [vmem:[%s2220_s0 + $0x8] sm:$0xff]  ;;  %v1814_v50 = vmov 0  }
   0x3   :  { %40 = vst.msk [vmem:[#allocation4 + $0x20] sm:$0xff] %vm35_vm0, %v1811_v0  ;;  %41 = vst.msk [vmem:[#allocation4 + $0x28] sm:$0xff] %vm35_vm0, %v1811_v0  ;;  %1683 = vmatpush3.xpose.msk.msra.mxu1 %vm35_vm0, %v53_v2  ;;  %1684 = vmatprep.mubr.msk.f32.mxu1 %vm1812_vm1, %v1811_v0  ;;  %v54_v5 = vld [vmem:[%s2219_s1 + $0x10] sm:$0xff]  ;;  %v55_v6 = vld [vmem:[%s2219_s1 + $0x18] sm:$0xff] }
   0x4   :  { %42 = vst.msk [vmem:[#allocation4 + $0x30] sm:$0xff] %vm35_vm0, %v1811_v0  ;;  %43 = vst.msk [vmem:[#allocation4 + $0x38] sm:$0xff] %vm35_vm0, %v1811_v0  ;;  %1687 = vmatprep.subr.mxu0 %v1811_v0  ;;  %1692 = vmatprep.subr.mxu1 %v1811_v0  ;;  %v46_v7 = vld [vmem:[%s2220_s0 + $0x10] sm:$0xff]  ;;  %v47_v8 = vld [vmem:[%s2220_s0 + $0x18] sm:$0xff] }
   0x5   :  { %1680 = vmatmul.mubr.msk.f32.vlgmr.msra.gmra.mrb[0].mxu0 %vm35_vm0, %v44_v3  ;;  %v56_v9 = vld [vmem:[%s2219_s1 + $0x20] sm:$0xff]  ;;  %v57_v10 = vld [vmem:[%s2219_s1 + $0x28] sm:$0xff]  ;;  %v58_v13 = vld [vmem:[%s2219_s1 + $0x30] sm:$0xff]  ;;  %19 = vst.msk [vmem:[#allocation2] sm:$0xff] %vm18_vm2, %v1813_v17  ;;  %1761 = vset.pattern.permute.xlu0 %v1814_v50 }
   0x6   :  { %1685 = vmatmul.mubr.msk.f32.vlgmr.msra.gmra.mrb[0].mxu1 %vm35_vm0, %v45_v4  ;;  %1688 = vmatpush3.xpose.msk.msra.mxu0 %vm35_vm0, %v54_v5  ;;  %v48_v11 = vld [vmem:[%s2220_s0 + $0x20] sm:$0xff]  ;;  %v49_v12 = vld [vmem:[%s2220_s0 + $0x28] sm:$0xff]  ;;  %v59_v14 = vld [vmem:[%s2219_s1 + $0x38] sm:$0xff]  ;;  %20 = vst.msk [vmem:[#allocation2 + $0x8] sm:$0xff] %vm18_vm2, %v1813_v17 }
   0x7   :  { %1689 = vmatprep.mubr.msk.f32.mxu0 %vm1812_vm1, %v1811_v0  ;;  %1693 = vmatpush3.xpose.msk.msra.mxu1 %vm35_vm0, %v55_v6  ;;  %v50_v15 = vld [vmem:[%s2220_s0 + $0x30] sm:$0xff]  ;;  %v51_v16 = vld [vmem:[%s2220_s0 + $0x38] sm:$0xff]  ;;  %21 = vst.msk [vmem:[#allocation2 + $0x10] sm:$0xff] %vm18_vm2, %v1813_v17  ;;  %22 = vst.msk [vmem:[#allocation2 + $0x18] sm:$0xff] %vm18_vm2, %v1813_v17 }
   0x8   :  { %1694 = vmatprep.mubr.msk.f32.mxu1 %vm1812_vm1, %v1811_v0  ;;  %1697 = vmatprep.subr.mxu0 %v1811_v0  ;;  %23 = vst.msk [vmem:[#allocation2 + $0x20] sm:$0xff] %vm18_vm2, %v1813_v17  ;;  %24 = vst.msk [vmem:[#allocation2 + $0x28] sm:$0xff] %vm18_vm2, %v1813_v17 }
   0x9   :  { %1690 = vmatmul.mubr.msk.f32.vlgmr.msra.gmra.mrb[2].mxu0 %vm35_vm0, %v46_v7  ;;  %1702 = vmatprep.subr.mxu1 %v1811_v0  ;;  %25 = vst.msk [vmem:[#allocation2 + $0x30] sm:$0xff] %vm18_vm2, %v1813_v17  ;;  %26 = vst.msk [vmem:[#allocation2 + $0x38] sm:$0xff] %vm18_vm2, %v1813_v17 }
   0xa   :  { %1695 = vmatmul.mubr.msk.f32.vlgmr.msra.gmra.mrb[2].mxu1 %vm35_vm0, %v47_v8  ;;  %1698 = vmatpush3.xpose.msk.msra.mxu0 %vm35_vm0, %v56_v9  ;;  %27 = vst.msk [vmem:[#allocation3] sm:$0xff] %vm18_vm2, %v1811_v0  ;;  %28 = vst.msk [vmem:[#allocation3 + $0x8] sm:$0xff] %vm18_vm2, %v1811_v0 }
   0xb   :  { %1699 = vmatprep.mubr.msk.f32.mxu0 %vm1812_vm1, %v1811_v0  ;;  %1703 = vmatpush3.xpose.msk.msra.mxu1 %vm35_vm0, %v57_v10  ;;  %29 = vst.msk [vmem:[#allocation3 + $0x10] sm:$0xff] %vm18_vm2, %v1811_v0  ;;  %30 = vst.msk [vmem:[#allocation3 + $0x18] sm:$0xff] %vm18_vm2, %v1811_v0 }
   0xc   :  { %1704 = vmatprep.mubr.msk.f32.mxu1 %vm1812_vm1, %v1811_v0  ;;  %1707 = vmatprep.subr.mxu0 %v1811_v0  ;;  %31 = vst.msk [vmem:[#allocation3 + $0x20] sm:$0xff] %vm18_vm2, %v1811_v0  ;;  %32 = vst.msk [vmem:[#allocation3 + $0x28] sm:$0xff] %vm18_vm2, %v1811_v0  ;;  %v2001_v51 = vld [vmem:[#allocation2] sm:$0xff] }
   0xd   :  { %1700 = vmatmul.mubr.msk.f32.vlgmr.msra.gmra.mrb[4].mxu0 %vm35_vm0, %v48_v11  ;;  %1712 = vmatprep.subr.mxu1 %v1811_v0  ;;  %33 = vst.msk [vmem:[#allocation3 + $0x30] sm:$0xff] %vm18_vm2, %v1811_v0  ;;  %34 = vst.msk [vmem:[#allocation3 + $0x38] sm:$0xff] %vm18_vm2, %v1811_v0  ;;  %v2006_v54 = vld [vmem:[#allocation2 + $0x8] sm:$0xff] }
   0xe   :  { %1705 = vmatmul.mubr.msk.f32.vlgmr.msra.gmra.mrb[4].mxu1 %vm35_vm0, %v49_v12  ;;  %1708 = vmatpush3.xpose.msk.msra.mxu0 %vm35_vm0, %v58_v13  ;;  %v2008_v55 = vld [vmem:[#allocation2 + $0x10] sm:$0xff]  ;;  %v2021_v61 = vld [vmem:[#allocation2 + $0x18] sm:$0xff] }
   0xf   :  { %1709 = vmatprep.mubr.msk.f32.mxu0 %vm1812_vm1, %v1811_v0  ;;  %1713 = vmatpush3.xpose.msk.msra.mxu1 %vm35_vm0, %v59_v14  ;;  %v2023_v62 = vld [vmem:[#allocation2 + $0x20] sm:$0xff]  ;;  %v2040_v6 = vld [vmem:[#allocation2 + $0x28] sm:$0xff] }
  0x10   :  { %1714 = vmatprep.mubr.msk.f32.mxu1 %vm1812_vm1, %v1811_v0  ;;  %1717 = vmatprep.subr.mxu0 %v1811_v0  ;;  %v2042_v7 = vld [vmem:[#allocation2 + $0x30] sm:$0xff]  ;;  %v2059_v14 = vld [vmem:[#allocation2 + $0x38] sm:$0xff] }
  0x11   :  { %1710 = vmatmul.mubr.msk.f32.vlgmr.msra.gmra.mrb[6].mxu0 %vm35_vm0, %v50_v15  ;;  %1722 = vmatprep.subr.mxu1 %v1811_v0 }
  0x12   :  { %1715 = vmatmul.mubr.msk.f32.vlgmr.msra.gmra.mrb[6].mxu1 %vm35_vm0, %v51_v16  ;;  %1719 = vmatprep.mubr.msk.f32.mxu0 %vm1812_vm1, %v1811_v0 }
  0x13   :  { %1724 = vmatprep.mubr.msk.f32.mxu1 %vm1812_vm1, %v1811_v0  ;;  %1762 = vset.pattern.permute.xlu1 %v1814_v50 }
  0xd8   :  { %v141_v18 = vpop.f32.mrb[0].mxu0 }
  0xd9   :  { %v1969_v19 = vmul.f32 0.35355338, %v141_v18  ;;  %v1681_v20 = vpop.f32.mrb[1].mxu0  ;;  %v217_v21 = vpop.f32.mrb[0].mxu1  ;;  %v60_v18 = vld [vmem:[%s2221_s2] sm:$0xff] }
  0xda   :  { %v1971_v22 = vmul.f32 0.35355338, %v217_v21  ;;  %v1686_v23 = vpop.f32.mrb[1].mxu1  ;;  %1718 = vmatpush3.msra.mxu0 %v60_v18 }
  0xdb   :  { %v693_v24 = vsel %vm35_vm0, %v1969_v19, -inf  ;;  %1727 = vmatprep.subr.mxu0 %v1811_v0  ;;  %v61_v23 = vld [vmem:[%s2221_s2 + $0x8] sm:$0xff] }
  0xdc   :  { %694 = vmax.xlane.f32.xlu0 %v693_v24  ;;  %v293_v25 = vpop.f32.mrb[2].mxu0  ;;  %v696_v27 = vsel %vm35_vm0, %v1971_v22, -inf  ;;  %1723 = vmatpush3.msra.mxu1 %v61_v23 }
  0xdd   :  { %v1975_v26 = vmul.f32 0.35355338, %v293_v25  ;;  %v1691_v28 = vpop.f32.mrb[3].mxu0  ;;  %v369_v29 = vpop.f32.mrb[2].mxu1  ;;  %1732 = vmatprep.subr.mxu1 %v1811_v0 }
  0xde   :  { %v1979_v30 = vmul.f32 0.35355338, %v369_v29  ;;  %v1696_v31 = vpop.f32.mrb[3].mxu1 }
  0xdf   :  { %v699_v32 = vsel %vm35_vm0, %v1975_v26, -inf }
  0xe0   :  { %697 = vmax.xlane.f32.xlu0 %v696_v27  ;;  %700 = vmax.xlane.f32.xlu1 %v699_v32  ;;  %v445_v33 = vpop.f32.mrb[4].mxu0  ;;  %v702_v35 = vsel %vm35_vm0, %v1979_v30, -inf }
  0xe1   :  { %v1983_v34 = vmul.f32 0.35355338, %v445_v33  ;;  %v1701_v36 = vpop.f32.mrb[5].mxu0  ;;  %v521_v37 = vpop.f32.mrb[4].mxu1 }
  0xe2   :  { %v1987_v38 = vmul.f32 0.35355338, %v521_v37  ;;  %v1706_v39 = vpop.f32.mrb[5].mxu1 }
  0xe3   :  { %v705_v40 = vsel %vm35_vm0, %v1983_v34, -inf  ;;  %v62_v39 = vld [vmem:[%s2221_s2 + $0x10] sm:$0xff] }
  0xe4   :  { %703 = vmax.xlane.f32.xlu1 %v702_v35  ;;  %706 = vmax.xlane.f32.xlu0 %v705_v40  ;;  %v597_v41 = vpop.f32.mrb[6].mxu0  ;;  %v708_v43 = vsel %vm35_vm0, %v1987_v38, -inf }
  0xe5   :  { %v1991_v42 = vmul.f32 0.35355338, %v597_v41  ;;  %v1711_v44 = vpop.f32.mrb[7].mxu0  ;;  %v673_v45 = vpop.f32.mrb[6].mxu1 }
  0xe6   :  { %v1995_v46 = vmul.f32 0.35355338, %v673_v45  ;;  %v1716_v47 = vpop.f32.mrb[7].mxu1 }
  0xe7   :  { %v711_v48 = vsel %vm35_vm0, %v1991_v42, -inf }
  0xe8   :  { %709 = vmax.xlane.f32.xlu1 %v708_v43  ;;  %712 = vmax.xlane.f32.xlu0 %v711_v48  ;;  %v714_v49 = vsel %vm35_vm0, %v1995_v46, -inf  ;;  %v64_v48 = vld [vmem:[%s2221_s2 + $0x20] sm:$0xff] }
  0xec   :  { %715 = vmax.xlane.f32.xlu1 %v714_v49 }
 0x169   :  { %v695_v52 = vpop.xlane.xlu0 %694 }
 0x16a   :  { %v2004_v53 = vmax.f32 %v2001_v51, %v695_v52 }
 0x16c   :  { %v725_v56 = vsub.f32 %v2001_v51, %v2004_v53  ;;  %1526 = vst.msk [vmem:[#allocation2] sm:$0xff] %vm18_vm2, %v2004_v53  ;;  %751 = vperm.xlu0 %1761, %v2004_v53  }
 0x16d   :  { %v698_v57 = vpop.xlane.xlu0 %697  ;;  %v701_v58 = vpop.xlane.xlu1 %700 }
 0x16e   :  { %v2016_v59 = vmax.f32 %v2006_v54, %v698_v57  ;;  %v2019_v60 = vmax.f32 %v2008_v55, %v701_v58  ;;  %v65_v58 = vld [vmem:[%s2221_s2 + $0x28] sm:$0xff] }
 0x170   :  { %v726_v63 = vsub.f32 %v2006_v54, %v2016_v59  ;;  %1527 = vst.msk [vmem:[#allocation2 + $0x8] sm:$0xff] %vm18_vm2, %v2016_v59  ;;  %756 = vperm.xlu1 %1762, %v2016_v59   ;;  %v727_v1 = vsub.f32 %v2008_v55, %v2019_v60  ;;  %1528 = vst.msk [vmem:[#allocation2 + $0x10] sm:$0xff] %vm18_vm2, %v2019_v60 }
 0x171   :  { %v704_v2 = vpop.xlane.xlu1 %703  ;;  %v707_v3 = vpop.xlane.xlu0 %706 }
 0x172   :  { %v2035_v4 = vmax.f32 %v2021_v61, %v704_v2  ;;  %v2038_v5 = vmax.f32 %v2023_v62, %v707_v3 }
 0x174   :  { %761 = vperm.xlu1 %1762, %v2019_v60   ;;  %v728_v8 = vsub.f32 %v2021_v61, %v2035_v4  ;;  %1529 = vst.msk [vmem:[#allocation2 + $0x18] sm:$0xff] %vm18_vm2, %v2035_v4  ;;  %v729_v9 = vsub.f32 %v2023_v62, %v2038_v5  ;;  %1530 = vst.msk [vmem:[#allocation2 + $0x20] sm:$0xff] %vm18_vm2, %v2038_v5 }
 0x175   :  { %v710_v10 = vpop.xlane.xlu1 %709  ;;  %v713_v11 = vpop.xlane.xlu0 %712 }
 0x176   :  { %v2054_v12 = vmax.f32 %v2040_v6, %v710_v10  ;;  %v2057_v13 = vmax.f32 %v2042_v7, %v713_v11  ;;  %v741_v54 = vmul.f32 1.442695, %v729_v9 }
 0x178   :  { %766 = vperm.xlu1 %1762, %v2035_v4   ;;  %v730_v15 = vsub.f32 %v2040_v6, %v2054_v12  ;;  %1531 = vst.msk [vmem:[#allocation2 + $0x28] sm:$0xff] %vm18_vm2, %v2054_v12  ;;  %v731_v16 = vsub.f32 %v2042_v7, %v2057_v13  ;;  %1532 = vst.msk [vmem:[#allocation2 + $0x30] sm:$0xff] %vm18_vm2, %v2057_v13 }
 0x179   :  { %v716_v17 = vpop.xlane.xlu1 %715 }
 0x17a   :  { %v2074_v20 = vmax.f32 %v2059_v14, %v716_v17  ;;  %v66_v17 = vld [vmem:[%s2221_s2 + $0x30] sm:$0xff]  ;;  %v743_v51 = vmul.f32 1.442695, %v730_v15  ;;  %v745_v53 = vmul.f32 1.442695, %v731_v16 }
 0x17c   :  { %771 = vperm.xlu1 %1762, %v2038_v5   ;;  %v732_v21 = vsub.f32 %v2059_v14, %v2074_v20  ;;  %1533 = vst.msk [vmem:[#allocation2 + $0x38] sm:$0xff] %vm18_vm2, %v2074_v20  ;;  %v813_v5 = vld [vmem:[#allocation3] sm:$0xff]  ;;  %v815_v14 = vld [vmem:[#allocation3 + $0x10] sm:$0xff] }
 0x17e   :  { %v747_v55 = vmul.f32 1.442695, %v732_v21  ;;  %v816_v21 = vld [vmem:[#allocation3 + $0x18] sm:$0xff] }
 0x180   :  { %776 = vperm.xlu1 %1762, %v2054_v12  }
 0x184   :  { %781 = vperm.xlu1 %1762, %v2057_v13  }
 0x188   :  { %786 = vperm.xlu1 %1762, %v2074_v20  }
 0x1eb   :  { %v752_v24 = vpop.permute.xlu0 %751 }
 0x1ec   :  { %v789_v25 = vsub.f32 %v1969_v19, %v752_v24 }
 0x1ee   :  { %v797_v27 = vmul.f32 1.442695, %v789_v25 }
 0x1ef   :  { %v757_v28 = vpop.permute.xlu1 %756 }
 0x1f0   :  { %1763 = vpow2.f32 %v797_v27  ;;  %v790_v29 = vsub.f32 %v1971_v22, %v757_v28 }
 0x1f2   :  { %v799_v31 = vmul.f32 1.442695, %v790_v29 }
 0x1f3   :  { %v762_v32 = vpop.permute.xlu1 %761 }
 0x1f4   :  { %1765 = vpow2.f32 %v799_v31  ;;  %v791_v33 = vsub.f32 %v1975_v26, %v762_v32  ;;  %v63_v26 = vld [vmem:[%s2221_s2 + $0x18] sm:$0xff] }
 0x1f6   :  { %v801_v35 = vmul.f32 1.442695, %v791_v33  ;;  %v735_v33 = vmul.f32 1.442695, %v726_v63 }
 0x1f7   :  { %v767_v36 = vpop.permute.xlu1 %766 }
 0x1f8   :  { %1767 = vpow2.f32 %v801_v35  ;;  %v792_v37 = vsub.f32 %v1979_v30, %v767_v36  ;;  %v737_v35 = vmul.f32 1.442695, %v727_v1  ;;  %v739_v36 = vmul.f32 1.442695, %v728_v8  ;;  %v814_v8 = vld [vmem:[#allocation3 + $0x8] sm:$0xff] }
 0x1fa   :  { %v1764_v19 = vpop.eup %1763  ;;  %v803_v40 = vmul.f32 1.442695, %v792_v37 }
 0x1fb   :  { %v772_v41 = vpop.permute.xlu1 %771  ;;  %1720 = vmatmul.mubr.msk.f32.vlgmr.msra.gmra.mrb[8].mxu0 %vm35_vm0, %v1764_v19  ;;  %v829_v22 = vsel %vm35_vm0, %v1764_v19, 0.0 }
 0x1fc   :  { %1769 = vpow2.f32 %v803_v40  ;;  %v793_v43 = vsub.f32 %v1983_v34, %v772_v41  ;;  %830 = vadd.xlane.f32.xlu1 %v829_v22  ;;  %1728 = vmatpush3.msra.mxu0 %v62_v39  ;;  %v817_v41 = vld [vmem:[#allocation3 + $0x20] sm:$0xff] }
 0x1fd   :  { %1729 = vmatprep.mubr.msk.f32.mxu0 %vm1812_vm1, %v1811_v0  ;;  %1737 = vmatprep.subr.mxu0 %v1811_v0 }
 0x1fe   :  { %v1766_v30 = vpop.eup %1765  ;;  %v805_v44 = vmul.f32 1.442695, %v793_v43 }
 0x1ff   :  { %1725 = vmatmul.mubr.msk.f32.vlgmr.msra.gmra.mrb[8].mxu1 %vm35_vm0, %v1766_v30  ;;  %v777_v45 = vpop.permute.xlu1 %776  ;;  %v832_v47 = vsel %vm35_vm0, %v1766_v30, 0.0 }
 0x200   :  { %1771 = vpow2.f32 %v805_v44  ;;  %v794_v34 = vsub.f32 %v1987_v38, %v777_v45  ;;  %833 = vadd.xlane.f32.xlu0 %v832_v47  ;;  %1733 = vmatpush3.msra.mxu1 %v63_v26  ;;  %v818_v44 = vld [vmem:[#allocation3 + $0x28] sm:$0xff] }
 0x201   :  { %1734 = vmatprep.mubr.msk.f32.mxu1 %vm1812_vm1, %v1811_v0  ;;  %1742 = vmatprep.subr.mxu1 %v1811_v0 }
 0x202   :  { %v1768_v49 = vpop.eup %1767  ;;  %v807_v50 = vmul.f32 1.442695, %v794_v34 }
 0x203   :  { %v782_v52 = vpop.permute.xlu1 %781  ;;  %1730 = vmatmul.mubr.msk.f32.vlgmr.msra.gmra.mrb[10].mxu0 %vm35_vm0, %v1768_v49  ;;  %v835_v57 = vsel %vm35_vm0, %v1768_v49, 0.0  ;;  %v819_v49 = vld [vmem:[#allocation3 + $0x30] sm:$0xff] }
 0x204   :  { %1773 = vpow2.f32 %v807_v50  ;;  %v795_v38 = vsub.f32 %v1991_v42, %v782_v52  ;;  %836 = vadd.xlane.f32.xlu0 %v835_v57  ;;  %1738 = vmatpush3.msra.mxu0 %v64_v48 }
 0x205   :  { %1739 = vmatprep.mubr.msk.f32.mxu0 %vm1812_vm1, %v1811_v0  ;;  %1747 = vmatprep.subr.mxu0 %v1811_v0 }
 0x206   :  { %v1770_v2 = vpop.eup %1769  ;;  %v809_v3 = vmul.f32 1.442695, %v795_v38 }
 0x207   :  { %1735 = vmatmul.mubr.msk.f32.vlgmr.msra.gmra.mrb[10].mxu1 %vm35_vm0, %v1770_v2  ;;  %v787_v10 = vpop.permute.xlu1 %786  ;;  %v838_v11 = vsel %vm35_vm0, %v1770_v2, 0.0  ;;  %v820_v2 = vld [vmem:[#allocation3 + $0x38] sm:$0xff] }
 0x208   :  { %1775 = vpow2.f32 %v809_v3  ;;  %v796_v42 = vsub.f32 %v1995_v46, %v787_v10  ;;  %839 = vadd.xlane.f32.xlu1 %v838_v11  ;;  %1743 = vmatpush3.msra.mxu1 %v65_v58  ;;  %v67_v46 = vld [vmem:[%s2221_s2 + $0x38] sm:$0xff] }
 0x209   :  { %1744 = vmatprep.mubr.msk.f32.mxu1 %vm1812_vm1, %v1811_v0  ;;  %1752 = vmatprep.subr.mxu1 %v1811_v0 }
 0x20a   :  { %v1772_v18 = vpop.eup %1771  ;;  %v811_v23 = vmul.f32 1.442695, %v796_v42 }
 0x20b   :  { %1740 = vmatmul.mubr.msk.f32.vlgmr.msra.gmra.mrb[12].mxu0 %vm35_vm0, %v1772_v18  ;;  %v841_v24 = vsel %vm35_vm0, %v1772_v18, 0.0 }
 0x20c   :  { %1777 = vpow2.f32 %v811_v23  ;;  %842 = vadd.xlane.f32.xlu0 %v841_v24  ;;  %1748 = vmatpush3.msra.mxu0 %v66_v17 }
 0x20d   :  { %1749 = vmatprep.mubr.msk.f32.mxu0 %vm1812_vm1, %v1811_v0  ;;  %1779 = vpow2.f32 %v735_v33  ;;  %v870_v33 = vld [vmem:[#allocation4] sm:$0xff] }
 0x20e   :  { %v1774_v25 = vpop.eup %1773 }
 0x20f   :  { %1745 = vmatmul.mubr.msk.f32.vlgmr.msra.gmra.mrb[12].mxu1 %vm35_vm0, %v1774_v25  ;;  %v844_v27 = vsel %vm35_vm0, %v1774_v25, 0.0 }
 0x210   :  { %845 = vadd.xlane.f32.xlu1 %v844_v27  ;;  %1753 = vmatpush3.msra.mxu1 %v67_v46 }
 0x211   :  { %1754 = vmatprep.mubr.msk.f32.mxu1 %vm1812_vm1, %v1811_v0  ;;  %v733_v0 = vmul.f32 1.442695, %v725_v56 }
 0x212   :  { %v1776_v28 = vpop.eup %1775 }
 0x213   :  { %1750 = vmatmul.mubr.msk.f32.vlgmr.msra.gmra.mrb[14].mxu0 %vm35_vm0, %v1776_v28  ;;  %v847_v29 = vsel %vm35_vm0, %v1776_v28, 0.0  ;;  %1781 = vpow2.f32 %v733_v0 }
 0x214   :  { %848 = vadd.xlane.f32.xlu0 %v847_v29  ;;  %1783 = vpow2.f32 %v737_v35 }
 0x215   :  { %1785 = vpow2.f32 %v739_v36 }
 0x216   :  { %v1778_v31 = vpop.eup %1777  ;;  %1787 = vpow2.f32 %v741_v54  ;;  %v871_v54 = vld [vmem:[#allocation4 + $0x8] sm:$0xff] }
 0x217   :  { %1755 = vmatmul.mubr.msk.f32.vlgmr.msra.gmra.mrb[14].mxu1 %vm35_vm0, %v1778_v31  ;;  %v850_v32 = vsel %vm35_vm0, %v1778_v31, 0.0  ;;  %1789 = vpow2.f32 %v743_v51  ;;  %v1780_v56 = vpop.eup %1779 }
 0x218   :  { %851 = vadd.xlane.f32.xlu1 %v850_v32  ;;  %1791 = vpow2.f32 %v745_v53  ;;  %v822_v12 = vmul.f32 %v1780_v56, %v814_v8 }
 0x219   :  { %1793 = vpow2.f32 %v747_v55 }
 0x21d   :  { %v1782_v59 = vpop.eup %1781 }
 0x21e   :  { %v1784_v60 = vpop.eup %1783  ;;  %v821_v6 = vmul.f32 %v1782_v59, %v813_v5 }
 0x21f   :  { %v1786_v61 = vpop.eup %1785  ;;  %v823_v16 = vmul.f32 %v1784_v60, %v815_v14 }
 0x220   :  { %v1788_v62 = vpop.eup %1787  ;;  %v824_v19 = vmul.f32 %v1786_v61, %v816_v21  ;;  %v875_v21 = vld [vmem:[#allocation4 + $0x28] sm:$0xff] }
 0x221   :  { %v1790_v63 = vpop.eup %1789  ;;  %v825_v26 = vmul.f32 %v1788_v62, %v817_v41 }
 0x222   :  { %v1792_v1 = vpop.eup %1791  ;;  %v826_v34 = vmul.f32 %v1790_v63, %v818_v44 }
 0x223   :  { %v1794_v4 = vpop.eup %1793  ;;  %v827_v38 = vmul.f32 %v1792_v1, %v819_v49 }
 0x224   :  { %v828_v42 = vmul.f32 %v1794_v4, %v820_v2 }
 0x229   :  { %885 = vperm.xlu1 %1762, %v1780_v56  }
 0x22a   :  { %880 = vperm.xlu0 %1761, %v1782_v59   ;;  %v872_v59 = vld [vmem:[#allocation4 + $0x10] sm:$0xff] }
 0x22d   :  { %890 = vperm.xlu1 %1762, %v1784_v60  }
 0x22e   :  { %895 = vperm.xlu0 %1761, %v1786_v61  }
 0x231   :  { %900 = vperm.xlu1 %1762, %v1788_v62  }
 0x232   :  { %905 = vperm.xlu0 %1761, %v1790_v63  }
 0x235   :  { %910 = vperm.xlu1 %1762, %v1792_v1  }
 0x236   :  { %915 = vperm.xlu0 %1761, %v1794_v4   ;;  %v873_v4 = vld [vmem:[#allocation4 + $0x18] sm:$0xff] }
 0x289   :  { %v831_v7 = vpop.xlane.xlu1 %830 }
 0x28a   :  { %v853_v9 = vadd.f32 %v831_v7, %v821_v6 }
 0x28c   :  { %862 = vst.msk [vmem:[#allocation3] sm:$0xff] %vm18_vm2, %v853_v9 }
 0x28d   :  { %v834_v13 = vpop.xlane.xlu0 %833 }
 0x28e   :  { %v854_v15 = vadd.f32 %v834_v13, %v822_v12  ;;  %v874_v12 = vld [vmem:[#allocation4 + $0x20] sm:$0xff] }
 0x290   :  { %863 = vst.msk [vmem:[#allocation3 + $0x8] sm:$0xff] %vm18_vm2, %v854_v15 }
 0x291   :  { %v837_v20 = vpop.xlane.xlu0 %836 }
 0x292   :  { %v855_v37 = vadd.f32 %v837_v20, %v823_v16 }
 0x293   :  { %v1545_v39 = vld [vmem:[#allocation3] sm:$0xff] }
 0x294   :  { %864 = vst.msk [vmem:[#allocation3 + $0x10] sm:$0xff] %vm18_vm2, %v855_v37  ;;  %1795 = vrcp.f32 %v1545_v39 }
 0x295   :  { %v840_v40 = vpop.xlane.xlu1 %839 }
 0x296   :  { %v856_v22 = vadd.f32 %v840_v40, %v824_v19 }
 0x297   :  { %v1546_v43 = vld [vmem:[#allocation3 + $0x8] sm:$0xff] }
 0x298   :  { %865 = vst.msk [vmem:[#allocation3 + $0x18] sm:$0xff] %vm18_vm2, %v856_v22  ;;  %1797 = vrcp.f32 %v1546_v43  ;;  %v876_v22 = vld [vmem:[#allocation4 + $0x30] sm:$0xff] }
 0x299   :  { %v843_v30 = vpop.xlane.xlu0 %842 }
 0x29a   :  { %v857_v45 = vadd.f32 %v843_v30, %v825_v26 }
 0x29b   :  { %v1547_v47 = vld [vmem:[#allocation3 + $0x10] sm:$0xff] }
 0x29c   :  { %866 = vst.msk [vmem:[#allocation3 + $0x20] sm:$0xff] %vm18_vm2, %v857_v45  ;;  %1799 = vrcp.f32 %v1547_v47  ;;  %v877_v47 = vld [vmem:[#allocation4 + $0x38] sm:$0xff] }
 0x29d   :  { %v846_v48 = vpop.xlane.xlu1 %845 }
 0x29e   :  { %v1796_v50 = vpop.eup %1795  ;;  %v858_v52 = vadd.f32 %v846_v48, %v826_v34 }
 0x29f   :  { %1563 = vperm.xlu1 %1762, %v1796_v50   ;;  %v1548_v57 = vld [vmem:[#allocation3 + $0x18] sm:$0xff] }
 0x2a0   :  { %867 = vst.msk [vmem:[#allocation3 + $0x28] sm:$0xff] %vm18_vm2, %v858_v52  ;;  %1801 = vrcp.f32 %v1548_v57 }
 0x2a1   :  { %v849_v58 = vpop.xlane.xlu0 %848 }
 0x2a2   :  { %v1798_v3 = vpop.eup %1797  ;;  %v859_v10 = vadd.f32 %v849_v58, %v827_v38 }
 0x2a3   :  { %1568 = vperm.xlu0 %1761, %v1798_v3   ;;  %v1549_v11 = vld [vmem:[#allocation3 + $0x20] sm:$0xff] }
 0x2a4   :  { %868 = vst.msk [vmem:[#allocation3 + $0x30] sm:$0xff] %vm18_vm2, %v859_v10  ;;  %1803 = vrcp.f32 %v1549_v11 }
 0x2a5   :  { %v852_v17 = vpop.xlane.xlu1 %851 }
 0x2a6   :  { %v1800_v18 = vpop.eup %1799  ;;  %v860_v23 = vadd.f32 %v852_v17, %v828_v42 }
 0x2a7   :  { %1573 = vperm.xlu1 %1762, %v1800_v18   ;;  %v1550_v24 = vld [vmem:[#allocation3 + $0x28] sm:$0xff] }
 0x2a8   :  { %869 = vst.msk [vmem:[#allocation3 + $0x38] sm:$0xff] %vm18_vm2, %v860_v23  ;;  %1805 = vrcp.f32 %v1550_v24 }
 0x2a9   :  { %v881_v0 = vpop.permute.xlu0 %880  ;;  %v886_v35 = vpop.permute.xlu1 %885 }
 0x2aa   :  { %v1802_v46 = vpop.eup %1801  ;;  %v918_v36 = vmul.f32 %v881_v0, %v870_v33  ;;  %v919_v56 = vmul.f32 %v886_v35, %v871_v54 }
 0x2ab   :  { %1578 = vperm.xlu0 %1761, %v1802_v46   ;;  %v1551_v25 = vld [vmem:[#allocation3 + $0x30] sm:$0xff] }
 0x2ac   :  { %1807 = vrcp.f32 %v1551_v25 }
 0x2ad   :  { %v891_v60 = vpop.permute.xlu1 %890  ;;  %v896_v5 = vpop.permute.xlu0 %895 }
 0x2ae   :  { %v1804_v27 = vpop.eup %1803  ;;  %v920_v1 = vmul.f32 %v891_v60, %v872_v59  ;;  %v921_v9 = vmul.f32 %v896_v5, %v873_v4 }
 0x2af   :  { %1583 = vperm.xlu1 %1762, %v1804_v27   ;;  %v1552_v28 = vld [vmem:[#allocation3 + $0x38] sm:$0xff] }
 0x2b0   :  { %1809 = vrcp.f32 %v1552_v28 }
 0x2b1   :  { %v901_v13 = vpop.permute.xlu1 %900  ;;  %v906_v37 = vpop.permute.xlu0 %905 }
 0x2b2   :  { %v1806_v29 = vpop.eup %1805  ;;  %v922_v20 = vmul.f32 %v901_v13, %v874_v12  ;;  %v923_v41 = vmul.f32 %v906_v37, %v875_v21 }
 0x2b3   :  { %1588 = vperm.xlu0 %1761, %v1806_v29  }
 0x2b5   :  { %v911_v43 = vpop.permute.xlu1 %910  ;;  %v916_v34 = vpop.permute.xlu0 %915 }
 0x2b6   :  { %v1808_v31 = vpop.eup %1807  ;;  %v924_v45 = vmul.f32 %v911_v43, %v876_v22  ;;  %v925_v52 = vmul.f32 %v916_v34, %v877_v47 }
 0x2b7   :  { %1593 = vperm.xlu1 %1762, %v1808_v31  }
 0x2ba   :  { %v1810_v32 = vpop.eup %1809 }
 0x2bb   :  { %1598 = vperm.xlu0 %1761, %v1810_v32  }
 0x2ce   :  { %v995_v51 = vpop.f32.mrb[8].mxu0 }
 0x2cf   :  { %v1510_v53 = vadd.f32 %v995_v51, %v918_v36  ;;  %v1721_v55 = vpop.f32.mrb[9].mxu0 }
 0x2d1   :  { %1518 = vst.msk [vmem:[#allocation4] sm:$0xff] %vm35_vm0, %v1510_v53 }
 0x2d2   :  { %v1068_v61 = vpop.f32.mrb[8].mxu1 }
 0x2d3   :  { %v1511_v62 = vadd.f32 %v1068_v61, %v919_v56  ;;  %v1726_v63 = vpop.f32.mrb[9].mxu1 }
 0x2d5   :  { %1519 = vst.msk [vmem:[#allocation4 + $0x8] sm:$0xff] %vm35_vm0, %v1511_v62 }
 0x2d6   :  { %v1141_v6 = vpop.f32.mrb[10].mxu0 }
 0x2d7   :  { %v1512_v7 = vadd.f32 %v1141_v6, %v920_v1  ;;  %v1731_v8 = vpop.f32.mrb[11].mxu0 }
 0x2d8   :  { %v1537_v3 = vld [vmem:[#allocation4] sm:$0xff] }
 0x2d9   :  { %1520 = vst.msk [vmem:[#allocation4 + $0x10] sm:$0xff] %vm35_vm0, %v1512_v7 }
 0x2da   :  { %v1214_v14 = vpop.f32.mrb[10].mxu1 }
 0x2db   :  { %v1513_v15 = vadd.f32 %v1214_v14, %v921_v9  ;;  %v1736_v16 = vpop.f32.mrb[11].mxu1 }
 0x2dc   :  { %v1538_v11 = vld [vmem:[#allocation4 + $0x8] sm:$0xff] }
 0x2dd   :  { %1521 = vst.msk [vmem:[#allocation4 + $0x18] sm:$0xff] %vm35_vm0, %v1513_v15 }
 0x2de   :  { %v1287_v39 = vpop.f32.mrb[12].mxu0 }
 0x2df   :  { %v1514_v19 = vadd.f32 %v1287_v39, %v922_v20  ;;  %v1741_v40 = vpop.f32.mrb[13].mxu0 }
 0x2e0   :  { %v1539_v23 = vld [vmem:[#allocation4 + $0x10] sm:$0xff] }
 0x2e1   :  { %1522 = vst.msk [vmem:[#allocation4 + $0x20] sm:$0xff] %vm35_vm0, %v1514_v19 }
 0x2e2   :  { %v1360_v26 = vpop.f32.mrb[12].mxu1 }
 0x2e3   :  { %v1515_v30 = vadd.f32 %v1360_v26, %v923_v41  ;;  %v1746_v44 = vpop.f32.mrb[13].mxu1 }
 0x2e4   :  { %v1540_v46 = vld [vmem:[#allocation4 + $0x18] sm:$0xff] }
 0x2e5   :  { %1523 = vst.msk [vmem:[#allocation4 + $0x28] sm:$0xff] %vm35_vm0, %v1515_v30 }
 0x2e6   :  { %v1433_v48 = vpop.f32.mrb[14].mxu0 }
 0x2e7   :  { %v1516_v49 = vadd.f32 %v1433_v48, %v924_v45  ;;  %v1751_v50 = vpop.f32.mrb[15].mxu0 }
 0x2e8   :  { %v1541_v29 = vld [vmem:[#allocation4 + $0x20] sm:$0xff] }
 0x2e9   :  { %1524 = vst.msk [vmem:[#allocation4 + $0x30] sm:$0xff] %vm35_vm0, %v1516_v49 }
 0x2ea   :  { %v1506_v57 = vpop.f32.mrb[14].mxu1 }
 0x2eb   :  { %v1517_v38 = vadd.f32 %v1506_v57, %v925_v52  ;;  %v1756_v58 = vpop.f32.mrb[15].mxu1 }
 0x2ec   :  { %v1542_v32 = vld [vmem:[#allocation4 + $0x28] sm:$0xff] }
 0x2ed   :  { %1525 = vst.msk [vmem:[#allocation4 + $0x38] sm:$0xff] %vm35_vm0, %v1517_v38 }
 0x2f0   :  { %v1543_v36 = vld [vmem:[#allocation4 + $0x30] sm:$0xff] }
 0x2f4   :  { %v1544_v51 = vld [vmem:[#allocation4 + $0x38] sm:$0xff] }
 0x31e   :  { %v1564_v2 = vpop.permute.xlu1 %1563 }
 0x31f   :  { %v1601_v10 = vmul.f32 %v1564_v2, %v1537_v3 }
 0x321   :  { %1609 = vst.msk [vmem:[%s2222_s3] sm:$0xff] %vm35_vm0, %v1601_v10 }
 0x322   :  { %v1569_v42 = vpop.permute.xlu0 %1568 }
 0x323   :  { %v1602_v17 = vmul.f32 %v1569_v42, %v1538_v11 }
 0x325   :  { %1610 = vst.msk [vmem:[%s2222_s3 + $0x8] sm:$0xff] %vm35_vm0, %v1602_v17 }
 0x326   :  { %v1574_v18 = vpop.permute.xlu1 %1573 }
 0x327   :  { %v1603_v24 = vmul.f32 %v1574_v18, %v1539_v23 }
 0x329   :  { %1611 = vst.msk [vmem:[%s2222_s3 + $0x10] sm:$0xff] %vm35_vm0, %v1603_v24 }
 0x32a   :  { %v1579_v25 = vpop.permute.xlu0 %1578 }
 0x32b   :  { %v1604_v27 = vmul.f32 %v1579_v25, %v1540_v46 }
 0x32d   :  { %1612 = vst.msk [vmem:[%s2222_s3 + $0x18] sm:$0xff] %vm35_vm0, %v1604_v27 }
 0x32e   :  { %v1584_v28 = vpop.permute.xlu1 %1583 }
 0x32f   :  { %v1605_v31 = vmul.f32 %v1584_v28, %v1541_v29 }
 0x331   :  { %1613 = vst.msk [vmem:[%s2222_s3 + $0x20] sm:$0xff] %vm35_vm0, %v1605_v31 }
 0x332   :  { %v1589_v33 = vpop.permute.xlu0 %1588 }
 0x333   :  { %v1606_v0 = vmul.f32 %v1589_v33, %v1542_v32 }
 0x335   :  { %1614 = vst.msk [vmem:[%s2222_s3 + $0x28] sm:$0xff] %vm35_vm0, %v1606_v0 }
 0x336   :  { %v1594_v35 = vpop.permute.xlu1 %1593 }
 0x337   :  { %v1607_v54 = vmul.f32 %v1594_v35, %v1543_v36 }
 0x339   :  { %1615 = vst.msk [vmem:[%s2222_s3 + $0x30] sm:$0xff] %vm35_vm0, %v1607_v54 }
 0x33a   :  { %v1599_v53 = vpop.permute.xlu0 %1598 }
 0x33b   :  { %v1608_v55 = vmul.f32 %v1599_v53, %v1544_v51 }
 0x33d   :  { %1616 = vst.msk [vmem:[%s2222_s3 + $0x38] sm:$0xff] %vm35_vm0, %v1608_v55 }

// kernel: micro_llm_forward.41
= control target key start
LH: loop header
LB: loop body
LE: loop exit
PB: predicated region body
PF: predicated region fallthrough
CT: control target
= control target key end

     0   :  { %vm29_vm0 = vcmask 261120   ;;  %vm18_vm1 = vcmask 523264   ;;  %v165_v3 = vmov 0.0   ;;  %s221_s1 = inlined_call_operand.vmem [shape: f32[32,64], index: 1, kind: input, shape index: {}]   ;;  %s222_s0 = inlined_call_operand.vmem [shape: f32[16,32], index: 0, kind: input, shape index: {}]   ;;  %s223_s2 = inlined_call_operand.vmem [shape: f32[1,64], index: 2, kind: input, shape index: {}]   ;;  %s224_s3 = inlined_call_operand.vmem [shape: f32[16,64], index: 3, kind: output, shape index: {}]  }
   0x1   :  { %v25_v0 = vld [vmem:[%s221_s1] sm:$0xff]  ;;  %v26_v1 = vld [vmem:[%s221_s1 + $0x8] sm:$0xff]  ;;  %v27_v2 = vld [vmem:[%s221_s1 + $0x10] sm:$0xff]  ;;  %20 = vst.msk [vmem:[#allocation2 + $0x8] sm:$0xff] %vm18_vm1, %v165_v3 }
   0x2   :  { %19 = vst.msk [vmem:[#allocation2] sm:$0xff] %vm18_vm1, %v165_v3  ;;  %v156_v4 = vpack.c.bf16 %v26_v1, %v25_v0  ;;  %v28_v5 = vld [vmem:[%s221_s1 + $0x18] sm:$0xff]  ;;  %v23_v6 = vld [vmem:[%s222_s0] sm:$0xff]  ;;  %v24_v8 = vld [vmem:[%s222_s0 + $0x8] sm:$0xff] }
   0x3   :  { %v160_v7 = vpack.c.bf16 %v28_v5, %v27_v2  ;;  %153 = vmatprep.mubr.msk.f32.mxu0 %vm29_vm0, %v23_v6  ;;  %v138_v15 = vld [vmem:[%s223_s2] ss:$0 sm:$0xff] }
   0x4   :  { %157 = vmatprep.subr.bf16.mxu0 %v156_v4 }
   0x5   :  { %159 = vmatpush3.bf16.msra.mxu0 %v156_v4 }
   0x6   :  { %161 = vmatprep.subr.bf16.mxu0 %v160_v7 }
   0x8   :  { %v22_v9 = vld [vmem:[#allocation2 + $0x8] sm:$0xff] }
   0x9   :  { %163 = vmatpush3.bf16.msra.mxu0 %v160_v7  ;;  %v21_v10 = vld [vmem:[#allocation2] sm:$0xff] }
   0xc   :  { %154 = vmatmul.mubr.msk.f32.vlgmr.msra.gmra.mrb[0].mxu0 %vm29_vm0, %v24_v8 }
  0xdf   :  { %v155_v11 = vpop.f32.mrb[0].mxu0 }
  0xe0   :  { %v112_v12 = vadd.f32 %v155_v11, %v22_v9  ;;  %v102_v13 = vpop.f32.mrb[1].mxu0 }
  0xe1   :  { %v111_v14 = vadd.f32 %v102_v13, %v21_v10 }
  0xe2   :  { %115 = vst.msk [vmem:[#allocation2 + $0x8] sm:$0xff] %vm18_vm1, %v112_v12 }
  0xe3   :  { %114 = vst.msk [vmem:[#allocation2] sm:$0xff] %vm18_vm1, %v111_v14 }
  0xe9   :  { %v120_v16 = vld [vmem:[#allocation2 + $0x8] sm:$0xff] }
  0xea   :  { %v129_v17 = vadd.f32 %v138_v15, %v120_v16  ;;  %v119_v18 = vld [vmem:[#allocation2] sm:$0xff] }
  0xeb   :  { %v128_v19 = vadd.f32 %v138_v15, %v119_v18 }
  0xec   :  { %131 = vst.msk [vmem:[%s224_s3 + $0x8] sm:$0xff] %vm18_vm1, %v129_v17 }
  0xed   :  { %130 = vst.msk [vmem:[%s224_s3] sm:$0xff] %vm18_vm1, %v128_v19 }

// kernel: micro_llm_forward.53
= control target key start
LH: loop header
LB: loop body
LE: loop exit
PB: predicated region body
PF: predicated region fallthrough
CT: control target
= control target key end

     0   :  { %vm38_vm0 = vcmask 261120   ;;  %s456_s0 = inlined_call_operand.vmem [shape: f32[16,32], index: 0, kind: input, shape index: {}]   ;;  %s457_s1 = inlined_call_operand.vmem [shape: f32[32,64], index: 1, kind: input, shape index: {}]   ;;  %s458_s2 = inlined_call_operand.vmem [shape: f32[1,64], index: 2, kind: input, shape index: {}]   ;;  %s459_s3 = inlined_call_operand.vmem [shape: f32[64,64], index: 3, kind: input, shape index: {}]   ;;  %s460_s4 = inlined_call_operand.vmem [shape: f32[1,64], index: 4, kind: input, shape index: {}]   ;;  %s461_s5 = inlined_call_operand.hbm [shape: f32[16,64], index: 5, kind: output, shape index: {}]  }
   0x1   :  { %v27_v0 = vld [vmem:[%s457_s1] sm:$0xff]  ;;  %v28_v1 = vld [vmem:[%s457_s1 + $0x8] sm:$0xff]  ;;  %v29_v2 = vld [vmem:[%s457_s1 + $0x10] sm:$0xff] }
   0x2   :  { %v302_v3 = vpack.c.bf16 %v28_v1, %v27_v0  ;;  %v30_v4 = vld [vmem:[%s457_s1 + $0x18] sm:$0xff]  ;;  %v25_v5 = vld [vmem:[%s456_s0] sm:$0xff] }
   0x3   :  { %v306_v6 = vpack.c.bf16 %v30_v4, %v29_v2  ;;  %280 = vmatprep.mubr.msk.f32.mxu0 %vm38_vm0, %v25_v5 }
   0x4   :  { %10 = vsyncpa [#allocation4], 0  ;;  %303 = vmatprep.subr.bf16.mxu0 %v302_v3  ;;  %v26_v7 = vld [vmem:[%s456_s0 + $0x8] sm:$0xff]  ;;  %v135_v8 = vld [vmem:[%s459_s3] sm:$0xff]  ;;  %vm130_vm1 = vcmask 523264   ;;  %s357_s21 = smov [#allocation3]  }
   0x5   :  { %305 = vmatpush3.bf16.msra.mxu0 %v302_v3  ;;  %v136_v9 = vld [vmem:[%s459_s3 + $0x8] sm:$0xff]  ;;  %v137_v11 = vld [vmem:[%s459_s3 + $0x10] sm:$0xff]  ;;  %v138_v12 = vld [vmem:[%s459_s3 + $0x18] sm:$0xff]  ;;  %s239_s22 = sshll.u32 %s357_s21, 4  ;;  %s240_s22 = int_to_ptr.vmem [resolvable:$true] %s239_s22 }
   0x6   :  { %307 = vmatprep.subr.bf16.mxu0 %v306_v6  ;;  %v310_v10 = vpack.c.bf16 %v136_v9, %v135_v8  ;;  %v314_v13 = vpack.c.bf16 %v138_v12, %v137_v11  ;;  %v139_v14 = vld [vmem:[%s459_s3 + $0x20] sm:$0xff]  ;;  %v140_v15 = vld [vmem:[%s459_s3 + $0x28] sm:$0xff]  ;;  %v141_v17 = vld [vmem:[%s459_s3 + $0x30] sm:$0xff]  ;;  %s333_s23 = scalar_lea.vmem %s240_s22, 256  ;;  %p338_p1 = scmp.lt.s32.totalorder %s240_s22, %s240_s22 }
   0x7   :  { %v318_v16 = vpack.c.bf16 %v140_v15, %v139_v14  ;;  %v142_v18 = vld [vmem:[%s459_s3 + $0x38] sm:$0xff]  ;;  %v250_v20 = vld [vmem:[%s458_s2] ss:$0 sm:$0xff]  ;;  %p334_p0 = scmp.ne.s32.totalorder %s240_s22, %s333_s23  ;;  %p339_p2 = scmp.lt.s32.totalorder %s333_s23, %s333_s23 }
   0x8   :  { %311 = vmatprep.subr.bf16.mxu1 %v310_v10  ;;  %v322_v19 = vpack.c.bf16 %v142_v18, %v141_v17  ;;  %v253_v37 = vld [vmem:[%s460_s4] ss:$0 sm:$0xff] }
   0x9   :  { %309 = vmatpush3.bf16.msra.mxu0 %v306_v6  ;;  %313 = vmatpush3.bf16.msra.mxu1 %v310_v10  ;;  %p340_p3 = por %p339_p2, %p338_p1 }
   0xa   :  { %315 = vmatprep.subr.bf16.mxu1 %v314_v13 }
   0xb   :  { %p341_p4 = pnand %p340_p3, %p334_p0 }
   0xc   :  { %281 = vmatmul.mubr.msk.f32.vlgmr.msra.gmra.mrb[0].mxu0 %vm38_vm0, %v26_v7 }
   0xd   :  { %317 = vmatpush3.bf16.msra.mxu1 %v314_v13 }
   0xe   :  { %319 = vmatprep.subr.bf16.mxu1 %v318_v16 }
  0x11   :  { %321 = vmatpush3.bf16.msra.mxu1 %v318_v16 }
  0x12   :  { %323 = vmatprep.subr.bf16.mxu1 %v322_v19 }
  0x15   :  { %325 = vmatpush3.bf16.msra.mxu1 %v322_v19 }
  0xdf   :  { %v282_v21 = vpop.f32.mrb[0].mxu0 }
  0xe0   :  { %v117_v22 = vadd.f32 %v282_v21, %v250_v20  ;;  %v111_v23 = vpop.f32.mrb[1].mxu0 }
  0xe1   :  { %v112_v24 = vadd.f32 %v250_v20, %v111_v23 }
  0xe2   :  { %v123_v25 = vmul.f32 0.70710677, %v117_v22  ;;  %v121_v29 = vmul.f32 0.5, %v117_v22 }
  0xe3   :  { %v122_v26 = vmul.f32 0.70710677, %v112_v24  ;;  %v120_v31 = vmul.f32 0.5, %v112_v24 }
  0xe4   :  { %329 = verf.f32 %v123_v25 }
  0xe5   :  { %331 = verf.f32 %v122_v26 }
  0xee   :  { %v330_v27 = vpop.eup %329 }
  0xef   :  { %v332_v28 = vpop.eup %331  ;;  %v127_v30 = vadd.f32 1.0, %v330_v27 }
  0xf0   :  { %v126_v32 = vadd.f32 1.0, %v332_v28 }
  0xf1   :  { %v129_v33 = vmul.f32 %v127_v30, %v121_v29 }
  0xf2   :  { %v128_v34 = vmul.f32 %v126_v32, %v120_v31 }
  0xf3   :  { %132 = vst.msk [vmem:[#allocation2 + $0x8] sm:$0xff] %vm130_vm1, %v129_v33 }
  0xf4   :  { %131 = vst.msk [vmem:[#allocation2] sm:$0xff] %vm130_vm1, %v128_v34 }
  0xfa   :  { %v134_v36 = vld [vmem:[#allocation2 + $0x8] sm:$0xff] }
  0xfb   :  { %v133_v35 = vld [vmem:[#allocation2] sm:$0xff] }
  0xfc   :  { %299 = vmatprep.mubr.msk.f32.mxu1 %vm130_vm1, %v133_v35 }
  0xfd   :  { %300 = vmatmul.mubr.msk.f32.vlgmr.msra.gmra.mrb[0].mxu1 %vm130_vm1, %v134_v36 }
 0x1d0   :  { %v301_v38 = vpop.f32.mrb[0].mxu1 }
 0x1d1   :  { %v229_v39 = vadd.f32 %v301_v38, %v253_v37  ;;  %v223_v40 = vpop.f32.mrb[1].mxu1 }
 0x1d2   :  { %v224_v41 = vadd.f32 %v253_v37, %v223_v40 }
 0x1d3   :  { %233 = vst.msk [vmem:[#allocation3 + $0x8] sm:$0xff] %vm130_vm1, %v229_v39 }
 0x1d4   :  { %232 = vst.msk [vmem:[#allocation3] sm:$0xff] %vm130_vm1, %v224_v41 }
 0x1d5   :  { %344 = shalt.err (!%p341_p4)
}
 0x1d6   :  { %s345_s25 = scalar_lea.hbm %s461_s5, 256 }
 0x1d7   :  { %p346_p5 = scmp.ne.s32.totalorder %s461_s5, %s345_s25  ;;  %p349_p6 = scmp.lt.u32.totalorder %s345_s25, %s461_s5 }
 0x1d9   :  { %p351_p7 = pnand %p349_p6, %p346_p5 }
 0x1db   :  { %354 = shalt.err (!%p351_p7)
}
 0x1dc   :  { %s358_s30 = smov 128   ;;  %s359_s6 = smov 8  }
 0x1dd   :  { %245 = dma.vmem_to_hbm [thread:$0]  %s240_s22, 256, %s461_s5, [#allocation4], %s358_s30, %s358_s30, %s359_s6  }
 0x1de   :  { %355 = dma.done.wait [#allocation4], 256  }
 0x1df   :  { %356 = vsyncadd [#allocation4], 4294967040 }
 0x1e0   :  { %249 = vsyncpa [#allocation4], 1 }

</bundles_post_ra>
